<compile_context>
chip_gen: v7x
topology: tpu7x:2x2x1
jax: 0.10.0
libtpu: 0.0.40
codegen_flags: <defaults>
</compile_context>

<pallas_src>
import math
import functools

import jax
import jax.numpy as jnp
from jax.experimental import pallas as pl
from jax.experimental.pallas import tpu as pltpu


# ----------------------------- Pallas kernel ------------------------------ #
def _self_attn_kernel(x_ref, wq_ref, bq_ref, wk_ref, bk_ref, wv_ref, bv_ref,
                      wo_ref, bo_ref, o_ref, *, num_heads, scale):
    x = x_ref[0]                                          # (S, C) f32

    # 1x1-conv projections == per-pixel matmuls on the MXU.
    q = jnp.dot(x, wq_ref[...], preferred_element_type=jnp.float32) + bq_ref[...]
    k = jnp.dot(x, wk_ref[...], preferred_element_type=jnp.float32) + bk_ref[...]
    v = jnp.dot(x, wv_ref[...], preferred_element_type=jnp.float32) + bv_ref[...]

    S, C = q.shape
    d = C // num_heads

    head_outs = []
    for h in range(num_heads):                            # static unroll
        sl = slice(h * d, (h + 1) * d)
        qh, kh, vh = q[:, sl], k[:, sl], v[:, sl]         # (S, d)
        # scores scaled by 1/sqrt(dim) (full dim, matching the PyTorch module)
        s = jnp.dot(qh, kh.T, preferred_element_type=jnp.float32) * scale
        s = s - jnp.max(s, axis=-1, keepdims=True)
        p = jnp.exp(s)
        p = p / jnp.sum(p, axis=-1, keepdims=True)
        # TODO(synk): train-mode dropout on attention weights not implemented;
        # this kernel matches eval/inference semantics (dropout == identity).
        head_outs.append(jnp.dot(p, vh, preferred_element_type=jnp.float32))
    o_cat = jnp.concatenate(head_outs, axis=-1)           # (S, C)

    out = jnp.dot(o_cat, wo_ref[...], preferred_element_type=jnp.float32) + bo_ref[...]
    o_ref[0] = (x + out).astype(o_ref.dtype)              # residual


# ------------------------------ host wrapper ------------------------------ #
def self_attention_2d(x, params, num_heads):
    """x: (B, C, H, W) f32; params: [wq, bq, wk, bk, wv, bv, wo, bo]
       with w stored transposed as (C_in, C_out) and b as (1, C_out)."""
    B, C, H, W = x.shape
    assert C % num_heads == 0
    S = H * W
    x_sc = jnp.transpose(x, (0, 2, 3, 1)).reshape(B, S, C)   # (B, S, C)

    wq, bq, wk, bk, wv, bv, wo, bo = params
    scale = 1.0 / math.sqrt(C)

    x_spec = pl.BlockSpec((1, S, C), lambda b: (b, 0, 0))
    w_spec = pl.BlockSpec((C, C), lambda b: (0, 0))          # resident weights
    b_spec = pl.BlockSpec((1, C), lambda b: (0, 0))          # resident biases

    flops = B * (8 * S * C * C + 4 * S * S * C)
    cost = pl.CostEstimate(
        flops=flops,
        transcendentals=B * num_heads * S * S,
        bytes_accessed=2 * B * S * C * 4 + 4 * (C * C + C) * 4)

    out = pl.pallas_call(
        functools.partial(_self_attn_kernel, num_heads=num_heads, scale=scale),
        out_shape=jax.ShapeDtypeStruct((B, S, C), jnp.float32),
        grid_spec=pltpu.PrefetchScalarGridSpec(
            num_scalar_prefetch=0,
            grid=(B,),
            in_specs=[x_spec,
                      w_spec, b_spec, w_spec, b_spec,
                      w_spec, b_spec, w_spec, b_spec],
            out_specs=pl.BlockSpec((1, S, C), lambda b: (b, 0, 0)),
        ),
        compiler_params=pltpu.CompilerParams(
            dimension_semantics=("parallel",),
            vmem_limit_bytes=32 * 1024 * 1024),
        cost_estimate=cost,
    )(x_sc, wq, bq, wk, bk, wv, bv, wo, bo)

    return jnp.transpose(out.reshape(B, H, W, C), (0, 3, 1, 2))


# ------------------------- parameter construction ------------------------- #
def make_params(key, dim):
    """Mirror nn.Conv2d(dim, dim, 1) init; store W as [in, out], b as (1, out)."""
    bound = 1.0 / math.sqrt(dim)
    params = []
    for _ in range(4):          # q, k, v, o projections
        key, kw, kb = jax.random.split(key, 3)
        w = jax.random.uniform(kw, (dim, dim), jnp.float32, -bound, bound)
        b = jax.random.uniform(kb, (1, dim), jnp.float32, -bound, bound)
        params += [w, b]
    return params


# ------------------------------ pure-JAX ref ------------------------------ #
def self_attention_2d_ref(x, params, num_heads):
    B, C, H, W = x.shape
    S = H * W
    wq, bq, wk, bk, wv, bv, wo, bo = params
    hi = jax.lax.Precision.HIGHEST
    xf = x.reshape(B, C, S)                                   # (B, C, S)

    def conv1x1(z, w, b):                                     # w: [in, out]
        return jnp.einsum('io,bis->bos', w, z, precision=hi) + b.reshape(1, C, 1)

    q = conv1x1(xf, wq, bq)
    k = conv1x1(xf, wk, bk)
    v = conv1x1(xf, wv, bv)
    g = num_heads
    d = C // g
    q = q.reshape(B * g, d, S)
    k = k.reshape(B * g, d, S)
    v = v.reshape(B * g, d, S)
    a = jnp.einsum('bcs,bct->bst', q, k, precision=hi) / math.sqrt(C)
    a = jax.nn.softmax(a, axis=-1)
    o = jnp.einsum('bst,bct->bcs', a, v, precision=hi)
    o = o.reshape(B, C, S)
    out = conv1x1(o, wo, bo)
    return (xf + out).reshape(B, C, H, W)


if __name__ == "__main__":
    B, dim, num_heads, H, W = 2, 128, 8, 8, 8

    key = jax.random.PRNGKey(0)
    key, kx = jax.random.split(key)
    x = jax.random.normal(kx, (B, dim, H, W), jnp.float32)
    params = make_params(key, dim)

    out = self_attention_2d(x, params, num_heads)
    out = jax.block_until_ready(out)

    ref = self_attention_2d_ref(x, params, num_heads)
    assert out.shape == (B, dim, H, W)
    err = float(jnp.max(jnp.abs(out - ref)))
    assert jnp.allclose(out, ref, atol=2e-3, rtol=2e-3), f"mismatch vs reference, max abs err={err}"

    print("KERNEL_OK")
</pallas_src>

<mosaic_0001>
module attributes {stable_mosaic.version = 11 : i64} {
  func.func @_self_attn_kernel(%arg0: i32, %arg1: memref<1x64x128xf32, #tpu.memory_space<vmem>>, %arg2: memref<128x128xf32, #tpu.memory_space<vmem>>, %arg3: memref<1x128xf32, #tpu.memory_space<vmem>>, %arg4: memref<128x128xf32, #tpu.memory_space<vmem>>, %arg5: memref<1x128xf32, #tpu.memory_space<vmem>>, %arg6: memref<128x128xf32, #tpu.memory_space<vmem>>, %arg7: memref<1x128xf32, #tpu.memory_space<vmem>>, %arg8: memref<128x128xf32, #tpu.memory_space<vmem>>, %arg9: memref<1x128xf32, #tpu.memory_space<vmem>>, %arg10: memref<1x64x128xf32, #tpu.memory_space<vmem>>) attributes {dimension_semantics = [#tpu.dimension_semantics<parallel>], iteration_bounds = array<i64: 2>, scalar_prefetch = 0 : i64, scratch_operands = 0 : i64, tpu.core_type = #tpu.core_type<tc>, window_params = [{transform_indices = @transform_0, window_bounds = array<i64: 1, 64, 128>}, {pipeline_mode = #tpu.pipeline_mode<synchronous>, transform_indices = @transform_1, window_bounds = array<i64: 128, 128>}, {pipeline_mode = #tpu.pipeline_mode<synchronous>, transform_indices = @transform_2, window_bounds = array<i64: 1, 128>}, {pipeline_mode = #tpu.pipeline_mode<synchronous>, transform_indices = @transform_3, window_bounds = array<i64: 128, 128>}, {pipeline_mode = #tpu.pipeline_mode<synchronous>, transform_indices = @transform_4, window_bounds = array<i64: 1, 128>}, {pipeline_mode = #tpu.pipeline_mode<synchronous>, transform_indices = @transform_5, window_bounds = array<i64: 128, 128>}, {pipeline_mode = #tpu.pipeline_mode<synchronous>, transform_indices = @transform_6, window_bounds = array<i64: 1, 128>}, {pipeline_mode = #tpu.pipeline_mode<synchronous>, transform_indices = @transform_7, window_bounds = array<i64: 128, 128>}, {pipeline_mode = #tpu.pipeline_mode<synchronous>, transform_indices = @transform_8, window_bounds = array<i64: 1, 128>}, {transform_indices = @transform_9, window_bounds = array<i64: 1, 64, 128>}]} {
    %c0 = arith.constant 0 : index
    %c0_0 = arith.constant 0 : index
    %c0_1 = arith.constant 0 : index
    %0 = vector.load %arg1[%c0, %c0_0, %c0_1] : memref<1x64x128xf32, #tpu.memory_space<vmem>>, vector<1x64x128xf32>
    %1 = vector.shape_cast %0 : vector<1x64x128xf32> to vector<64x128xf32>
    %c0_2 = arith.constant 0 : index
    %c0_3 = arith.constant 0 : index
    %2 = vector.load %arg2[%c0_2, %c0_3] : memref<128x128xf32, #tpu.memory_space<vmem>>, vector<128x128xf32>
    %cst = arith.constant dense<0.000000e+00> : vector<64x128xf32>
    %3 = tpu.matmul %1, %2, %cst {dimension_numbers = #tpu.dot_dimension_numbers<[1], [0], [0], [1], [0, 0, 1, 1], [], []>} : vector<64x128xf32>, vector<128x128xf32>, vector<64x128xf32> -> vector<64x128xf32>
    %c0_4 = arith.constant 0 : index
    %c0_5 = arith.constant 0 : index
    %4 = vector.load %arg3[%c0_4, %c0_5] : memref<1x128xf32, #tpu.memory_space<vmem>>, vector<1x128xf32>
    %5 = vector.broadcast %4 : vector<1x128xf32> to vector<64x128xf32>
    %6 = arith.addf %3, %5 : vector<64x128xf32>
    %c0_6 = arith.constant 0 : index
    %c0_7 = arith.constant 0 : index
    %7 = vector.load %arg4[%c0_6, %c0_7] : memref<128x128xf32, #tpu.memory_space<vmem>>, vector<128x128xf32>
    %cst_8 = arith.constant dense<0.000000e+00> : vector<64x128xf32>
    %8 = tpu.matmul %1, %7, %cst_8 {dimension_numbers = #tpu.dot_dimension_numbers<[1], [0], [0], [1], [0, 0, 1, 1], [], []>} : vector<64x128xf32>, vector<128x128xf32>, vector<64x128xf32> -> vector<64x128xf32>
    %c0_9 = arith.constant 0 : index
    %c0_10 = arith.constant 0 : index
    %9 = vector.load %arg5[%c0_9, %c0_10] : memref<1x128xf32, #tpu.memory_space<vmem>>, vector<1x128xf32>
    %10 = vector.broadcast %9 : vector<1x128xf32> to vector<64x128xf32>
    %11 = arith.addf %8, %10 : vector<64x128xf32>
    %c0_11 = arith.constant 0 : index
    %c0_12 = arith.constant 0 : index
    %12 = vector.load %arg6[%c0_11, %c0_12] : memref<128x128xf32, #tpu.memory_space<vmem>>, vector<128x128xf32>
    %cst_13 = arith.constant dense<0.000000e+00> : vector<64x128xf32>
    %13 = tpu.matmul %1, %12, %cst_13 {dimension_numbers = #tpu.dot_dimension_numbers<[1], [0], [0], [1], [0, 0, 1, 1], [], []>} : vector<64x128xf32>, vector<128x128xf32>, vector<64x128xf32> -> vector<64x128xf32>
    %c0_14 = arith.constant 0 : index
    %c0_15 = arith.constant 0 : index
    %14 = vector.load %arg7[%c0_14, %c0_15] : memref<1x128xf32, #tpu.memory_space<vmem>>, vector<1x128xf32>
    %15 = vector.broadcast %14 : vector<1x128xf32> to vector<64x128xf32>
    %16 = arith.addf %13, %15 : vector<64x128xf32>
    %17 = vector.extract_strided_slice %6 {offsets = [0, 0], sizes = [64, 16], strides = [1, 1]} : vector<64x128xf32> to vector<64x16xf32>
    %18 = vector.extract_strided_slice %11 {offsets = [0, 0], sizes = [64, 16], strides = [1, 1]} : vector<64x128xf32> to vector<64x16xf32>
    %19 = vector.extract_strided_slice %16 {offsets = [0, 0], sizes = [64, 16], strides = [1, 1]} : vector<64x128xf32> to vector<64x16xf32>
    %20 = tpu.transpose %18, [1, 0] : vector<64x16xf32> -> vector<16x64xf32>
    %cst_16 = arith.constant dense<0.000000e+00> : vector<64x64xf32>
    %21 = tpu.matmul %17, %20, %cst_16 {dimension_numbers = #tpu.dot_dimension_numbers<[1], [0], [0], [1], [0, 0, 1, 1], [], []>} : vector<64x16xf32>, vector<16x64xf32>, vector<64x64xf32> -> vector<64x64xf32>
    %cst_17 = arith.constant 0.0883883461 : f32
    %22 = vector.broadcast %cst_17 : f32 to vector<64x64xf32>
    %23 = arith.mulf %21, %22 : vector<64x64xf32>
    %cst_18 = arith.constant dense<0xFF800000> : vector<64xf32>
    %24 = vector.multi_reduction <maximumf>, %23, %cst_18 [1] : vector<64x64xf32> to vector<64xf32>
    %25 = vector.shape_cast %24 : vector<64xf32> to vector<64x1xf32>
    %26 = vector.broadcast %25 : vector<64x1xf32> to vector<64x64xf32>
    %27 = arith.subf %23, %26 : vector<64x64xf32>
    %28 = math.exp %27 : vector<64x64xf32>
    %cst_19 = arith.constant dense<0.000000e+00> : vector<64xf32>
    %29 = vector.multi_reduction <add>, %28, %cst_19 [1] : vector<64x64xf32> to vector<64xf32>
    %30 = vector.shape_cast %29 : vector<64xf32> to vector<64x1xf32>
    %31 = vector.broadcast %30 : vector<64x1xf32> to vector<64x64xf32>
    %32 = arith.divf %28, %31 : vector<64x64xf32>
    %cst_20 = arith.constant dense<0.000000e+00> : vector<64x16xf32>
    %33 = tpu.matmul %32, %19, %cst_20 {dimension_numbers = #tpu.dot_dimension_numbers<[1], [0], [0], [1], [0, 0, 1, 1], [], []>} : vector<64x64xf32>, vector<64x16xf32>, vector<64x16xf32> -> vector<64x16xf32>
    %34 = vector.extract_strided_slice %6 {offsets = [0, 16], sizes = [64, 16], strides = [1, 1]} : vector<64x128xf32> to vector<64x16xf32>
    %35 = vector.extract_strided_slice %11 {offsets = [0, 16], sizes = [64, 16], strides = [1, 1]} : vector<64x128xf32> to vector<64x16xf32>
    %36 = vector.extract_strided_slice %16 {offsets = [0, 16], sizes = [64, 16], strides = [1, 1]} : vector<64x128xf32> to vector<64x16xf32>
    %37 = tpu.transpose %35, [1, 0] : vector<64x16xf32> -> vector<16x64xf32>
    %cst_21 = arith.constant dense<0.000000e+00> : vector<64x64xf32>
    %38 = tpu.matmul %34, %37, %cst_21 {dimension_numbers = #tpu.dot_dimension_numbers<[1], [0], [0], [1], [0, 0, 1, 1], [], []>} : vector<64x16xf32>, vector<16x64xf32>, vector<64x64xf32> -> vector<64x64xf32>
    %cst_22 = arith.constant 0.0883883461 : f32
    %39 = vector.broadcast %cst_22 : f32 to vector<64x64xf32>
    %40 = arith.mulf %38, %39 : vector<64x64xf32>
    %cst_23 = arith.constant dense<0xFF800000> : vector<64xf32>
    %41 = vector.multi_reduction <maximumf>, %40, %cst_23 [1] : vector<64x64xf32> to vector<64xf32>
    %42 = vector.shape_cast %41 : vector<64xf32> to vector<64x1xf32>
    %43 = vector.broadcast %42 : vector<64x1xf32> to vector<64x64xf32>
    %44 = arith.subf %40, %43 : vector<64x64xf32>
    %45 = math.exp %44 : vector<64x64xf32>
    %cst_24 = arith.constant dense<0.000000e+00> : vector<64xf32>
    %46 = vector.multi_reduction <add>, %45, %cst_24 [1] : vector<64x64xf32> to vector<64xf32>
    %47 = vector.shape_cast %46 : vector<64xf32> to vector<64x1xf32>
    %48 = vector.broadcast %47 : vector<64x1xf32> to vector<64x64xf32>
    %49 = arith.divf %45, %48 : vector<64x64xf32>
    %cst_25 = arith.constant dense<0.000000e+00> : vector<64x16xf32>
    %50 = tpu.matmul %49, %36, %cst_25 {dimension_numbers = #tpu.dot_dimension_numbers<[1], [0], [0], [1], [0, 0, 1, 1], [], []>} : vector<64x64xf32>, vector<64x16xf32>, vector<64x16xf32> -> vector<64x16xf32>
    %51 = vector.extract_strided_slice %6 {offsets = [0, 32], sizes = [64, 16], strides = [1, 1]} : vector<64x128xf32> to vector<64x16xf32>
    %52 = vector.extract_strided_slice %11 {offsets = [0, 32], sizes = [64, 16], strides = [1, 1]} : vector<64x128xf32> to vector<64x16xf32>
    %53 = vector.extract_strided_slice %16 {offsets = [0, 32], sizes = [64, 16], strides = [1, 1]} : vector<64x128xf32> to vector<64x16xf32>
    %54 = tpu.transpose %52, [1, 0] : vector<64x16xf32> -> vector<16x64xf32>
    %cst_26 = arith.constant dense<0.000000e+00> : vector<64x64xf32>
    %55 = tpu.matmul %51, %54, %cst_26 {dimension_numbers = #tpu.dot_dimension_numbers<[1], [0], [0], [1], [0, 0, 1, 1], [], []>} : vector<64x16xf32>, vector<16x64xf32>, vector<64x64xf32> -> vector<64x64xf32>
    %cst_27 = arith.constant 0.0883883461 : f32
    %56 = vector.broadcast %cst_27 : f32 to vector<64x64xf32>
    %57 = arith.mulf %55, %56 : vector<64x64xf32>
    %cst_28 = arith.constant dense<0xFF800000> : vector<64xf32>
    %58 = vector.multi_reduction <maximumf>, %57, %cst_28 [1] : vector<64x64xf32> to vector<64xf32>
    %59 = vector.shape_cast %58 : vector<64xf32> to vector<64x1xf32>
    %60 = vector.broadcast %59 : vector<64x1xf32> to vector<64x64xf32>
    %61 = arith.subf %57, %60 : vector<64x64xf32>
    %62 = math.exp %61 : vector<64x64xf32>
    %cst_29 = arith.constant dense<0.000000e+00> : vector<64xf32>
    %63 = vector.multi_reduction <add>, %62, %cst_29 [1] : vector<64x64xf32> to vector<64xf32>
    %64 = vector.shape_cast %63 : vector<64xf32> to vector<64x1xf32>
    %65 = vector.broadcast %64 : vector<64x1xf32> to vector<64x64xf32>
    %66 = arith.divf %62, %65 : vector<64x64xf32>
    %cst_30 = arith.constant dense<0.000000e+00> : vector<64x16xf32>
    %67 = tpu.matmul %66, %53, %cst_30 {dimension_numbers = #tpu.dot_dimension_numbers<[1], [0], [0], [1], [0, 0, 1, 1], [], []>} : vector<64x64xf32>, vector<64x16xf32>, vector<64x16xf32> -> vector<64x16xf32>
    %68 = vector.extract_strided_slice %6 {offsets = [0, 48], sizes = [64, 16], strides = [1, 1]} : vector<64x128xf32> to vector<64x16xf32>
    %69 = vector.extract_strided_slice %11 {offsets = [0, 48], sizes = [64, 16], strides = [1, 1]} : vector<64x128xf32> to vector<64x16xf32>
    %70 = vector.extract_strided_slice %16 {offsets = [0, 48], sizes = [64, 16], strides = [1, 1]} : vector<64x128xf32> to vector<64x16xf32>
    %71 = tpu.transpose %69, [1, 0] : vector<64x16xf32> -> vector<16x64xf32>
    %cst_31 = arith.constant dense<0.000000e+00> : vector<64x64xf32>
    %72 = tpu.matmul %68, %71, %cst_31 {dimension_numbers = #tpu.dot_dimension_numbers<[1], [0], [0], [1], [0, 0, 1, 1], [], []>} : vector<64x16xf32>, vector<16x64xf32>, vector<64x64xf32> -> vector<64x64xf32>
    %cst_32 = arith.constant 0.0883883461 : f32
    %73 = vector.broadcast %cst_32 : f32 to vector<64x64xf32>
    %74 = arith.mulf %72, %73 : vector<64x64xf32>
    %cst_33 = arith.constant dense<0xFF800000> : vector<64xf32>
    %75 = vector.multi_reduction <maximumf>, %74, %cst_33 [1] : vector<64x64xf32> to vector<64xf32>
    %76 = vector.shape_cast %75 : vector<64xf32> to vector<64x1xf32>
    %77 = vector.broadcast %76 : vector<64x1xf32> to vector<64x64xf32>
    %78 = arith.subf %74, %77 : vector<64x64xf32>
    %79 = math.exp %78 : vector<64x64xf32>
    %cst_34 = arith.constant dense<0.000000e+00> : vector<64xf32>
    %80 = vector.multi_reduction <add>, %79, %cst_34 [1] : vector<64x64xf32> to vector<64xf32>
    %81 = vector.shape_cast %80 : vector<64xf32> to vector<64x1xf32>
    %82 = vector.broadcast %81 : vector<64x1xf32> to vector<64x64xf32>
    %83 = arith.divf %79, %82 : vector<64x64xf32>
    %cst_35 = arith.constant dense<0.000000e+00> : vector<64x16xf32>
    %84 = tpu.matmul %83, %70, %cst_35 {dimension_numbers = #tpu.dot_dimension_numbers<[1], [0], [0], [1], [0, 0, 1, 1], [], []>} : vector<64x64xf32>, vector<64x16xf32>, vector<64x16xf32> -> vector<64x16xf32>
    %85 = vector.extract_strided_slice %6 {offsets = [0, 64], sizes = [64, 16], strides = [1, 1]} : vector<64x128xf32> to vector<64x16xf32>
    %86 = vector.extract_strided_slice %11 {offsets = [0, 64], sizes = [64, 16], strides = [1, 1]} : vector<64x128xf32> to vector<64x16xf32>
    %87 = vector.extract_strided_slice %16 {offsets = [0, 64], sizes = [64, 16], strides = [1, 1]} : vector<64x128xf32> to vector<64x16xf32>
    %88 = tpu.transpose %86, [1, 0] : vector<64x16xf32> -> vector<16x64xf32>
    %cst_36 = arith.constant dense<0.000000e+00> : vector<64x64xf32>
    %89 = tpu.matmul %85, %88, %cst_36 {dimension_numbers = #tpu.dot_dimension_numbers<[1], [0], [0], [1], [0, 0, 1, 1], [], []>} : vector<64x16xf32>, vector<16x64xf32>, vector<64x64xf32> -> vector<64x64xf32>
    %cst_37 = arith.constant 0.0883883461 : f32
    %90 = vector.broadcast %cst_37 : f32 to vector<64x64xf32>
    %91 = arith.mulf %89, %90 : vector<64x64xf32>
    %cst_38 = arith.constant dense<0xFF800000> : vector<64xf32>
    %92 = vector.multi_reduction <maximumf>, %91, %cst_38 [1] : vector<64x64xf32> to vector<64xf32>
    %93 = vector.shape_cast %92 : vector<64xf32> to vector<64x1xf32>
    %94 = vector.broadcast %93 : vector<64x1xf32> to vector<64x64xf32>
    %95 = arith.subf %91, %94 : vector<64x64xf32>
    %96 = math.exp %95 : vector<64x64xf32>
    %cst_39 = arith.constant dense<0.000000e+00> : vector<64xf32>
    %97 = vector.multi_reduction <add>, %96, %cst_39 [1] : vector<64x64xf32> to vector<64xf32>
    %98 = vector.shape_cast %97 : vector<64xf32> to vector<64x1xf32>
    %99 = vector.broadcast %98 : vector<64x1xf32> to vector<64x64xf32>
    %100 = arith.divf %96, %99 : vector<64x64xf32>
    %cst_40 = arith.constant dense<0.000000e+00> : vector<64x16xf32>
    %101 = tpu.matmul %100, %87, %cst_40 {dimension_numbers = #tpu.dot_dimension_numbers<[1], [0], [0], [1], [0, 0, 1, 1], [], []>} : vector<64x64xf32>, vector<64x16xf32>, vector<64x16xf32> -> vector<64x16xf32>
    %102 = vector.extract_strided_slice %6 {offsets = [0, 80], sizes = [64, 16], strides = [1, 1]} : vector<64x128xf32> to vector<64x16xf32>
    %103 = vector.extract_strided_slice %11 {offsets = [0, 80], sizes = [64, 16], strides = [1, 1]} : vector<64x128xf32> to vector<64x16xf32>
    %104 = vector.extract_strided_slice %16 {offsets = [0, 80], sizes = [64, 16], strides = [1, 1]} : vector<64x128xf32> to vector<64x16xf32>
    %105 = tpu.transpose %103, [1, 0] : vector<64x16xf32> -> vector<16x64xf32>
    %cst_41 = arith.constant dense<0.000000e+00> : vector<64x64xf32>
    %106 = tpu.matmul %102, %105, %cst_41 {dimension_numbers = #tpu.dot_dimension_numbers<[1], [0], [0], [1], [0, 0, 1, 1], [], []>} : vector<64x16xf32>, vector<16x64xf32>, vector<64x64xf32> -> vector<64x64xf32>
    %cst_42 = arith.constant 0.0883883461 : f32
    %107 = vector.broadcast %cst_42 : f32 to vector<64x64xf32>
    %108 = arith.mulf %106, %107 : vector<64x64xf32>
    %cst_43 = arith.constant dense<0xFF800000> : vector<64xf32>
    %109 = vector.multi_reduction <maximumf>, %108, %cst_43 [1] : vector<64x64xf32> to vector<64xf32>
    %110 = vector.shape_cast %109 : vector<64xf32> to vector<64x1xf32>
    %111 = vector.broadcast %110 : vector<64x1xf32> to vector<64x64xf32>
    %112 = arith.subf %108, %111 : vector<64x64xf32>
    %113 = math.exp %112 : vector<64x64xf32>
    %cst_44 = arith.constant dense<0.000000e+00> : vector<64xf32>
    %114 = vector.multi_reduction <add>, %113, %cst_44 [1] : vector<64x64xf32> to vector<64xf32>
    %115 = vector.shape_cast %114 : vector<64xf32> to vector<64x1xf32>
    %116 = vector.broadcast %115 : vector<64x1xf32> to vector<64x64xf32>
    %117 = arith.divf %113, %116 : vector<64x64xf32>
    %cst_45 = arith.constant dense<0.000000e+00> : vector<64x16xf32>
    %118 = tpu.matmul %117, %104, %cst_45 {dimension_numbers = #tpu.dot_dimension_numbers<[1], [0], [0], [1], [0, 0, 1, 1], [], []>} : vector<64x64xf32>, vector<64x16xf32>, vector<64x16xf32> -> vector<64x16xf32>
    %119 = vector.extract_strided_slice %6 {offsets = [0, 96], sizes = [64, 16], strides = [1, 1]} : vector<64x128xf32> to vector<64x16xf32>
    %120 = vector.extract_strided_slice %11 {offsets = [0, 96], sizes = [64, 16], strides = [1, 1]} : vector<64x128xf32> to vector<64x16xf32>
    %121 = vector.extract_strided_slice %16 {offsets = [0, 96], sizes = [64, 16], strides = [1, 1]} : vector<64x128xf32> to vector<64x16xf32>
    %122 = tpu.transpose %120, [1, 0] : vector<64x16xf32> -> vector<16x64xf32>
    %cst_46 = arith.constant dense<0.000000e+00> : vector<64x64xf32>
    %123 = tpu.matmul %119, %122, %cst_46 {dimension_numbers = #tpu.dot_dimension_numbers<[1], [0], [0], [1], [0, 0, 1, 1], [], []>} : vector<64x16xf32>, vector<16x64xf32>, vector<64x64xf32> -> vector<64x64xf32>
    %cst_47 = arith.constant 0.0883883461 : f32
    %124 = vector.broadcast %cst_47 : f32 to vector<64x64xf32>
    %125 = arith.mulf %123, %124 : vector<64x64xf32>
    %cst_48 = arith.constant dense<0xFF800000> : vector<64xf32>
    %126 = vector.multi_reduction <maximumf>, %125, %cst_48 [1] : vector<64x64xf32> to vector<64xf32>
    %127 = vector.shape_cast %126 : vector<64xf32> to vector<64x1xf32>
    %128 = vector.broadcast %127 : vector<64x1xf32> to vector<64x64xf32>
    %129 = arith.subf %125, %128 : vector<64x64xf32>
    %130 = math.exp %129 : vector<64x64xf32>
    %cst_49 = arith.constant dense<0.000000e+00> : vector<64xf32>
    %131 = vector.multi_reduction <add>, %130, %cst_49 [1] : vector<64x64xf32> to vector<64xf32>
    %132 = vector.shape_cast %131 : vector<64xf32> to vector<64x1xf32>
    %133 = vector.broadcast %132 : vector<64x1xf32> to vector<64x64xf32>
    %134 = arith.divf %130, %133 : vector<64x64xf32>
    %cst_50 = arith.constant dense<0.000000e+00> : vector<64x16xf32>
    %135 = tpu.matmul %134, %121, %cst_50 {dimension_numbers = #tpu.dot_dimension_numbers<[1], [0], [0], [1], [0, 0, 1, 1], [], []>} : vector<64x64xf32>, vector<64x16xf32>, vector<64x16xf32> -> vector<64x16xf32>
    %136 = vector.extract_strided_slice %6 {offsets = [0, 112], sizes = [64, 16], strides = [1, 1]} : vector<64x128xf32> to vector<64x16xf32>
    %137 = vector.extract_strided_slice %11 {offsets = [0, 112], sizes = [64, 16], strides = [1, 1]} : vector<64x128xf32> to vector<64x16xf32>
    %138 = vector.extract_strided_slice %16 {offsets = [0, 112], sizes = [64, 16], strides = [1, 1]} : vector<64x128xf32> to vector<64x16xf32>
    %139 = tpu.transpose %137, [1, 0] : vector<64x16xf32> -> vector<16x64xf32>
    %cst_51 = arith.constant dense<0.000000e+00> : vector<64x64xf32>
    %140 = tpu.matmul %136, %139, %cst_51 {dimension_numbers = #tpu.dot_dimension_numbers<[1], [0], [0], [1], [0, 0, 1, 1], [], []>} : vector<64x16xf32>, vector<16x64xf32>, vector<64x64xf32> -> vector<64x64xf32>
    %cst_52 = arith.constant 0.0883883461 : f32
    %141 = vector.broadcast %cst_52 : f32 to vector<64x64xf32>
    %142 = arith.mulf %140, %141 : vector<64x64xf32>
    %cst_53 = arith.constant dense<0xFF800000> : vector<64xf32>
    %143 = vector.multi_reduction <maximumf>, %142, %cst_53 [1] : vector<64x64xf32> to vector<64xf32>
    %144 = vector.shape_cast %143 : vector<64xf32> to vector<64x1xf32>
    %145 = vector.broadcast %144 : vector<64x1xf32> to vector<64x64xf32>
    %146 = arith.subf %142, %145 : vector<64x64xf32>
    %147 = math.exp %146 : vector<64x64xf32>
    %cst_54 = arith.constant dense<0.000000e+00> : vector<64xf32>
    %148 = vector.multi_reduction <add>, %147, %cst_54 [1] : vector<64x64xf32> to vector<64xf32>
    %149 = vector.shape_cast %148 : vector<64xf32> to vector<64x1xf32>
    %150 = vector.broadcast %149 : vector<64x1xf32> to vector<64x64xf32>
    %151 = arith.divf %147, %150 : vector<64x64xf32>
    %cst_55 = arith.constant dense<0.000000e+00> : vector<64x16xf32>
    %152 = tpu.matmul %151, %138, %cst_55 {dimension_numbers = #tpu.dot_dimension_numbers<[1], [0], [0], [1], [0, 0, 1, 1], [], []>} : vector<64x64xf32>, vector<64x16xf32>, vector<64x16xf32> -> vector<64x16xf32>
    %153 = tpu.concatenate %33, %50, %67, %84, %101, %118, %135, %152 in 1 : vector<64x16xf32>, vector<64x16xf32>, vector<64x16xf32>, vector<64x16xf32>, vector<64x16xf32>, vector<64x16xf32>, vector<64x16xf32>, vector<64x16xf32> -> vector<64x128xf32>
    %c0_56 = arith.constant 0 : index
    %c0_57 = arith.constant 0 : index
    %154 = vector.load %arg8[%c0_56, %c0_57] : memref<128x128xf32, #tpu.memory_space<vmem>>, vector<128x128xf32>
    %cst_58 = arith.constant dense<0.000000e+00> : vector<64x128xf32>
    %155 = tpu.matmul %153, %154, %cst_58 {dimension_numbers = #tpu.dot_dimension_numbers<[1], [0], [0], [1], [0, 0, 1, 1], [], []>} : vector<64x128xf32>, vector<128x128xf32>, vector<64x128xf32> -> vector<64x128xf32>
    %c0_59 = arith.constant 0 : index
    %c0_60 = arith.constant 0 : index
    %156 = vector.load %arg9[%c0_59, %c0_60] : memref<1x128xf32, #tpu.memory_space<vmem>>, vector<1x128xf32>
    %157 = vector.broadcast %156 : vector<1x128xf32> to vector<64x128xf32>
    %158 = arith.addf %155, %157 : vector<64x128xf32>
    %159 = arith.addf %1, %158 : vector<64x128xf32>
    %c0_61 = arith.constant 0 : index
    %c0_62 = arith.constant 0 : index
    %c0_63 = arith.constant 0 : index
    %160 = vector.load %arg10[%c0_61, %c0_62, %c0_63] : memref<1x64x128xf32, #tpu.memory_space<vmem>>, vector<1x64x128xf32>
    %161 = vector.shape_cast %160 : vector<1x64x128xf32> to vector<64x128xf32>
    %162 = vector.shape_cast %159 : vector<64x128xf32> to vector<1x64x128xf32>
    tpu.vector_store %arg10[%c0_61, %c0_62, %c0_63], %162 {strides = array<i32>} : memref<1x64x128xf32, #tpu.memory_space<vmem>>, vector<1x64x128xf32>,
    return
  }
  func.func @transform_0(%arg0: i32) -> (i32, i32, i32) {
    %c0_i32 = arith.constant 0 : i32
    %c0_i32_0 = arith.constant 0 : i32
    %c0_i32_1 = arith.constant 0 : i32
    return %arg0, %c0_i32, %c0_i32_0 : i32, i32, i32
  }
  func.func @transform_1(%arg0: i32) -> (i32, i32) {
    %c0_i32 = arith.constant 0 : i32
    %c0_i32_0 = arith.constant 0 : i32
    %c0_i32_1 = arith.constant 0 : i32
    return %c0_i32, %c0_i32_0 : i32, i32
  }
  func.func @transform_2(%arg0: i32) -> (i32, i32) {
    %c0_i32 = arith.constant 0 : i32
    %c0_i32_0 = arith.constant 0 : i32
    %c0_i32_1 = arith.constant 0 : i32
    return %c0_i32, %c0_i32_0 : i32, i32
  }
  func.func @transform_3(%arg0: i32) -> (i32, i32) {
    %c0_i32 = arith.constant 0 : i32
    %c0_i32_0 = arith.constant 0 : i32
    %c0_i32_1 = arith.constant 0 : i32
    return %c0_i32, %c0_i32_0 : i32, i32
  }
  func.func @transform_4(%arg0: i32) -> (i32, i32) {
    %c0_i32 = arith.constant 0 : i32
    %c0_i32_0 = arith.constant 0 : i32
    %c0_i32_1 = arith.constant 0 : i32
    return %c0_i32, %c0_i32_0 : i32, i32
  }
  func.func @transform_5(%arg0: i32) -> (i32, i32) {
    %c0_i32 = arith.constant 0 : i32
    %c0_i32_0 = arith.constant 0 : i32
    %c0_i32_1 = arith.constant 0 : i32
    return %c0_i32, %c0_i32_0 : i32, i32
  }
  func.func @transform_6(%arg0: i32) -> (i32, i32) {
    %c0_i32 = arith.constant 0 : i32
    %c0_i32_0 = arith.constant 0 : i32
    %c0_i32_1 = arith.constant 0 : i32
    return %c0_i32, %c0_i32_0 : i32, i32
  }
  func.func @transform_7(%arg0: i32) -> (i32, i32) {
    %c0_i32 = arith.constant 0 : i32
    %c0_i32_0 = arith.constant 0 : i32
    %c0_i32_1 = arith.constant 0 : i32
    return %c0_i32, %c0_i32_0 : i32, i32
  }
  func.func @transform_8(%arg0: i32) -> (i32, i32) {
    %c0_i32 = arith.constant 0 : i32
    %c0_i32_0 = arith.constant 0 : i32
    %c0_i32_1 = arith.constant 0 : i32
    return %c0_i32, %c0_i32_0 : i32, i32
  }
  func.func @transform_9(%arg0: i32) -> (i32, i32, i32) {
    %c0_i32 = arith.constant 0 : i32
    %c0_i32_0 = arith.constant 0 : i32
    %c0_i32_1 = arith.constant 0 : i32
    return %arg0, %c0_i32, %c0_i32_0 : i32, i32, i32
  }
}

</mosaic_0001>

<bundles_post_ra>
// kernel: tpu_custom_call.1
= control target key start
LH: loop header
LB: loop body
LE: loop exit
PB: predicated region body
PF: predicated region fallthrough
CT: control target
= control target key end

     0   :  { %s9143_s0 = inlined_call_operand.hbm [shape: f32[2,64,128], index: 0, kind: input, shape index: {}]   ;;  %s9144_s1 = inlined_call_operand.hbm [shape: f32[128,128], index: 1, kind: input, shape index: {}]   ;;  %s9145_s2 = inlined_call_operand.vmem [shape: f32[1,128], index: 2, kind: input, shape index: {}]   ;;  %s9146_s3 = inlined_call_operand.hbm [shape: f32[128,128], index: 3, kind: input, shape index: {}]   ;;  %s9147_s4 = inlined_call_operand.vmem [shape: f32[1,128], index: 4, kind: input, shape index: {}]   ;;  %s9148_s5 = inlined_call_operand.hbm [shape: f32[128,128], index: 5, kind: input, shape index: {}]   ;;  %s9149_s6 = inlined_call_operand.vmem [shape: f32[1,128], index: 6, kind: input, shape index: {}]   ;;  %s9150_s7 = inlined_call_operand.hbm [shape: f32[128,128], index: 7, kind: input, shape index: {}]   ;;  %s9151_s8 = inlined_call_operand.vmem [shape: f32[1,128], index: 8, kind: input, shape index: {}]   ;;  %s9152_s9 = inlined_call_operand.hbm [shape: f32[2,64,128], index: 9, kind: output, shape index: {}]  }
   0x1   :  { %9175 = sst [smem:[#allocation42_spill]] %s9152_s9 }
   0x2   :  { %14 = vsyncpa [#allocation3], 0 }
   0x3   :  { %16 = vsyncpa [#allocation3 + $0x1], 0 }
   0x4   :  { %17 = vsyncpa [#allocation6], 0 }
   0x5   :  { %18 = vsyncpa [#allocation9], 0 }
   0x6   :  { %19 = vsyncpa [#allocation4], 0 }
   0x7   :  { %21 = vsyncpa [#allocation4 + $0x1], 0  ;;  %s7380_s30 = smov 0   ;;  %s7382_s10 = smov 0  }
   0x8   :  { %s7384_s11 = smov 0   ;;  %s7386_s12 = smov 0  }
   0x9 LB: > { %9176 = sst [smem:[#allocation16_spill]] %s7299_s30  ;;  %s7401_s13 = sadd.s32 4294967295, %s7311_s12   ;;  %s7311_s12 = sphi %s7386_s12, %s9270_s12   ;;  %s7307_s11 = sphi %s7384_s11, %s9269_s11   ;;  %s7303_s10 = sphi %s7382_s10, %s9268_s10   ;;  %s7299_s30 = sphi %s7380_s30, %s9267_s30  }
   0xa   : > { %s4669_s14 = sadd.s32 4294967294, %s7311_s12   ;;  %p47_p0 = scmp.ne.s32.totalorder %s7303_s10, %s7299_s30 }
   0xb   : > { %p9153_p1 = scmp.eq.s32.totalorder %s7401_s13, 0  ;;  %p245_p3 = scmp.eq.s32.totalorder %s4669_s14, 1 }
   0xc   : > { %p4670_p5 = scmp.ge.s32.totalorder %s7311_s12, 1  ;;  %p252_p7 = scmp.lt.s32.totalorder %s7311_s12, 3 }
   0xd   : > { %p7410_p4 = por %p9153_p1, %p47_p0  ;;  %p7415_p6 = por %p245_p3, %p47_p0 }
   0xe   : > { %p7420_p8 = pnand %p4670_p5, %p252_p7  ;;  %s7313_s18 = smov [#allocation5]  }
   0xf   : > { %s9177_s15 = scalar_select %p7410_p4, 1, 0 }
  0x10   : > { %s9178_s16 = scalar_select %p7415_p6, 1, 0 }
  0x11   : > { %s9180_s17 = scalar_select %p7420_p8, 1, 0 }
  0x12   : > { %9179 = sst [smem:[#allocation17_spill]] %s9178_s16  ;;  %s264_s19 = sshll.u32 %s7313_s18, 4  ;;  %s7424_s19 = int_to_ptr.vmem [resolvable:$true] %s264_s19 }
  0x13   : > { %p6333_p9 = pneg %p7420_p8  ;;  %s7314_s21 = smov [#allocation8]  }
  0x14   : > { %s296_s22 = sshll.u32 %s7314_s21, 4  ;;  %s7315_s23 = smov [#allocation7]   ;;  %s7435_s22 = int_to_ptr.vmem [resolvable:$true] %s296_s22 }
  0x15   : > { %p7431_p11 = pnand %p6333_p9, %p9153_p1  ;;  %s7437_s24 = sshll.u32 %s7315_s23, 4  ;;  %s281_s24 = int_to_ptr.vmem [resolvable:$true] %s7437_s24 }
  0x16   : > { %s7095_s27 = scalar_lea.hbm %s9144_s1, 2048 }
  0x17   : > { %p7096_p12 = scmp.ne.s32.totalorder %s9144_s1, %s7095_s27  ;;  %p7447_p13 = pneg %p7431_p11 }
  0x18   : > { %p7102_p5 = scmp.lt.u32.totalorder %s7095_s27, %s9144_s1 }
  0x19   : > { %p7098_p0 = pnand %p7447_p13, %p7096_p12 }
  0x1b   : > { %p7099_p3 = pneg %p7098_p0 }
  0x1d   : > { %p7104_p7 = pnand %p7102_p5, %p7099_p3 }
  0x1f   : > { %7107 = shalt.err (!%p7104_p7)
}
  0x20   : > { %s7108_s23 = scalar_lea.vmem %s7424_s19, 2048  ;;  %p7116_p2 = scmp.lt.s32.totalorder %s7424_s19, %s7424_s19 }
  0x21   : > { %p7109_p9 = scmp.ne.s32.totalorder %s7424_s19, %s7108_s23  ;;  %p7117_p6 = scmp.lt.s32.totalorder %s7108_s23, %s7108_s23 }
  0x23   : > { %p7111_p10 = pnand %p7109_p9, %p7447_p13  ;;  %p7118_p12 = por %p7117_p6, %p7116_p2 }
  0x25   : > { %p7112_p1 = pneg %p7111_p10 }
  0x27   : > { %p7119_p0 = pnand %p7118_p12, %p7112_p1 }
  0x29   : > { %7122 = shalt.err (!%p7119_p0)
}
  0x2a   : > { %s7316_s25 = smov 128   ;;  %s7317_s26 = smov 8  }
  0x2b   : > { %6336 = dma.hbm_to_vmem [thread:$0]  (!%p7431_p11), %s9144_s1, 2048, %s7424_s19, [#allocation6], %s7316_s25, %s7316_s25, %s7317_s26  }
  0x2c   : > { %s7123_s21 = scalar_lea.hbm %s9148_s5, 2048 }
  0x2d   : > { %p7124_p1 = scmp.ne.s32.totalorder %s9148_s5, %s7123_s21  ;;  %p7130_p10 = scmp.lt.u32.totalorder %s7123_s21, %s9148_s5 }
  0x2f   : > { %p7126_p2 = pnand %p7124_p1, %p7447_p13 }
  0x31   : > { %p7127_p6 = pneg %p7126_p2 }
  0x33   : > { %p7132_p3 = pnand %p7130_p10, %p7127_p6 }
  0x35   : > { %7135 = shalt.err (!%p7132_p3)
}
  0x36   : > { %s7136_s19 = scalar_lea.vmem %s7435_s22, 2048  ;;  %p7144_p12 = scmp.lt.s32.totalorder %s7435_s22, %s7435_s22 }
  0x37   : > { %p7137_p5 = scmp.ne.s32.totalorder %s7435_s22, %s7136_s19  ;;  %p7145_p0 = scmp.lt.s32.totalorder %s7136_s19, %s7136_s19 }
  0x39   : > { %p7139_p7 = pnand %p7137_p5, %p7447_p13  ;;  %p7146_p1 = por %p7145_p0, %p7144_p12 }
  0x3b   : > { %p7140_p9 = pneg %p7139_p7 }
  0x3d   : > { %p7147_p2 = pnand %p7146_p1, %p7140_p9 }
  0x3f   : > { %7150 = shalt.err (!%p7147_p2)
}
  0x40   : > { %6342 = dma.hbm_to_vmem [thread:$0]  (!%p7431_p11), %s9148_s5, 2048, %s7435_s22, [#allocation9], %s7316_s25, %s7316_s25, %s7317_s26  }
  0x41   : > { %s7151_s28 = scalar_lea.hbm %s9146_s3, 2048 }
  0x42   : > { %p7152_p6 = scmp.ne.s32.totalorder %s9146_s3, %s7151_s28  ;;  %p7158_p5 = scmp.lt.u32.totalorder %s7151_s28, %s9146_s3 }
  0x44   : > { %p7154_p10 = pnand %p7152_p6, %p7447_p13 }
  0x46   : > { %p7155_p3 = pneg %p7154_p10 }
  0x48   : > { %p7160_p7 = pnand %p7158_p5, %p7155_p3 }
  0x4a   : > { %7163 = shalt.err (!%p7160_p7)
}
  0x4b   : > { %s7164_s19 = scalar_lea.vmem %s281_s24, 2048  ;;  %p7172_p1 = scmp.lt.s32.totalorder %s281_s24, %s281_s24 }
  0x4c   : > { %p7165_p9 = scmp.ne.s32.totalorder %s281_s24, %s7164_s19  ;;  %p7173_p2 = scmp.lt.s32.totalorder %s7164_s19, %s7164_s19 }
  0x4e   : > { %p7167_p12 = pnand %p7165_p9, %p7447_p13  ;;  %p7174_p4 = por %p7173_p2, %p7172_p1 }
  0x50   : > { %p7168_p0 = pneg %p7167_p12 }
  0x52   : > { %p7175_p8 = pnand %p7174_p4, %p7168_p0 }
  0x54   : > { %7178 = shalt.err (!%p7175_p8)
}
  0x55   : > { %6339 = dma.hbm_to_vmem [thread:$0]  (!%p7431_p11), %s9146_s3, 2048, %s281_s24, [#allocation6], %s7316_s25, %s7316_s25, %s7317_s26  }
  0x56   : > { %s7318_s30 = smov [#allocation10]   ;;  %s7179_s29 = scalar_lea.hbm %s9150_s7, 2048 }
  0x57   : > { %s312_s16 = sshll.u32 %s7318_s30, 4  ;;  %p7180_p4 = scmp.ne.s32.totalorder %s9150_s7, %s7179_s29  ;;  %s313_s16 = int_to_ptr.vmem [resolvable:$true] %s312_s16 }
  0x58   : > { %p7186_p10 = scmp.lt.u32.totalorder %s7179_s29, %s9150_s7 }
  0x59   : > { %p7182_p8 = pnand %p7180_p4, %p7447_p13 }
  0x5b   : > { %p7183_p6 = pneg %p7182_p8 }
  0x5d   : > { %p7188_p3 = pnand %p7186_p10, %p7183_p6 }
  0x5f   : > { %7191 = shalt.err (!%p7188_p3)
}
  0x60   : > { %s7192_s24 = scalar_lea.vmem %s313_s16, 2048  ;;  %p7200_p12 = scmp.lt.s32.totalorder %s313_s16, %s313_s16 }
  0x61   : > { %p7193_p5 = scmp.ne.s32.totalorder %s313_s16, %s7192_s24  ;;  %p7201_p0 = scmp.lt.s32.totalorder %s7192_s24, %s7192_s24 }
  0x63   : > { %p7195_p7 = pnand %p7193_p5, %p7447_p13  ;;  %p7202_p1 = por %p7201_p0, %p7200_p12 }
  0x65   : > { %p7196_p9 = pneg %p7195_p7 }
  0x67   : > { %p7203_p2 = pnand %p7202_p1, %p7196_p9 }
  0x69   : > { %7206 = shalt.err (!%p7203_p2)
}
  0x6a   : > { %6345 = dma.hbm_to_vmem [thread:$0]  (!%p7431_p11), %s9150_s7, 2048, %s313_s16, [#allocation9], %s7316_s25, %s7316_s25, %s7317_s26  }
  0x6b   : > { %s7541_s14 = sadd.s32 1, %s7311_s12   ;;  %s34_s20 = sadd.s32 1, %s7307_s11 }
  0x6c   : > { %s31_s30 = ssub.s32 %s7311_s12, %s7541_s14  ;;  %p41_p13 = scmp.ne.s32.totalorder %s7307_s11, %s7303_s10 }
  0x6d   : > { %p32_p4 = scmp.eq.s32.totalorder %s31_s30, 0  ;;  %p42_p8 = scmp.eq.s32.totalorder %s7311_s12, 0 }
  0x6e   : > { %p9183_p6 = scmp.eq.s32.totalorder %s7401_s13, 1  ;;  %p6358_p3 = scmp.lt.s32.totalorder %s7311_s12, 2 }
  0x6f   : > { %s7557_s28 = scalar_select %p32_p4, %s7307_s11, %s34_s20  }
  0x70   : > { %p7551_p10 = por %p9183_p6, %p41_p13  ;;  %p43_p5 = por %p42_p8, %p41_p13 }
  0x71   : > { %s329_s29 = sand.u32 1, %s7307_s11   ;;  %s4887_s16 = sshll.u32 %s7311_s12, 10 }
  0x72   : > { %s4676_s18 = sshll.u32 %s329_s29, 6  ;;  %s7564_s19 = scalar_lea.hbm %s9143_s0, %s4887_s16 }
  0x73   : > { %s333_s24 = scalar_lea.vmem [#allocation2], %s4676_s18  ;;  %p7568_p11 = pnand %p6358_p3, %p43_p5 }
  0x74   : > { %s340_s22 = sshll.u32 %s333_s24, 4  ;;  %s7572_s20 = scalar_lea.sflag [#allocation3], %s329_s29  ;;  %s7566_s22 = int_to_ptr.vmem [resolvable:$true] %s340_s22 }
  0x75   : > { %s7207_s30 = scalar_lea.hbm %s7564_s19, 1024  ;;  %p7209_p9 = pneg %p7568_p11 }
  0x76   : > { %p7208_p7 = scmp.ne.s32.totalorder %s7564_s19, %s7207_s30  ;;  %s7212_s21 = scalar_lea.hbm %s9143_s0, 2048 }
  0x77   : > { %p7213_p1 = scmp.lt.u32.totalorder %s7564_s19, %s9143_s0  ;;  %p7214_p2 = scmp.lt.u32.totalorder %s7212_s21, %s7207_s30 }
  0x78   : > { %p7210_p12 = pnand %p7209_p9, %p7208_p7  ;;  %p7216_p4 = scmp.lt.u32.totalorder %s7207_s30, %s7564_s19 }
  0x79   : > { %p7215_p13 = por %p7214_p2, %p7213_p1 }
  0x7a   : > { %p7211_p0 = pneg %p7210_p12 }
  0x7b   : > { %p7217_p8 = por %p7216_p4, %p7215_p13 }
  0x7d   : > { %p7218_p6 = pnand %p7217_p8, %p7211_p0 }
  0x7f   : > { %7221 = shalt.err (!%p7218_p6)
}
  0x80   : > { %s7222_s29 = scalar_lea.vmem %s7566_s22, 1024  ;;  %s7319_s18 = smov [#allocation2]  }
  0x81   : > { %p7223_p3 = scmp.ne.s32.totalorder %s7566_s22, %s7222_s29  ;;  %s7227_s16 = sshll.u32 %s7319_s18, 4  ;;  %s7228_s16 = int_to_ptr.vmem [resolvable:$false] %s7227_s16 }
  0x82   : > { %s7229_s23 = scalar_lea.vmem %s7228_s16, 2048  ;;  %p7230_p12 = scmp.lt.s32.totalorder %s7566_s22, %s7228_s16 }
  0x83   : > { %p7225_p5 = pnand %p7223_p3, %p7209_p9  ;;  %p7231_p1 = scmp.lt.s32.totalorder %s7229_s23, %s7222_s29 }
  0x85   : > { %p7226_p7 = pneg %p7225_p5  ;;  %p7232_p2 = por %p7231_p1, %p7230_p12 }
  0x87   : > { %p7233_p13 = pnand %p7232_p2, %p7226_p7 }
  0x89   : > { %7236 = shalt.err (!%p7233_p13)
}
  0x8a   : > { %6349 = dma.hbm_to_vmem [thread:$0]  (!%p7568_p11), %s7564_s19, 1024, %s7566_s22, %s7572_s20, %s7316_s25, %s7316_s25, %s7317_s26  }
  0x8b   : > { %p9186_p9 = scmp.ne.s32.totalorder %s9180_s17, 0 }
  0x8d   : > { %352 = sbr.rel (%p9186_p9) target bundleno = 5792 (0x16a0), region = 56 }
  0x94   : > { %s7606_s30 = sand.u32 1, %s7303_s10   ;;  %p9187_p0 = scmp.ne.s32.totalorder %s9177_s15, 0 }
  0x95   : > { %s4680_s21 = sshll.u32 %s7606_s30, 6  ;;  %s355_s24 = scalar_lea.sflag [#allocation3], %s7606_s30 }
  0x96   : > { %s7612_s9 = scalar_lea.vmem [#allocation2], %s4680_s21 }
  0x97   : > { %7282 = dma.done.wait (%p9187_p0), %s355_s24, 1024  }
  0x98   : > { %7284 = vsyncadd (%p9187_p0), %s355_s24, 4294966272  ;;  %p9188_p11 = scmp.eq.s32.totalorder %s7401_s13, 0 }
  0x9a   : > { %7286 = dma.done.wait (%p9188_p11), [#allocation6], 4096   ;;  %p9189_p4 = pmov %p9188_p11 }
  0x9c   : > { %7288 = vsyncadd (%p9189_p4), [#allocation6], 4294963200  ;;  %p9190_p8 = pmov %p9189_p4 }
  0x9d   : > { %p9191_p6 = pmov %p9189_p4 }
  0x9e   : > { %7290 = dma.done.wait (%p9190_p8), [#allocation9], 4096  }
  0x9f   : > { %7292 = vsyncadd (%p9191_p6), [#allocation9], 4294963200  ;;  %v545_v0 = vld [vmem:[#allocation7] sm:$0xff]  ;;  %v546_v1 = vld [vmem:[#allocation7 + $0x8] sm:$0xff]  ;;  %vm801_vm0 = vcmask 130048   ;;  %vm963_vm2 = vcmask 523264  }
  0xa0   : > { %v547_v2 = vld [vmem:[#allocation7 + $0x10] sm:$0xff]  ;;  %v5897_v3 = vpack.c.bf16 %v546_v1, %v545_v0  ;;  %v548_v4 = vld [vmem:[#allocation7 + $0x18] sm:$0xff]  ;;  %v549_v6 = vld [vmem:[#allocation7 + $0x20] sm:$0xff]  ;;  %s7320_s20 = smov 112   ;;  %s7321_s29 = smov 96   ;;  %vm4347_vm3 = vcmask 261120  }
  0xa1   : > { %v5901_v5 = vpack.c.bf16 %v548_v4, %v547_v2  ;;  %v550_v7 = vld [vmem:[#allocation7 + $0x28] sm:$0xff]  ;;  %v551_v9 = vld [vmem:[#allocation7 + $0x30] sm:$0xff]  ;;  %v7627_v10 = vld [vmem:[%s7612_s9] sm:$0xff]  ;;  %s7322_s18 = smov 80   ;;  %s7323_s16 = smov 64   ;;  %vm4356_vm4 = vcmask 392192  }
  0xa2   : > { %5898 = vmatprep.subr.bf16.mxu1 %v5897_v3  ;;  %v5905_v8 = vpack.c.bf16 %v550_v7, %v549_v6  ;;  %v417_v11 = vld [vmem:[#allocation5] sm:$0xff]  ;;  %v552_v12 = vld [vmem:[#allocation7 + $0x38] sm:$0xff]  ;;  %5317 = vmatprep.mubr.f32.mxu1 %v7627_v10  ;;  %v418_v13 = vld [vmem:[#allocation5 + $0x8] sm:$0xff]  ;;  %s7324_s23 = smov 48   ;;  %s7325_s24 = smov 32   ;;  %vm4373_vm5 = vcmask 654336  }
  0xa3   : > { %5900 = vmatpush3.bf16.msra.mxu1 %v5897_v3  ;;  %v419_v14 = vld [vmem:[#allocation5 + $0x10] sm:$0xff]  ;;  %5273 = vmatprep.mubr.f32.mxu0 %v7627_v10  ;;  %v5865_v15 = vpack.c.bf16 %v418_v13, %v417_v11  ;;  %v420_v16 = vld [vmem:[#allocation5 + $0x18] sm:$0xff]  ;;  %v421_v18 = vld [vmem:[#allocation5 + $0x20] sm:$0xff]  ;;  %v5909_v20 = vpack.c.bf16 %v552_v12, %v551_v9  ;;  %s7326_s15 = smov 16   ;;  %vm4382_vm6 = vcmask 785408   ;;  %vm4391_vm7 = vcmask 916480  }
  0xa4   : > { %5902 = vmatprep.subr.bf16.mxu1 %v5901_v5  ;;  %v5869_v17 = vpack.c.bf16 %v420_v16, %v419_v14  ;;  %v422_v19 = vld [vmem:[#allocation5 + $0x28] sm:$0xff]  ;;  %v553_v21 = vld [vmem:[#allocation7 + $0x40] sm:$0xff]  ;;  %v423_v24 = vld [vmem:[#allocation5 + $0x30] sm:$0xff]  ;;  %s9076_s26 = scalar_lea.vmem [#allocation11], %s4680_s21  ;;  %s4888_s19 = sshll.u32 %s7401_s13, 10 }
  0xa5   : > { %5866 = vmatprep.subr.bf16.mxu0 %v5865_v15  ;;  %v554_v22 = vld [vmem:[#allocation7 + $0x48] sm:$0xff]  ;;  %v5873_v23 = vpack.c.bf16 %v422_v19, %v421_v18  ;;  %v424_v25 = vld [vmem:[#allocation5 + $0x38] sm:$0xff]  ;;  %v555_v27 = vld [vmem:[#allocation7 + $0x50] sm:$0xff]  ;;  %s4558_s21 = sshll.u32 %s9076_s26, 4  ;;  %s4545_s13 = scalar_lea.sflag [#allocation4], %s7606_s30  ;;  %s9090_s21 = int_to_ptr.vmem [resolvable:$true] %s4558_s21 }
  0xa6   : > { %5868 = vmatpush3.bf16.msra.mxu0 %v5865_v15  ;;  %v5913_v26 = vpack.c.bf16 %v554_v22, %v553_v21  ;;  %v556_v28 = vld [vmem:[#allocation7 + $0x58] sm:$0xff]  ;;  %v5877_v29 = vpack.c.bf16 %v424_v25, %v423_v24  ;;  %v425_v30 = vld [vmem:[#allocation5 + $0x40] sm:$0xff]  ;;  %v426_v31 = vld [vmem:[#allocation5 + $0x48] sm:$0xff] }
  0xa7   : > { %5904 = vmatpush3.bf16.msra.mxu1 %v5901_v5  ;;  %5870 = vmatprep.subr.bf16.mxu0 %v5869_v17  ;;  %v5917_v32 = vpack.c.bf16 %v556_v28, %v555_v27  ;;  %v557_v33 = vld [vmem:[#allocation7 + $0x60] sm:$0xff]  ;;  %v558_v34 = vld [vmem:[#allocation7 + $0x68] sm:$0xff]  ;;  %v5881_v35 = vpack.c.bf16 %v426_v31, %v425_v30  ;;  %v427_v36 = vld [vmem:[#allocation5 + $0x50] sm:$0xff] }
  0xa8   : > { %5906 = vmatprep.subr.bf16.mxu1 %v5905_v8  ;;  %v428_v37 = vld [vmem:[#allocation5 + $0x58] sm:$0xff]  ;;  %v5921_v38 = vpack.c.bf16 %v558_v34, %v557_v33  ;;  %v559_v39 = vld [vmem:[#allocation7 + $0x70] sm:$0xff]  ;;  %v429_v42 = vld [vmem:[#allocation5 + $0x60] sm:$0xff] }
  0xa9   : > { %v560_v40 = vld [vmem:[#allocation7 + $0x78] sm:$0xff]  ;;  %v5885_v41 = vpack.c.bf16 %v428_v37, %v427_v36  ;;  %v430_v43 = vld [vmem:[#allocation5 + $0x68] sm:$0xff]  ;;  %v431_v46 = vld [vmem:[#allocation5 + $0x70] sm:$0xff] }
  0xaa   : > { %5872 = vmatpush3.bf16.msra.mxu0 %v5869_v17  ;;  %v5925_v44 = vpack.c.bf16 %v560_v40, %v559_v39  ;;  %v5889_v45 = vpack.c.bf16 %v430_v43, %v429_v42  ;;  %v432_v47 = vld [vmem:[#allocation5 + $0x78] sm:$0xff]  ;;  %v7632_v49 = vld [vmem:[%s7612_s9 + $0x8] sm:$0xff]  ;;  %v7635_v50 = vld [vmem:[%s7612_s9 + $0x10] sm:$0xff] }
  0xab   : > { %5908 = vmatpush3.bf16.msra.mxu1 %v5905_v8  ;;  %5874 = vmatprep.subr.bf16.mxu0 %v5873_v23  ;;  %v5893_v48 = vpack.c.bf16 %v432_v47, %v431_v46  ;;  %v7640_v51 = vld [vmem:[%s7612_s9 + $0x18] sm:$0xff]  ;;  %v7643_v52 = vld [vmem:[%s7612_s9 + $0x20] sm:$0xff]  ;;  %v7648_v53 = vld [vmem:[%s7612_s9 + $0x28] sm:$0xff] }
  0xac   : > { %5910 = vmatprep.subr.bf16.mxu1 %v5909_v20  ;;  %v7651_v54 = vld [vmem:[%s7612_s9 + $0x30] sm:$0xff]  ;;  %v7658_v55 = vld [vmem:[%s7612_s9 + $0x38] sm:$0xff]  ;;  %v4687_v56 = vld [vmem:[%s9147_s4] ss:$0 sm:$0xff] }
  0xad   : > { %vm7672_vm1 = vmpackc.low %vm801_vm0, %vm801_vm0  ;;  %v4686_v3 = vld [vmem:[%s9145_s2] ss:$0 sm:$0xff]  ;;  %v674_v36 = vld [vmem:[#allocation8 + $0x8] sm:$0xff] }
  0xae   : > { %5876 = vmatpush3.bf16.msra.mxu0 %v5873_v23  ;;  %v675_v37 = vld [vmem:[#allocation8 + $0x10] sm:$0xff]  ;;  %v676_v39 = vld [vmem:[#allocation8 + $0x18] sm:$0xff]  ;;  %v678_v42 = vld [vmem:[#allocation8 + $0x28] sm:$0xff] }
  0xaf   : > { %5912 = vmatpush3.bf16.msra.mxu1 %v5909_v20  ;;  %5878 = vmatprep.subr.bf16.mxu0 %v5877_v29  ;;  %v5933_v40 = vpack.c.bf16 %v676_v39, %v675_v37  ;;  %v681_v47 = vld [vmem:[#allocation8 + $0x40] sm:$0xff] }
  0xb0   : > { %5914 = vmatprep.subr.bf16.mxu1 %v5913_v26 }
  0xb2   : > { %5880 = vmatpush3.bf16.msra.mxu0 %v5877_v29 }
  0xb3   : > { %5916 = vmatpush3.bf16.msra.mxu1 %v5913_v26  ;;  %5882 = vmatprep.subr.bf16.mxu0 %v5881_v35 }
  0xb4   : > { %5918 = vmatprep.subr.bf16.mxu1 %v5917_v32 }
  0xb6   : > { %5884 = vmatpush3.bf16.msra.mxu0 %v5881_v35  ;;  %v673_v35 = vld [vmem:[#allocation8] sm:$0xff] }
  0xb7   : > { %5920 = vmatpush3.bf16.msra.mxu1 %v5917_v32  ;;  %5886 = vmatprep.subr.bf16.mxu0 %v5885_v41 }
  0xb8   : > { %5922 = vmatprep.subr.bf16.mxu1 %v5921_v38 }
  0xba   : > { %5888 = vmatpush3.bf16.msra.mxu0 %v5885_v41  ;;  %v677_v41 = vld [vmem:[#allocation8 + $0x20] sm:$0xff] }
  0xbb   : > { %5924 = vmatpush3.bf16.msra.mxu1 %v5921_v38  ;;  %5890 = vmatprep.subr.bf16.mxu0 %v5889_v45  ;;  %v5929_v38 = vpack.c.bf16 %v674_v36, %v673_v35  ;;  %v5937_v43 = vpack.c.bf16 %v678_v42, %v677_v41 }
  0xbc   : > { %5926 = vmatprep.subr.bf16.mxu1 %v5925_v44 }
  0xbe   : > { %5892 = vmatpush3.bf16.msra.mxu0 %v5889_v45  ;;  %v680_v45 = vld [vmem:[#allocation8 + $0x38] sm:$0xff] }
  0xbf   : > { %5928 = vmatpush3.bf16.msra.mxu1 %v5925_v44  ;;  %5894 = vmatprep.subr.bf16.mxu0 %v5893_v48  ;;  %v679_v44 = vld [vmem:[#allocation8 + $0x30] sm:$0xff] }
  0xc0   : > { %v5941_v46 = vpack.c.bf16 %v680_v45, %v679_v44  ;;  %v4688_v44 = vld [vmem:[%s9149_s6] ss:$0 sm:$0xff] }
  0xc2   : > { %5318 = vmatmul.mubr.f32.vlgmr.msra.gmra.mrb[0].mxu1 %v7632_v49  ;;  %5896 = vmatpush3.bf16.msra.mxu0 %v5893_v48  ;;  %v682_v48 = vld [vmem:[#allocation8 + $0x48] sm:$0xff] }
  0xc3   : > { %5320 = vmatprep.mubr.f32.mxu1 %v7635_v50  ;;  %5930 = vmatprep.subr.bf16.mxu0 %v5929_v38 }
  0xc5   : > { %5274 = vmatmul.mubr.f32.vlgmr.msra.gmra.mrb[0].mxu0 %v7632_v49 }
  0xc6   : > { %5321 = vmatmul.mubr.f32.gmra.mrb[2].mxu1 %v7640_v51  ;;  %5276 = vmatprep.mubr.f32.mxu0 %v7635_v50 }
  0xc7   : > { %5323 = vmatprep.mubr.f32.mxu1 %v7643_v52  ;;  %5932 = vmatpush3.bf16.msra.mxu0 %v5929_v38 }
  0xc8   : > { %5934 = vmatprep.subr.bf16.mxu0 %v5933_v40 }
  0xc9   : > { %5277 = vmatmul.mubr.f32.gmra.mrb[2].mxu0 %v7640_v51 }
  0xca   : > { %5324 = vmatmul.mubr.f32.gmra.mrb[4].mxu1 %v7648_v53  ;;  %5279 = vmatprep.mubr.f32.mxu0 %v7643_v52 }
  0xcb   : > { %5326 = vmatprep.mubr.f32.mxu1 %v7651_v54  ;;  %5936 = vmatpush3.bf16.msra.mxu0 %v5933_v40 }
  0xcc   : > { %5938 = vmatprep.subr.bf16.mxu0 %v5937_v43 }
  0xcd   : > { %5280 = vmatmul.mubr.f32.gmra.mrb[4].mxu0 %v7648_v53 }
  0xce   : > { %5327 = vmatmul.mubr.f32.gmra.mrb[6].mxu1 %v7658_v55  ;;  %5282 = vmatprep.mubr.f32.mxu0 %v7651_v54 }
  0xcf   : > { %5940 = vmatpush3.bf16.msra.mxu0 %v5937_v43 }
  0xd0   : > { %5942 = vmatprep.subr.bf16.mxu0 %v5941_v46 }
  0xd1   : > { %5283 = vmatmul.mubr.f32.gmra.mrb[6].mxu0 %v7658_v55 }
  0xd2   : > { %5361 = vmatprep.mubr.f32.mxu0 %v7627_v10 }
  0xd3   : > { %5944 = vmatpush3.bf16.msra.mxu0 %v5941_v46 }
 0x195   : > { %v5319_v57 = vpop.f32.mrb[0].mxu1 }
 0x196   : > { %v640_v58 = vadd.f32 %v5319_v57, %v4687_v56  ;;  %v634_v59 = vpop.f32.mrb[1].mxu1  ;;  %v683_v57 = vld [vmem:[#allocation8 + $0x50] sm:$0xff] }
 0x197   : > { %v635_v60 = vadd.f32 %v4687_v56, %v634_v59 }
 0x198   : > { %v5275_v5 = vpop.f32.mrb[0].mxu0 }
 0x199   : > { %v5961_v62 = vpack.c.bf16 %v640_v58, %v635_v60  ;;  %v5322_v63 = vpop.f32.mrb[2].mxu1  ;;  %v7676_v0 = vpack.i.bf16 %v640_v58, %v635_v60  ;;  %v506_v6 = vpop.f32.mrb[1].mxu0  ;;  %v7709_v29 = vadd.f32 %v5275_v5, %v4686_v3  ;;  %v684_v58 = vld [vmem:[#allocation8 + $0x58] sm:$0xff]  ;;  %v685_v60 = vld [vmem:[#allocation8 + $0x60] sm:$0xff] }
 0x19a   : > { %v650_v1 = vadd.f32 %v5322_v63, %v4687_v56  ;;  %v644_v2 = vpop.f32.mrb[3].mxu1  ;;  %v7685_v9 = vadd.f32 %v4686_v3, %v506_v6  ;;  %v5949_v59 = vpack.c.bf16 %v684_v58, %v683_v57 }
 0x19b   : > { %5963 = vmatprep.subr.msk.bf16.mxu1 %vm7672_vm1, %v5961_v62  ;;  %v645_v4 = vadd.f32 %v4687_v56, %v644_v2  ;;  %v688_v2 = vld [vmem:[#allocation8 + $0x78] sm:$0xff] }
 0x19c   : > { %5966 = vmatpush3.bf16.xpose.msk.msra.mxu1 %vm7672_vm1, %v5961_v62  ;;  %5389 = vmatprep.mubr.msk.f32.mxu1 %vm801_vm0, %v7685_v9  ;;  %v5278_v14 = vpop.f32.mrb[2].mxu0  ;;  %v686_v62 = vld [vmem:[#allocation8 + $0x68] sm:$0xff] }
 0x19d   : > { %v5967_v7 = vpack.c.bf16 %v650_v1, %v645_v4  ;;  %v5325_v8 = vpop.f32.mrb[4].mxu1  ;;  %v7687_v10 = vpack.i.bf16 %v650_v1, %v645_v4  ;;  %v516_v15 = vpop.f32.mrb[3].mxu0  ;;  %v7711_v30 = vadd.f32 %v5278_v14, %v4686_v3  ;;  %v5953_v63 = vpack.c.bf16 %v686_v62, %v685_v60  ;;  %v687_v1 = vld [vmem:[#allocation8 + $0x70] sm:$0xff] }
 0x19e   : > { %v660_v11 = vadd.f32 %v5325_v8, %v4687_v56  ;;  %v654_v12 = vpop.f32.mrb[5].mxu1  ;;  %v7707_v28 = vadd.f32 %v4686_v3, %v516_v15 }
 0x19f   : > { %5969 = vmatprep.subr.msk.bf16.mxu1 %vm7672_vm1, %v5967_v7  ;;  %v655_v13 = vadd.f32 %v4687_v56, %v654_v12 }
 0x1a0   : > { %v5281_v22 = vpop.f32.mrb[4].mxu0 }
 0x1a1   : > { %v5973_v16 = vpack.c.bf16 %v660_v11, %v655_v13  ;;  %v5328_v17 = vpop.f32.mrb[6].mxu1  ;;  %v7693_v18 = vpack.i.bf16 %v660_v11, %v655_v13  ;;  %v526_v23 = vpop.f32.mrb[5].mxu0  ;;  %v7719_v32 = vadd.f32 %v5281_v22, %v4686_v3 }
 0x1a2   : > { %v670_v19 = vadd.f32 %v5328_v17, %v4687_v56  ;;  %v664_v20 = vpop.f32.mrb[7].mxu1  ;;  %v7717_v31 = vadd.f32 %v4686_v3, %v526_v23 }
 0x1a3   : > { %v665_v21 = vadd.f32 %v4687_v56, %v664_v20  ;;  %v5945_v56 = vpack.c.bf16 %v682_v48, %v681_v47 }
 0x1a4   : > { %5972 = vmatpush3.bf16.xpose.msk.msra.mxu1 %vm7672_vm1, %v5967_v7  ;;  %v5284_v26 = vpop.f32.mrb[6].mxu0 }
 0x1a5   : > { %5975 = vmatprep.subr.msk.bf16.mxu1 %vm7672_vm1, %v5973_v16  ;;  %v5979_v24 = vpack.c.bf16 %v670_v19, %v665_v21  ;;  %v7699_v25 = vpack.i.bf16 %v670_v19, %v665_v21  ;;  %v536_v27 = vpop.f32.mrb[7].mxu0  ;;  %v7727_v34 = vadd.f32 %v5284_v26, %v4686_v3  ;;  %5946 = vmatprep.subr.bf16.mxu0 %v5945_v56 }
 0x1a6   : > { %v7725_v33 = vadd.f32 %v4686_v3, %v536_v27  ;;  %5948 = vmatpush3.bf16.msra.mxu0 %v5945_v56  ;;  %v5957_v3 = vpack.c.bf16 %v688_v2, %v687_v1 }
 0x1a7   : > { %5950 = vmatprep.subr.bf16.mxu0 %v5949_v59 }
 0x1aa   : > { %5952 = vmatpush3.bf16.msra.mxu0 %v5949_v59 }
 0x1ab   : > { %5954 = vmatprep.subr.bf16.mxu0 %v5953_v63 }
 0x1ac   : > { %5978 = vmatpush3.bf16.xpose.msk.msra.mxu1 %vm7672_vm1, %v5973_v16 }
 0x1ad   : > { %5981 = vmatprep.subr.msk.bf16.mxu1 %vm7672_vm1, %v5979_v24 }
 0x1ae   : > { %5956 = vmatpush3.bf16.msra.mxu0 %v5953_v63 }
 0x1af   : > { %5958 = vmatprep.subr.bf16.mxu0 %v5957_v3 }
 0x1b2   : > { %5960 = vmatpush3.bf16.msra.mxu0 %v5957_v3 }
 0x1b4   : > { %5984 = vmatpush3.bf16.xpose.msk.msra.mxu1 %vm7672_vm1, %v5979_v24 }
 0x1b5   : > { %5362 = vmatmul.mubr.f32.vlgmr.msra.gmra.mrb[8].mxu0 %v7632_v49 }
 0x1b6   : > { %5364 = vmatprep.mubr.f32.mxu0 %v7635_v50 }
 0x1b9   : > { %5365 = vmatmul.mubr.f32.gmra.mrb[10].mxu0 %v7640_v51 }
 0x1ba   : > { %5367 = vmatprep.mubr.f32.mxu0 %v7643_v52 }
 0x1bb   : > { %5390 = vmatmul.mubr.msk.f32.vlgmr.msra.gmra.mrb[8].mxu1 %vm801_vm0, %v7709_v29 }
 0x1bc   : > { %5392 = vmatprep.mubr.msk.f32.mxu1 %vm801_vm0, %v7707_v28 }
 0x1bd   : > { %5368 = vmatmul.mubr.f32.gmra.mrb[12].mxu0 %v7648_v53 }
 0x1be   : > { %5370 = vmatprep.mubr.f32.mxu0 %v7651_v54 }
 0x1bf   : > { %5393 = vmatmul.mubr.msk.f32.gmra.mrb[10].mxu1 %vm801_vm0, %v7711_v30 }
 0x1c0   : > { %5395 = vmatprep.mubr.msk.f32.mxu1 %vm801_vm0, %v7717_v31 }
 0x1c1   : > { %5371 = vmatmul.mubr.f32.gmra.mrb[14].mxu0 %v7658_v55 }
 0x1c3   : > { %5396 = vmatmul.mubr.msk.f32.gmra.mrb[12].mxu1 %vm801_vm0, %v7719_v32 }
 0x1c4   : > { %5398 = vmatprep.mubr.msk.f32.mxu1 %vm801_vm0, %v7725_v33 }
 0x1c7   : > { %5399 = vmatmul.mubr.msk.f32.gmra.mrb[14].mxu1 %vm801_vm0, %v7727_v34 }
 0x288   : > { %v5363_v38 = vpop.f32.mrb[8].mxu0 }
 0x289   : > { %v762_v39 = vpop.f32.mrb[9].mxu0  ;;  %v7777_v46 = vadd.f32 %v5363_v38, %v4688_v44 }
 0x28a   : > { %v7779_v47 = vadd.f32 %v4688_v44, %v762_v39 }
 0x28c   : > { %v5366_v40 = vpop.f32.mrb[10].mxu0  ;;  %v5985_v58 = vpack.c.bf16 %v7777_v46, %v7779_v47 }
 0x28d   : > { %v772_v41 = vpop.f32.mrb[11].mxu0  ;;  %v7783_v56 = vadd.f32 %v5366_v40, %v4688_v44 }
 0x28e   : > { %v5391_v4 = vpop.f32.mrb[8].mxu1  ;;  %v7785_v57 = vadd.f32 %v4688_v44, %v772_v41  ;;  %5986 = vmatprep.subr.bf16.mxu1 %v5985_v58 }
 0x28f   : > { %v916_v5 = vpop.f32.mrb[9].mxu1  ;;  %v956_v7 = vmul.f32 0.088388346, %v5391_v4  ;;  %5988 = vmatpush3.bf16.msra.mxu1 %v5985_v58 }
 0x290   : > { %v955_v6 = vmul.f32 0.088388346, %v916_v5  ;;  %v5369_v59 = vpop.f32.mrb[12].mxu0  ;;  %v5989_v1 = vpack.c.bf16 %v7783_v56, %v7785_v57 }
 0x291   : > { %v967_v54 = vsel %vm963_vm2, %v956_v7, -inf  ;;  %v782_v60 = vpop.f32.mrb[13].mxu0  ;;  %v7789_v62 = vadd.f32 %v5369_v59, %v4688_v44 }
 0x292   : > { %v5394_v8 = vpop.f32.mrb[10].mxu1  ;;  %v964_v49 = vsel %vm963_vm2, %v955_v6, -inf  ;;  %v7791_v63 = vadd.f32 %v4688_v44, %v782_v60  ;;  %5990 = vmatprep.subr.bf16.mxu1 %v5989_v1 }
 0x293   : > { %v7743_v11 = vmul.f32 0.088388346, %v5394_v8  ;;  %965 = vmax.xlane.f32.xlu0 %v964_v49  ;;  %v926_v50 = vpop.f32.mrb[11].mxu1  ;;  %5992 = vmatpush3.bf16.msra.mxu1 %v5989_v1 }
 0x294   : > { %v7745_v51 = vmul.f32 0.088388346, %v926_v50  ;;  %v5372_v2 = vpop.f32.mrb[14].mxu0  ;;  %v5993_v3 = vpack.c.bf16 %v7789_v62, %v7791_v63 }
 0x295   : > { %v973_v52 = vsel %vm963_vm2, %v7743_v11, -inf  ;;  %v7797_v4 = vadd.f32 %v5372_v2, %v4688_v44  ;;  %v792_v5 = vpop.f32.mrb[15].mxu0 }
 0x296   : > { %974 = vmax.xlane.f32.xlu1 %v973_v52  ;;  %v5397_v53 = vpop.f32.mrb[12].mxu1  ;;  %v970_v13 = vsel %vm963_vm2, %v7745_v51, -inf  ;;  %5994 = vmatprep.subr.bf16.mxu1 %v5993_v3 }
 0x297   : > { %v7750_v55 = vmul.f32 0.088388346, %v5397_v53  ;;  %968 = vmax.xlane.f32.xlu0 %v967_v54  ;;  %v936_v12 = vpop.f32.mrb[13].mxu1  ;;  %5996 = vmatpush3.bf16.msra.mxu1 %v5993_v3 }
 0x298   : > { %v7754_v14 = vmul.f32 0.088388346, %v936_v12 }
 0x299   : > { %v979_v20 = vsel %vm963_vm2, %v7750_v55, -inf }
 0x29a   : > { %971 = vmax.xlane.f32.xlu1 %v970_v13  ;;  %v5400_v15 = vpop.f32.mrb[14].mxu1  ;;  %v976_v16 = vsel %vm963_vm2, %v7754_v14, -inf }
 0x29b   : > { %v7758_v17 = vmul.f32 0.088388346, %v5400_v15  ;;  %977 = vmax.xlane.f32.xlu0 %v976_v16  ;;  %v946_v19 = vpop.f32.mrb[15].mxu1 }
 0x29c   : > { %v7762_v21 = vmul.f32 0.088388346, %v946_v19 }
 0x29d   : > { %v985_v23 = vsel %vm963_vm2, %v7758_v17, -inf }
 0x29e   : > { %980 = vmax.xlane.f32.xlu1 %v979_v20  ;;  %v982_v22 = vsel %vm963_vm2, %v7762_v21, -inf }
 0x29f   : > { %983 = vmax.xlane.f32.xlu0 %v982_v22 }
 0x2a2   : > { %986 = vmax.xlane.f32.xlu1 %v985_v23 }
 0x320   : > { %v966_v24 = vpop.xlane.xlu0 %965 }
 0x321   : > { %v988_v26 = vsub.f32 %v955_v6, %v966_v24  ;;  %v7799_v6 = vadd.f32 %v4688_v44, %v792_v5 }
 0x323   : > { %v996_v27 = vmul.f32 1.442695, %v988_v26  ;;  %v975_v8 = vpop.xlane.xlu1 %974 }
 0x324   : > { %v969_v35 = vpop.xlane.xlu0 %968  ;;  %v991_v53 = vsub.f32 %v7743_v11, %v975_v8 }
 0x325   : > { %6831 = vpow2.f32 %v996_v27  ;;  %v989_v36 = vsub.f32 %v956_v7, %v969_v35  ;;  %v5997_v7 = vpack.c.bf16 %v7797_v4, %v7799_v6 }
 0x326   : > { %v1002_v15 = vmul.f32 1.442695, %v991_v53 }
 0x327   : > { %v998_v37 = vmul.f32 1.442695, %v989_v36  ;;  %5998 = vmatprep.subr.bf16.mxu1 %v5997_v7  ;;  %v972_v49 = vpop.xlane.xlu1 %971 }
 0x328   : > { %6000 = vmatpush3.bf16.msra.mxu1 %v5997_v7  ;;  %v990_v50 = vsub.f32 %v7745_v51, %v972_v49  ;;  %v978_v52 = vpop.xlane.xlu0 %977 }
 0x329   : > { %6833 = vpow2.f32 %v998_v37  ;;  %v992_v12 = vsub.f32 %v7754_v14, %v978_v52 }
 0x32a   : > { %v1000_v54 = vmul.f32 1.442695, %v990_v50 }
 0x32b   : > { %v981_v13 = vpop.xlane.xlu1 %980  ;;  %v1004_v16 = vmul.f32 1.442695, %v992_v12 }
 0x32c   : > { %6835 = vpow2.f32 %v1000_v54  ;;  %v993_v19 = vsub.f32 %v7750_v55, %v981_v13  ;;  %v984_v36 = vpop.xlane.xlu0 %983 }
 0x32d   : > { %6837 = vpow2.f32 %v1002_v15  ;;  %v994_v37 = vsub.f32 %v7762_v21, %v984_v36 }
 0x32e   : > { %6839 = vpow2.f32 %v1004_v16  ;;  %v1006_v20 = vmul.f32 1.442695, %v993_v19 }
 0x32f   : > { %v7768_v42 = vpop.eup %6831  ;;  %v987_v27 = vpop.xlane.xlu1 %986  ;;  %v1008_v39 = vmul.f32 1.442695, %v994_v37 }
 0x330   : > { %v1012_v43 = vsel %vm963_vm2, %v7768_v42, 0.0  ;;  %6841 = vpow2.f32 %v1006_v20  ;;  %v995_v35 = vsub.f32 %v7758_v17, %v987_v27 }
 0x331   : > { %1013 = vadd.xlane.f32.xlu0 %v1012_v43 }
 0x332   : > { %v1010_v38 = vmul.f32 1.442695, %v995_v35 }
 0x333   : > { %v7775_v45 = vpop.eup %6833 }
 0x334   : > { %v1015_v48 = vsel %vm963_vm2, %v7775_v45, 0.0  ;;  %6843 = vpow2.f32 %v1010_v38 }
 0x335   : > { %1016 = vadd.xlane.f32.xlu1 %v1015_v48  ;;  %6845 = vpow2.f32 %v1008_v39 }
 0x336   : > { %v7811_v22 = vpop.eup %6835 }
 0x337   : > { %v7813_v23 = vpop.eup %6837  ;;  %v1018_v11 = vsel %vm963_vm2, %v7811_v22, 0.0 }
 0x338   : > { %v7817_v51 = vpop.eup %6839  ;;  %v1021_v14 = vsel %vm963_vm2, %v7813_v23, 0.0 }
 0x339   : > { %v1024_v55 = vsel %vm963_vm2, %v7817_v51, 0.0 }
 0x33a   : > { %v7823_v24 = vpop.eup %6841 }
 0x33b   : > { %v1027_v26 = vsel %vm963_vm2, %v7823_v24, 0.0 }
 0x33e   : > { %v7841_v40 = vpop.eup %6843 }
 0x33f   : > { %v1033_v41 = vsel %vm963_vm2, %v7841_v40, 0.0  ;;  %v7845_v43 = vpop.eup %6845 }
 0x340   : > { %v1030_v17 = vsel %vm963_vm2, %v7845_v43, 0.0 }
 0x346   : > { %6417 = vrot.lane.b32.xlu1 %v7687_v10, %s7320_s20 }
 0x347   : > { %6412 = vrot.lane.b32.xlu0 %v7676_v0, %s7320_s20 }
 0x366   : > { %1019 = vadd.xlane.f32.xlu0 %v1018_v11 }
 0x36a   : > { %1022 = vadd.xlane.f32.xlu1 %v1021_v14  ;;  %1025 = vadd.xlane.f32.xlu0 %v1024_v55 }
 0x36e   : > { %1028 = vadd.xlane.f32.xlu1 %v1027_v26 }
 0x37f   : > { %6427 = vrot.lane.b32.xlu1 %v7699_v25, %s7320_s20 }
 0x380   : > { %6422 = vrot.lane.b32.xlu0 %v7693_v18, %s7320_s20 }
 0x384   : > { %1181 = vrot.lane.b32.xlu0 %v7685_v9, %s7320_s20 }
 0x388   : > { %1185 = vrot.lane.b32.xlu0 %v7707_v28, %s7320_s20 }
 0x38c   : > { %1189 = vrot.lane.b32.xlu0 %v7717_v31, %s7320_s20 }
 0x390   : > { %1193 = vrot.lane.b32.xlu0 %v7725_v33, %s7320_s20 }
 0x3a3   : > { %1034 = vadd.xlane.f32.xlu1 %v1033_v41 }
 0x3a7   : > { %1031 = vadd.xlane.f32.xlu1 %v1030_v17 }
 0x3b8   : > { %1183 = vrot.lane.b32.xlu1 %v7709_v29, %s7320_s20 }
 0x3bc   : > { %1187 = vrot.lane.b32.xlu1 %v7711_v30, %s7320_s20 }
 0x3be   : > { %v1014_v21 = vpop.xlane.xlu0 %1013 }
 0x3bf   : > { %6847 = vrcp.f32 %v1014_v21 }
 0x3c0   : > { %1191 = vrot.lane.b32.xlu1 %v7719_v32, %s7320_s20 }
 0x3c2   : > { %v1017_v44 = vpop.xlane.xlu1 %1016  ;;  %v6413_v48 = vpop.permute.xlu0 %6412 }
 0x3c3   : > { %6849 = vrcp.f32 %v1017_v44  ;;  %v6415_v58 = vunpack.i.h.bf16 %v6413_v48  ;;  %v6414_v59 = vunpack.i.l.bf16 %v6413_v48 }
 0x3c4   : > { %1195 = vrot.lane.b32.xlu1 %v7727_v34, %s7320_s20 }
 0x3c5   : > { %v6001_v60 = vpack.c.bf16 %v6415_v58, %v6414_v59 }
 0x3c6   : > { %v6418_v2 = vpop.permute.xlu1 %6417 }
 0x3c7   : > { %6003 = vmatprep.subr.msk.bf16.mxu1 %vm7672_vm1, %v6001_v60  ;;  %v6420_v5 = vunpack.i.h.bf16 %v6418_v2  ;;  %v6419_v7 = vunpack.i.l.bf16 %v6418_v2 }
 0x3c9   : > { %v6848_v1 = vpop.eup %6847  ;;  %v6007_v50 = vpack.c.bf16 %v6420_v5, %v6419_v7 }
 0x3ca   : > { %v1037_v3 = vmul.f32 %v6848_v1, %v7768_v42 }
 0x3cc   : > { %5417 = vmatprep.mubr.msk.f32.mxu1 %vm963_vm2, %v1037_v3 }
 0x3cd   : > { %v6850_v8 = vpop.eup %6849 }
 0x3ce   : > { %v1039_v49 = vmul.f32 %v6850_v8, %v7775_v45 }
 0x3d0   : > { %5418 = vmatmul.mubr.msk.f32.vlgmr.msra.gmra.mrb[16].mxu1 %vm963_vm2, %v1039_v49 }
 0x3d1   : > { %6006 = vmatpush3.bf16.xpose.msk.msra.mxu1 %vm7672_vm1, %v6001_v60 }
 0x3d2   : > { %6009 = vmatprep.subr.msk.bf16.mxu1 %vm7672_vm1, %v6007_v50 }
 0x3d9   : > { %6012 = vmatpush3.bf16.xpose.msk.msra.mxu1 %vm7672_vm1, %v6007_v50 }
 0x3f3   : > { %v1020_v42 = vpop.xlane.xlu0 %1019 }
 0x3f4   : > { %6851 = vrcp.f32 %v1020_v42 }
 0x3f7   : > { %v1023_v52 = vpop.xlane.xlu1 %1022  ;;  %v1026_v53 = vpop.xlane.xlu0 %1025 }
 0x3f8   : > { %6853 = vrcp.f32 %v1023_v52 }
 0x3f9   : > { %6855 = vrcp.f32 %v1026_v53 }
 0x3fb   : > { %v1029_v54 = vpop.xlane.xlu1 %1028  ;;  %v6423_v45 = vpop.permute.xlu0 %6422 }
 0x3fc   : > { %6857 = vrcp.f32 %v1029_v54  ;;  %v6425_v12 = vunpack.i.h.bf16 %v6423_v45  ;;  %v6424_v13 = vunpack.i.l.bf16 %v6423_v45 }
 0x3fe   : > { %v6852_v15 = vpop.eup %6851  ;;  %v6013_v16 = vpack.c.bf16 %v6425_v12, %v6424_v13 }
 0x3ff   : > { %v6428_v19 = vpop.permute.xlu1 %6427  ;;  %v1041_v20 = vmul.f32 %v6852_v15, %v7811_v22  ;;  %v1182_v39 = vpop.permute.xlu0 %1181 }
 0x400   : > { %v6430_v11 = vunpack.i.h.bf16 %v6428_v19  ;;  %v6429_v14 = vunpack.i.l.bf16 %v6428_v19  ;;  %6015 = vmatprep.subr.msk.bf16.mxu1 %vm7672_vm1, %v6013_v16 }
 0x401   : > { %5420 = vmatprep.mubr.msk.f32.mxu1 %vm963_vm2, %v1041_v20  ;;  %6018 = vmatpush3.bf16.xpose.msk.msra.mxu1 %vm7672_vm1, %v6013_v16 }
 0x402   : > { %v6854_v55 = vpop.eup %6853  ;;  %v6019_v26 = vpack.c.bf16 %v6430_v11, %v6429_v14 }
 0x403   : > { %v6856_v27 = vpop.eup %6855  ;;  %v1043_v35 = vmul.f32 %v6854_v55, %v7813_v23 }
 0x404   : > { %6021 = vmatprep.subr.msk.bf16.mxu1 %vm7672_vm1, %v6019_v26  ;;  %v1045_v22 = vmul.f32 %v6856_v27, %v7817_v51 }
 0x405   : > { %5421 = vmatmul.mubr.msk.f32.gmra.mrb[18].mxu1 %vm963_vm2, %v1043_v35 }
 0x406   : > { %v6858_v36 = vpop.eup %6857  ;;  %5423 = vmatprep.mubr.msk.f32.mxu1 %vm963_vm2, %v1045_v22 }
 0x407   : > { %v1047_v37 = vmul.f32 %v6858_v36, %v7823_v24  ;;  %v1186_v24 = vpop.permute.xlu0 %1185 }
 0x409   : > { %5424 = vmatmul.mubr.msk.f32.gmra.mrb[20].mxu1 %vm963_vm2, %v1047_v37 }
 0x40a   : > { %6024 = vmatpush3.bf16.xpose.msk.msra.mxu1 %vm7672_vm1, %v6019_v26 }
 0x40b   : > { %v1190_v58 = vpop.permute.xlu0 %1189 }
 0x430   : > { %v1035_v38 = vpop.xlane.xlu1 %1034 }
 0x431   : > { %6859 = vrcp.f32 %v1035_v38 }
 0x434   : > { %v1032_v23 = vpop.xlane.xlu1 %1031 }
 0x435   : > { %6861 = vrcp.f32 %v1032_v23 }
 0x438   : > { %v1184_v51 = vpop.permute.xlu1 %1183 }
 0x43b   : > { %v6860_v41 = vpop.eup %6859 }
 0x43c   : > { %v1051_v44 = vmul.f32 %v6860_v41, %v7841_v40  ;;  %v1188_v48 = vpop.permute.xlu1 %1187  ;;  %v7929_v41 = vpack.i.bf16 %v7783_v56, %v7785_v57  ;;  %v7947_v56 = vpack.i.bf16 %v7777_v46, %v7779_v47 }
 0x43f   : > { %v6862_v17 = vpop.eup %6861 }
 0x440   : > { %v1049_v21 = vmul.f32 %v6862_v17, %v7845_v43  ;;  %v1192_v59 = vpop.permute.xlu1 %1191  ;;  %v1194_v43 = vpop.permute.xlu0 %1193  ;;  %v7935_v17 = vpack.i.bf16 %v7789_v62, %v7791_v63 }
 0x442   : > { %5426 = vmatprep.mubr.msk.f32.mxu1 %vm963_vm2, %v1049_v21 }
 0x443   : > { %5427 = vmatmul.mubr.msk.f32.gmra.mrb[22].mxu1 %vm963_vm2, %v1051_v44 }
 0x444   : > { %5445 = vmatprep.mubr.msk.f32.mxu1 %vm801_vm0, %v1182_v39  ;;  %v1196_v40 = vpop.permute.xlu1 %1195 }
 0x447   : > { %5446 = vmatmul.mubr.msk.f32.vlgmr.msra.gmra.mrb[24].mxu1 %vm801_vm0, %v1184_v51  ;;  %v7941_v51 = vpack.i.bf16 %v7797_v4, %v7799_v6 }
 0x448   : > { %5448 = vmatprep.mubr.msk.f32.mxu1 %vm801_vm0, %v1186_v24 }
 0x44b   : > { %5449 = vmatmul.mubr.msk.f32.gmra.mrb[26].mxu1 %vm801_vm0, %v1188_v48 }
 0x44c   : > { %5451 = vmatprep.mubr.msk.f32.mxu1 %vm801_vm0, %v1190_v58 }
 0x44f   : > { %5452 = vmatmul.mubr.msk.f32.gmra.mrb[28].mxu1 %vm801_vm0, %v1192_v59 }
 0x450   : > { %5454 = vmatprep.mubr.msk.f32.mxu1 %vm801_vm0, %v1194_v43 }
 0x453   : > { %5455 = vmatmul.mubr.msk.f32.gmra.mrb[30].mxu1 %vm801_vm0, %v1196_v40 }
 0x4a3   : > { %v7897_v60 = vpop.f32.mrb[16].mxu1 }
 0x4a4   : > { %9194 = vst [vmem:[#allocation18_spill] sm:$0xff] %v7897_v60  ;;  %v7899_v1 = vpop.f32.mrb[17].mxu1 }
 0x4a5   : > { %9195 = vst [vmem:[#allocation19_spill] sm:$0xff] %v7899_v1 }
 0x4d8   : > { %v7901_v2 = vpop.f32.mrb[18].mxu1 }
 0x4d9   : > { %9196 = vst [vmem:[#allocation20_spill] sm:$0xff] %v7901_v2  ;;  %v7903_v3 = vpop.f32.mrb[19].mxu1 }
 0x4da   : > { %9197 = vst [vmem:[#allocation21_spill] sm:$0xff] %v7903_v3 }
 0x4dc   : > { %v7905_v5 = vpop.f32.mrb[20].mxu1 }
 0x4dd   : > { %9198 = vst [vmem:[#allocation22_spill] sm:$0xff] %v7905_v5  ;;  %v7907_v7 = vpop.f32.mrb[21].mxu1 }
 0x4de   : > { %9199 = vst [vmem:[#allocation23_spill] sm:$0xff] %v7907_v7 }
 0x516   : > { %v7909_v8 = vpop.f32.mrb[22].mxu1 }
 0x517   : > { %9200 = vst [vmem:[#allocation24_spill] sm:$0xff] %v7909_v8  ;;  %v7911_v49 = vpop.f32.mrb[23].mxu1 }
 0x518   : > { %9201 = vst [vmem:[#allocation25_spill] sm:$0xff] %v7911_v49 }
 0x51a   : > { %v5447_v50 = vpop.f32.mrb[24].mxu1 }
 0x51b   : > { %v1351_v42 = vmul.f32 0.088388346, %v5447_v50  ;;  %v1311_v52 = vpop.f32.mrb[25].mxu1 }
 0x51c   : > { %v1350_v53 = vmul.f32 0.088388346, %v1311_v52 }
 0x51d   : > { %v1361_v54 = vsel %vm963_vm2, %v1351_v42, -inf }
 0x51e   : > { %1362 = vmax.xlane.f32.xlu1 %v1361_v54  ;;  %v5450_v45 = vpop.f32.mrb[26].mxu1  ;;  %v1358_v12 = vsel %vm963_vm2, %v1350_v53, -inf }
 0x51f   : > { %v1353_v13 = vmul.f32 0.088388346, %v5450_v45  ;;  %1359 = vmax.xlane.f32.xlu0 %v1358_v12  ;;  %v1321_v15 = vpop.f32.mrb[27].mxu1 }
 0x520   : > { %v1352_v19 = vmul.f32 0.088388346, %v1321_v15 }
 0x521   : > { %v1367_v16 = vsel %vm963_vm2, %v1353_v13, -inf }
 0x522   : > { %v5453_v20 = vpop.f32.mrb[28].mxu1  ;;  %v1364_v35 = vsel %vm963_vm2, %v1352_v19, -inf }
 0x523   : > { %v1355_v11 = vmul.f32 0.088388346, %v5453_v20  ;;  %1368 = vmax.xlane.f32.xlu0 %v1367_v16  ;;  %v1331_v14 = vpop.f32.mrb[29].mxu1 }
 0x524   : > { %v1354_v26 = vmul.f32 0.088388346, %v1331_v14 }
 0x525   : > { %v1373_v55 = vsel %vm963_vm2, %v1355_v11, -inf }
 0x526   : > { %1374 = vmax.xlane.f32.xlu1 %v1373_v55  ;;  %v5456_v27 = vpop.f32.mrb[30].mxu1  ;;  %v1370_v23 = vsel %vm963_vm2, %v1354_v26, -inf }
 0x527   : > { %v7918_v22 = vmul.f32 0.088388346, %v5456_v27  ;;  %1365 = vmax.xlane.f32.xlu0 %v1364_v35  ;;  %v1341_v36 = vpop.f32.mrb[31].mxu1 }
 0x528   : > { %v7922_v38 = vmul.f32 0.088388346, %v1341_v36 }
 0x529   : > { %v1379_v37 = vsel %vm963_vm2, %v7918_v22, -inf }
 0x52a   : > { %1380 = vmax.xlane.f32.xlu1 %v1379_v37  ;;  %v1376_v39 = vsel %vm963_vm2, %v7922_v38, -inf }
 0x52b   : > { %1371 = vmax.xlane.f32.xlu0 %v1370_v23 }
 0x52f   : > { %1377 = vmax.xlane.f32.xlu0 %v1376_v39 }
 0x53b   : > { %6437 = vrot.lane.b32.xlu1 %v7929_v41, %s7320_s20 }
 0x53f   : > { %6442 = vrot.lane.b32.xlu1 %v7935_v17, %s7320_s20 }
 0x543   : > { %6447 = vrot.lane.b32.xlu1 %v7941_v51, %s7320_s20 }
 0x545   : > { %6432 = vrot.lane.b32.xlu0 %v7947_v56, %s7320_s20 }
 0x547   : > { %6457 = vrot.lane.b32.xlu1 %v7687_v10, %s7321_s29 }
 0x549   : > { %6452 = vrot.lane.b32.xlu0 %v7676_v0, %s7321_s29 }
 0x5ab   : > { %v1363_v57 = vpop.xlane.xlu1 %1362 }
 0x5ac   : > { %v1383_v62 = vsub.f32 %v1351_v42, %v1363_v57  ;;  %v1360_v63 = vpop.xlane.xlu0 %1359 }
 0x5ad   : > { %v1382_v4 = vsub.f32 %v1350_v53, %v1360_v63 }
 0x5ae   : > { %v1392_v6 = vmul.f32 1.442695, %v1383_v62 }
 0x5af   : > { %v1390_v21 = vmul.f32 1.442695, %v1382_v4 }
 0x5b0   : > { %6863 = vpow2.f32 %v1392_v6  ;;  %v1369_v44 = vpop.xlane.xlu0 %1368 }
 0x5b1   : > { %6865 = vpow2.f32 %v1390_v21  ;;  %v1385_v46 = vsub.f32 %v1353_v13, %v1369_v44 }
 0x5b3   : > { %v1396_v47 = vmul.f32 1.442695, %v1385_v46  ;;  %v1375_v24 = vpop.xlane.xlu1 %1374 }
 0x5b4   : > { %v1387_v48 = vsub.f32 %v1355_v11, %v1375_v24  ;;  %v1366_v58 = vpop.xlane.xlu0 %1365 }
 0x5b5   : > { %6867 = vpow2.f32 %v1396_v47  ;;  %v1384_v59 = vsub.f32 %v1352_v19, %v1366_v58 }
 0x5b6   : > { %v1400_v43 = vmul.f32 1.442695, %v1387_v48 }
 0x5b7   : > { %v1394_v40 = vmul.f32 1.442695, %v1384_v59  ;;  %v1381_v50 = vpop.xlane.xlu1 %1380 }
 0x5b8   : > { %v1372_v52 = vpop.xlane.xlu0 %1371 }
 0x5b9   : > { %6869 = vpow2.f32 %v1394_v40  ;;  %v1386_v42 = vsub.f32 %v1354_v26, %v1372_v52  ;;  %v1389_v52 = vsub.f32 %v7918_v22, %v1381_v50 }
 0x5ba   : > { %v7955_v54 = vpop.eup %6863  ;;  %6871 = vpow2.f32 %v1400_v43 }
 0x5bb   : > { %v7957_v53 = vpop.eup %6865  ;;  %v1398_v45 = vmul.f32 1.442695, %v1386_v42  ;;  %v6438_v12 = vpop.permute.xlu1 %6437  ;;  %v1409_v13 = vsel %vm963_vm2, %v7955_v54, 0.0  ;;  %v1404_v42 = vmul.f32 1.442695, %v1389_v52 }
 0x5bc   : > { %1410 = vadd.xlane.f32.xlu1 %v1409_v13  ;;  %v1378_v15 = vpop.xlane.xlu0 %1377  ;;  %v1406_v16 = vsel %vm963_vm2, %v7957_v53, 0.0  ;;  %v6440_v55 = vunpack.i.h.bf16 %v6438_v12  ;;  %v6439_v26 = vunpack.i.l.bf16 %v6438_v12 }
 0x5bd   : > { %1407 = vadd.xlane.f32.xlu0 %v1406_v16  ;;  %6873 = vpow2.f32 %v1398_v45  ;;  %v1388_v45 = vsub.f32 %v7922_v38, %v1378_v15 }
 0x5be   : > { %v6029_v63 = vpack.c.bf16 %v6440_v55, %v6439_v26  ;;  %6875 = vpow2.f32 %v1404_v42 }
 0x5bf   : > { %v7963_v19 = vpop.eup %6867  ;;  %v6443_v20 = vpop.permute.xlu1 %6442  ;;  %v1402_v12 = vmul.f32 1.442695, %v1388_v45 }
 0x5c0   : > { %v6433_v11 = vpop.permute.xlu0 %6432  ;;  %v1415_v14 = vsel %vm963_vm2, %v7963_v19, 0.0  ;;  %v6445_v57 = vunpack.i.h.bf16 %v6443_v20  ;;  %v6444_v62 = vunpack.i.l.bf16 %v6443_v20 }
 0x5c1   : > { %v6435_v27 = vunpack.i.h.bf16 %v6433_v11  ;;  %v6434_v35 = vunpack.i.l.bf16 %v6433_v11  ;;  %1416 = vadd.xlane.f32.xlu1 %v1415_v14  ;;  %6877 = vpow2.f32 %v1402_v12 }
 0x5c2   : > { %v6033_v47 = vpack.c.bf16 %v6445_v57, %v6444_v62 }
 0x5c3   : > { %v7967_v36 = vpop.eup %6869  ;;  %v6025_v37 = vpack.c.bf16 %v6435_v27, %v6434_v35  ;;  %v6448_v4 = vpop.permute.xlu1 %6447 }
 0x5c4   : > { %v1412_v23 = vsel %vm963_vm2, %v7967_v36, 0.0  ;;  %v7971_v39 = vpop.eup %6871  ;;  %v6450_v44 = vunpack.i.h.bf16 %v6448_v4  ;;  %v6449_v46 = vunpack.i.l.bf16 %v6448_v4  ;;  %v6453_v24 = vpop.permute.xlu0 %6452 }
 0x5c5   : > { %1413 = vadd.xlane.f32.xlu0 %v1412_v23  ;;  %6026 = vmatprep.subr.bf16.mxu0 %v6025_v37  ;;  %v1421_v6 = vsel %vm963_vm2, %v7971_v39, 0.0  ;;  %v6455_v58 = vunpack.i.h.bf16 %v6453_v24  ;;  %v6454_v59 = vunpack.i.l.bf16 %v6453_v24 }
 0x5c6   : > { %6028 = vmatpush3.bf16.msra.mxu0 %v6025_v37  ;;  %v6037_v43 = vpack.c.bf16 %v6450_v44, %v6449_v46 }
 0x5c7   : > { %6030 = vmatprep.subr.bf16.mxu0 %v6029_v63  ;;  %v7975_v21 = vpop.eup %6873  ;;  %v6041_v40 = vpack.c.bf16 %v6455_v58, %v6454_v59  ;;  %v6458_v15 = vpop.permute.xlu1 %6457 }
 0x5c8   : > { %v1418_v48 = vsel %vm963_vm2, %v7975_v21, 0.0  ;;  %v7993_v13 = vpop.eup %6875  ;;  %v6460_v27 = vunpack.i.h.bf16 %v6458_v15  ;;  %v6459_v35 = vunpack.i.l.bf16 %v6458_v15 }
 0x5c9   : > { %1422 = vadd.xlane.f32.xlu0 %v1421_v6  ;;  %v1427_v22 = vsel %vm963_vm2, %v7993_v13, 0.0 }
 0x5ca   : > { %6032 = vmatpush3.bf16.msra.mxu0 %v6029_v63  ;;  %v6047_v62 = vpack.c.bf16 %v6460_v27, %v6459_v35 }
 0x5cb   : > { %6034 = vmatprep.subr.bf16.mxu0 %v6033_v47  ;;  %v7999_v38 = vpop.eup %6877 }
 0x5cc   : > { %v1424_v50 = vsel %vm963_vm2, %v7999_v38, 0.0 }
 0x5cd   : > { %1419 = vadd.xlane.f32.xlu0 %v1418_v48 }
 0x5ce   : > { %6036 = vmatpush3.bf16.msra.mxu0 %v6033_v47 }
 0x5cf   : > { %6038 = vmatprep.subr.bf16.mxu0 %v6037_v43 }
 0x5d2   : > { %6467 = vrot.lane.b32.xlu1 %v7699_v25, %s7321_s29  ;;  %6040 = vmatpush3.bf16.msra.mxu0 %v6037_v43 }
 0x5d3   : > { %6043 = vmatprep.subr.msk.bf16.mxu0 %vm7672_vm1, %v6041_v40 }
 0x5e3   : > { %6462 = vrot.lane.b32.xlu0 %v7693_v18, %s7321_s29 }
 0x5e7   : > { %1607 = vrot.lane.b32.xlu0 %v7685_v9, %s7321_s29 }
 0x5eb   : > { %1611 = vrot.lane.b32.xlu0 %v7707_v28, %s7321_s29 }
 0x5ef   : > { %1615 = vrot.lane.b32.xlu0 %v7717_v31, %s7321_s29 }
 0x5f3   : > { %1619 = vrot.lane.b32.xlu0 %v7725_v33, %s7321_s29 }
 0x5f6   : > { %1428 = vadd.xlane.f32.xlu1 %v1427_v22 }
 0x5fa   : > { %1425 = vadd.xlane.f32.xlu1 %v1424_v50 }
 0x60b   : > { %1609 = vrot.lane.b32.xlu1 %v7709_v29, %s7321_s29 }
 0x60f   : > { %1613 = vrot.lane.b32.xlu1 %v7711_v30, %s7321_s29 }
 0x613   : > { %1617 = vrot.lane.b32.xlu1 %v7719_v32, %s7321_s29 }
 0x617   : > { %1621 = vrot.lane.b32.xlu1 %v7727_v34, %s7321_s29 }
 0x649   : > { %v1411_v16 = vpop.xlane.xlu1 %1410 }
 0x64a   : > { %6879 = vrcp.f32 %v1411_v16  ;;  %v1408_v20 = vpop.xlane.xlu0 %1407 }
 0x64b   : > { %6881 = vrcp.f32 %v1408_v20 }
 0x64e   : > { %v1417_v11 = vpop.xlane.xlu1 %1416 }
 0x64f   : > { %6883 = vrcp.f32 %v1417_v11 }
 0x652   : > { %v1414_v14 = vpop.xlane.xlu0 %1413  ;;  %v6468_v48 = vpop.permute.xlu1 %6467 }
 0x653   : > { %6885 = vrcp.f32 %v1414_v14  ;;  %v6470_v43 = vunpack.i.h.bf16 %v6468_v48 }
 0x654   : > { %v6880_v55 = vpop.eup %6879 }
 0x655   : > { %v6882_v26 = vpop.eup %6881  ;;  %v1433_v57 = vmul.f32 %v6880_v55, %v7955_v54 }
 0x656   : > { %v1423_v37 = vpop.xlane.xlu0 %1422  ;;  %v1431_v23 = vmul.f32 %v6882_v26, %v7957_v53 }
 0x657   : > { %6887 = vrcp.f32 %v1423_v37 }
 0x658   : > { %5473 = vmatprep.mubr.msk.f32.mxu0 %vm963_vm2, %v1431_v23 }
 0x659   : > { %5474 = vmatmul.mubr.msk.f32.vlgmr.msra.gmra.mrb[16].mxu0 %vm963_vm2, %v1433_v57  ;;  %v6884_v4 = vpop.eup %6883 }
 0x65a   : > { %6046 = vmatpush3.bf16.xpose.msk.msra.mxu0 %vm7672_vm1, %v6041_v40  ;;  %v1420_v63 = vpop.xlane.xlu0 %1419  ;;  %v1437_v47 = vmul.f32 %v6884_v4, %v7963_v19 }
 0x65b   : > { %6889 = vrcp.f32 %v1420_v63  ;;  %6049 = vmatprep.subr.msk.bf16.mxu0 %vm7672_vm1, %v6047_v62 }
 0x65d   : > { %v6886_v6 = vpop.eup %6885 }
 0x65e   : > { %v6463_v44 = vpop.permute.xlu0 %6462  ;;  %v1435_v53 = vmul.f32 %v6886_v6, %v7967_v36  ;;  %v6469_v36 = vunpack.i.l.bf16 %v6468_v48 }
 0x65f   : > { %v6465_v54 = vunpack.i.h.bf16 %v6463_v44  ;;  %v6464_v46 = vunpack.i.l.bf16 %v6463_v44 }
 0x660   : > { %5476 = vmatprep.mubr.msk.f32.mxu0 %vm963_vm2, %v1435_v53  ;;  %v6059_v52 = vpack.c.bf16 %v6470_v43, %v6469_v36 }
 0x661   : > { %v6053_v24 = vpack.c.bf16 %v6465_v54, %v6464_v46  ;;  %5477 = vmatmul.mubr.msk.f32.gmra.mrb[18].mxu0 %vm963_vm2, %v1437_v47  ;;  %v6888_v58 = vpop.eup %6887 }
 0x662   : > { %6052 = vmatpush3.bf16.xpose.msk.msra.mxu0 %vm7672_vm1, %v6047_v62  ;;  %v1441_v19 = vmul.f32 %v6888_v58, %v7971_v39 }
 0x663   : > { %6055 = vmatprep.subr.msk.bf16.mxu0 %vm7672_vm1, %v6053_v24 }
 0x665   : > { %v6890_v59 = vpop.eup %6889 }
 0x666   : > { %v1439_v40 = vmul.f32 %v6890_v59, %v7975_v21  ;;  %v1608_v21 = vpop.permute.xlu0 %1607 }
 0x668   : > { %5479 = vmatprep.mubr.msk.f32.mxu0 %vm963_vm2, %v1439_v40 }
 0x669   : > { %5480 = vmatmul.mubr.msk.f32.gmra.mrb[20].mxu0 %vm963_vm2, %v1441_v19 }
 0x66a   : > { %6058 = vmatpush3.bf16.xpose.msk.msra.mxu0 %vm7672_vm1, %v6053_v24  ;;  %v1612_v16 = vpop.permute.xlu0 %1611 }
 0x66b   : > { %6061 = vmatprep.subr.msk.bf16.mxu0 %vm7672_vm1, %v6059_v52 }
 0x66e   : > { %v1616_v11 = vpop.permute.xlu0 %1615 }
 0x672   : > { %6064 = vmatpush3.bf16.xpose.msk.msra.mxu0 %vm7672_vm1, %v6059_v52 }
 0x683   : > { %v1429_v42 = vpop.xlane.xlu1 %1428 }
 0x684   : > { %6891 = vrcp.f32 %v1429_v42 }
 0x687   : > { %v1426_v45 = vpop.xlane.xlu1 %1425 }
 0x688   : > { %6893 = vrcp.f32 %v1426_v45 }
 0x68b   : > { %v1610_v22 = vpop.permute.xlu1 %1609 }
 0x68e   : > { %v6892_v39 = vpop.eup %6891 }
 0x68f   : > { %v1445_v15 = vmul.f32 %v6892_v39, %v7993_v13  ;;  %v1614_v20 = vpop.permute.xlu1 %1613 }
 0x692   : > { %v6894_v12 = vpop.eup %6893 }
 0x693   : > { %v1443_v50 = vmul.f32 %v6894_v12, %v7999_v38  ;;  %v1618_v14 = vpop.permute.xlu1 %1617  ;;  %v1620_v38 = vpop.permute.xlu0 %1619 }
 0x695   : > { %5482 = vmatprep.mubr.msk.f32.mxu0 %vm963_vm2, %v1443_v50 }
 0x696   : > { %5483 = vmatmul.mubr.msk.f32.gmra.mrb[22].mxu0 %vm963_vm2, %v1445_v15 }
 0x697   : > { %5501 = vmatprep.mubr.msk.f32.mxu0 %vm801_vm0, %v1608_v21  ;;  %v1622_v13 = vpop.permute.xlu1 %1621 }
 0x69a   : > { %5502 = vmatmul.mubr.msk.f32.vlgmr.msra.gmra.mrb[24].mxu0 %vm801_vm0, %v1610_v22 }
 0x69b   : > { %5504 = vmatprep.mubr.msk.f32.mxu0 %vm801_vm0, %v1612_v16 }
 0x69e   : > { %5505 = vmatmul.mubr.msk.f32.gmra.mrb[26].mxu0 %vm801_vm0, %v1614_v20 }
 0x69f   : > { %5507 = vmatprep.mubr.msk.f32.mxu0 %vm801_vm0, %v1616_v11 }
 0x6a2   : > { %5508 = vmatmul.mubr.msk.f32.gmra.mrb[28].mxu0 %vm801_vm0, %v1618_v14 }
 0x6a3   : > { %5510 = vmatprep.mubr.msk.f32.mxu0 %vm801_vm0, %v1620_v38 }
 0x6a6   : > { %5511 = vmatmul.mubr.msk.f32.gmra.mrb[30].mxu0 %vm801_vm0, %v1622_v13 }
 0x72c   : > { %v8049_v55 = vpop.f32.mrb[16].mxu0 }
 0x72d   : > { %v8051_v26 = vpop.f32.mrb[17].mxu0 }
 0x734   : > { %v8055_v35 = vpop.f32.mrb[18].mxu0 }
 0x735   : > { %v8057_v37 = vpop.f32.mrb[19].mxu0 }
 0x73c   : > { %v8061_v57 = vpop.f32.mrb[20].mxu0 }
 0x73d   : > { %v8063_v62 = vpop.f32.mrb[21].mxu0 }
 0x769   : > { %v8067_v4 = vpop.f32.mrb[22].mxu0 }
 0x76a   : > { %9202 = vst [vmem:[#allocation26_spill] sm:$0xff] %v8067_v4  ;;  %v8069_v6 = vpop.f32.mrb[23].mxu0 }
 0x76b   : > { %9203 = vst [vmem:[#allocation27_spill] sm:$0xff] %v8069_v6 }
 0x76d   : > { %v5503_v53 = vpop.f32.mrb[24].mxu0 }
 0x76e   : > { %v1777_v54 = vmul.f32 0.088388346, %v5503_v53  ;;  %v1737_v46 = vpop.f32.mrb[25].mxu0 }
 0x76f   : > { %v1776_v47 = vmul.f32 0.088388346, %v1737_v46 }
 0x770   : > { %v1787_v24 = vsel %vm963_vm2, %v1777_v54, -inf }
 0x771   : > { %1788 = vmax.xlane.f32.xlu1 %v1787_v24  ;;  %v5506_v48 = vpop.f32.mrb[26].mxu0  ;;  %v1784_v58 = vsel %vm963_vm2, %v1776_v47, -inf }
 0x772   : > { %v1779_v59 = vmul.f32 0.088388346, %v5506_v48  ;;  %1785 = vmax.xlane.f32.xlu0 %v1784_v58  ;;  %v1747_v43 = vpop.f32.mrb[27].mxu0 }
 0x773   : > { %v1778_v40 = vmul.f32 0.088388346, %v1747_v43 }
 0x774   : > { %v1793_v36 = vsel %vm963_vm2, %v1779_v59, -inf }
 0x775   : > { %v5509_v19 = vpop.f32.mrb[28].mxu0  ;;  %v1790_v12 = vsel %vm963_vm2, %v1778_v40, -inf }
 0x776   : > { %v1781_v52 = vmul.f32 0.088388346, %v5509_v19  ;;  %1794 = vmax.xlane.f32.xlu0 %v1793_v36  ;;  %v1757_v42 = vpop.f32.mrb[29].mxu0 }
 0x777   : > { %v1780_v21 = vmul.f32 0.088388346, %v1757_v42 }
 0x778   : > { %v1799_v45 = vsel %vm963_vm2, %v1781_v52, -inf }
 0x779   : > { %1800 = vmax.xlane.f32.xlu1 %v1799_v45  ;;  %v5512_v39 = vpop.f32.mrb[30].mxu0  ;;  %v1796_v20 = vsel %vm963_vm2, %v1780_v21, -inf }
 0x77a   : > { %v8078_v22 = vmul.f32 0.088388346, %v5512_v39  ;;  %1791 = vmax.xlane.f32.xlu0 %v1790_v12  ;;  %v1767_v50 = vpop.f32.mrb[31].mxu0 }
 0x77b   : > { %v8082_v16 = vmul.f32 0.088388346, %v1767_v50 }
 0x77c   : > { %v1805_v15 = vsel %vm963_vm2, %v8078_v22, -inf }
 0x77d   : > { %1806 = vmax.xlane.f32.xlu1 %v1805_v15  ;;  %v1802_v11 = vsel %vm963_vm2, %v8082_v16, -inf }
 0x77e   : > { %1797 = vmax.xlane.f32.xlu0 %v1796_v20 }
 0x782   : > { %1803 = vmax.xlane.f32.xlu0 %v1802_v11 }
 0x78e   : > { %6477 = vrot.lane.b32.xlu1 %v7929_v41, %s7321_s29 }
 0x792   : > { %6482 = vrot.lane.b32.xlu1 %v7935_v17, %s7321_s29 }
 0x796   : > { %6487 = vrot.lane.b32.xlu1 %v7941_v51, %s7321_s29 }
 0x798   : > { %6472 = vrot.lane.b32.xlu0 %v7947_v56, %s7321_s29 }
 0x79a   : > { %6497 = vrot.lane.b32.xlu1 %v7687_v10, %s7322_s18 }
 0x79c   : > { %6492 = vrot.lane.b32.xlu0 %v7676_v0, %s7322_s18 }
 0x7fe   : > { %v1789_v14 = vpop.xlane.xlu1 %1788 }
 0x7ff   : > { %v1809_v38 = vsub.f32 %v1777_v54, %v1789_v14  ;;  %v1786_v13 = vpop.xlane.xlu0 %1785 }
 0x800   : > { %v1808_v53 = vsub.f32 %v1776_v47, %v1786_v13 }
 0x801   : > { %v1818_v46 = vmul.f32 1.442695, %v1809_v38 }
 0x802   : > { %v1816_v24 = vmul.f32 1.442695, %v1808_v53 }
 0x803   : > { %6895 = vpow2.f32 %v1818_v46  ;;  %v1795_v48 = vpop.xlane.xlu0 %1794 }
 0x804   : > { %6897 = vpow2.f32 %v1816_v24  ;;  %v1811_v58 = vsub.f32 %v1779_v59, %v1795_v48 }
 0x806   : > { %v1822_v43 = vmul.f32 1.442695, %v1811_v58  ;;  %v1801_v36 = vpop.xlane.xlu1 %1800 }
 0x807   : > { %v1813_v19 = vsub.f32 %v1781_v52, %v1801_v36  ;;  %v1792_v42 = vpop.xlane.xlu0 %1791 }
 0x808   : > { %6899 = vpow2.f32 %v1822_v43  ;;  %v1810_v45 = vsub.f32 %v1778_v40, %v1792_v42 }
 0x809   : > { %v1826_v39 = vmul.f32 1.442695, %v1813_v19 }
 0x80a   : > { %v1820_v12 = vmul.f32 1.442695, %v1810_v45  ;;  %v1807_v50 = vpop.xlane.xlu1 %1806 }
 0x80b   : > { %v1798_v15 = vpop.xlane.xlu0 %1797 }
 0x80c   : > { %6901 = vpow2.f32 %v1820_v12  ;;  %v1812_v54 = vsub.f32 %v1780_v21, %v1798_v15 }
 0x80d   : > { %v8099_v20 = vpop.eup %6895  ;;  %6903 = vpow2.f32 %v1826_v39 }
 0x80e   : > { %v8101_v47 = vpop.eup %6897  ;;  %v1824_v11 = vmul.f32 1.442695, %v1812_v54  ;;  %v6478_v14 = vpop.permute.xlu1 %6477  ;;  %v1835_v59 = vsel %vm963_vm2, %v8099_v20, 0.0 }
 0x80f   : > { %1836 = vadd.xlane.f32.xlu1 %v1835_v59  ;;  %v1804_v52 = vpop.xlane.xlu0 %1803  ;;  %v1832_v40 = vsel %vm963_vm2, %v8101_v47, 0.0  ;;  %v6480_v46 = vunpack.i.h.bf16 %v6478_v14  ;;  %v6479_v24 = vunpack.i.l.bf16 %v6478_v14 }
 0x810   : > { %1833 = vadd.xlane.f32.xlu0 %v1832_v40  ;;  %6905 = vpow2.f32 %v1824_v11 }
 0x811   : > { %v6069_v12 = vpack.c.bf16 %v6480_v46, %v6479_v24 }
 0x812   : > { %v8107_v38 = vpop.eup %6899  ;;  %v6483_v21 = vpop.permute.xlu1 %6482 }
 0x813   : > { %v6473_v13 = vpop.permute.xlu0 %6472  ;;  %v1841_v53 = vsel %vm963_vm2, %v8107_v38, 0.0  ;;  %v6485_v45 = vunpack.i.h.bf16 %v6483_v21  ;;  %v6484_v39 = vunpack.i.l.bf16 %v6483_v21 }
 0x814   : > { %v6475_v48 = vunpack.i.h.bf16 %v6473_v13  ;;  %v6474_v58 = vunpack.i.l.bf16 %v6473_v13  ;;  %1842 = vadd.xlane.f32.xlu1 %v1841_v53 }
 0x815   : > { %v6073_v40 = vpack.c.bf16 %v6485_v45, %v6484_v39 }
 0x816   : > { %v8111_v43 = vpop.eup %6901  ;;  %v6065_v36 = vpack.c.bf16 %v6475_v48, %v6474_v58  ;;  %v6488_v15 = vpop.permute.xlu1 %6487  ;;  %v1815_v58 = vsub.f32 %v8078_v22, %v1807_v50 }
 0x817   : > { %v1838_v19 = vsel %vm963_vm2, %v8111_v43, 0.0  ;;  %v8115_v42 = vpop.eup %6903  ;;  %v6490_v14 = vunpack.i.h.bf16 %v6488_v15  ;;  %v6489_v59 = vunpack.i.l.bf16 %v6488_v15  ;;  %v6493_v13 = vpop.permute.xlu0 %6492 }
 0x818   : > { %1839 = vadd.xlane.f32.xlu0 %v1838_v19  ;;  %6066 = vmatprep.subr.bf16.mxu1 %v6065_v36  ;;  %v1847_v54 = vsel %vm963_vm2, %v8115_v42, 0.0  ;;  %v6495_v53 = vunpack.i.h.bf16 %v6493_v13  ;;  %v6494_v46 = vunpack.i.l.bf16 %v6493_v13  ;;  %v1814_v19 = vsub.f32 %v8082_v16, %v1804_v52 }
 0x819   : > { %6068 = vmatpush3.bf16.msra.mxu1 %v6065_v36  ;;  %v6077_v24 = vpack.c.bf16 %v6490_v14, %v6489_v59  ;;  %v1830_v36 = vmul.f32 1.442695, %v1815_v58 }
 0x81a   : > { %6070 = vmatprep.subr.bf16.mxu1 %v6069_v12  ;;  %v8119_v11 = vpop.eup %6905  ;;  %v6081_v48 = vpack.c.bf16 %v6495_v53, %v6494_v46  ;;  %v1828_v45 = vmul.f32 1.442695, %v1814_v19  ;;  %v6498_v52 = vpop.permute.xlu1 %6497 }
 0x81b   : > { %v1844_v21 = vsel %vm963_vm2, %v8119_v11, 0.0  ;;  %6907 = vpow2.f32 %v1830_v36  ;;  %v6500_v13 = vunpack.i.h.bf16 %v6498_v52 }
 0x81c   : > { %1848 = vadd.xlane.f32.xlu0 %v1847_v54  ;;  %6909 = vpow2.f32 %v1828_v45 }
 0x81d   : > { %6072 = vmatpush3.bf16.msra.mxu1 %v6069_v12 }
 0x81e   : > { %6074 = vmatprep.subr.bf16.mxu1 %v6073_v40 }
 0x820   : > { %1845 = vadd.xlane.f32.xlu0 %v1844_v21  ;;  %v6499_v21 = vunpack.i.l.bf16 %v6498_v52 }
 0x821   : > { %6076 = vmatpush3.bf16.msra.mxu1 %v6073_v40 }
 0x822   : > { %6078 = vmatprep.subr.bf16.mxu1 %v6077_v24  ;;  %v6087_v58 = vpack.c.bf16 %v6500_v13, %v6499_v21 }
 0x825   : > { %6507 = vrot.lane.b32.xlu1 %v7699_v25, %s7322_s18  ;;  %6080 = vmatpush3.bf16.msra.mxu1 %v6077_v24  ;;  %v8137_v39 = vpop.eup %6907 }
 0x826   : > { %6083 = vmatprep.subr.msk.bf16.mxu1 %vm7672_vm1, %v6081_v48  ;;  %v1853_v22 = vsel %vm963_vm2, %v8137_v39, 0.0  ;;  %v8143_v16 = vpop.eup %6909 }
 0x827   : > { %v1850_v50 = vsel %vm963_vm2, %v8143_v16, 0.0 }
 0x836   : > { %6502 = vrot.lane.b32.xlu0 %v7693_v18, %s7322_s18 }
 0x83a   : > { %2025 = vrot.lane.b32.xlu0 %v7685_v9, %s7322_s18 }
 0x83e   : > { %2029 = vrot.lane.b32.xlu0 %v7707_v28, %s7322_s18 }
 0x842   : > { %2033 = vrot.lane.b32.xlu0 %v7717_v31, %s7322_s18 }
 0x846   : > { %2037 = vrot.lane.b32.xlu0 %v7725_v33, %s7322_s18 }
 0x849   : > { %1854 = vadd.xlane.f32.xlu1 %v1853_v22 }
 0x84d   : > { %1851 = vadd.xlane.f32.xlu1 %v1850_v50 }
 0x85e   : > { %2027 = vrot.lane.b32.xlu1 %v7709_v29, %s7322_s18 }
 0x862   : > { %2031 = vrot.lane.b32.xlu1 %v7711_v30, %s7322_s18 }
 0x866   : > { %2035 = vrot.lane.b32.xlu1 %v7719_v32, %s7322_s18 }
 0x86a   : > { %2039 = vrot.lane.b32.xlu1 %v7727_v34, %s7322_s18 }
 0x89c   : > { %v1837_v12 = vpop.xlane.xlu1 %1836 }
 0x89d   : > { %6911 = vrcp.f32 %v1837_v12  ;;  %v1834_v15 = vpop.xlane.xlu0 %1833 }
 0x89e   : > { %6913 = vrcp.f32 %v1834_v15 }
 0x8a1   : > { %v1843_v54 = vpop.xlane.xlu1 %1842 }
 0x8a2   : > { %6915 = vrcp.f32 %v1843_v54 }
 0x8a5   : > { %v1840_v14 = vpop.xlane.xlu0 %1839 }
 0x8a6   : > { %6917 = vrcp.f32 %v1840_v14 }
 0x8a7   : > { %v6912_v59 = vpop.eup %6911 }
 0x8a8   : > { %v6914_v40 = vpop.eup %6913  ;;  %v1859_v24 = vmul.f32 %v6912_v59, %v8099_v20 }
 0x8a9   : > { %v1849_v53 = vpop.xlane.xlu0 %1848  ;;  %v1857_v46 = vmul.f32 %v6914_v40, %v8101_v47 }
 0x8aa   : > { %6919 = vrcp.f32 %v1849_v53 }
 0x8ab   : > { %5529 = vmatprep.mubr.msk.f32.mxu1 %vm963_vm2, %v1857_v46 }
 0x8ac   : > { %5530 = vmatmul.mubr.msk.f32.vlgmr.msra.gmra.mrb[32].mxu1 %vm963_vm2, %v1859_v24  ;;  %v6916_v19 = vpop.eup %6915 }
 0x8ad   : > { %6086 = vmatpush3.bf16.xpose.msk.msra.mxu1 %vm7672_vm1, %v6081_v48  ;;  %v1846_v36 = vpop.xlane.xlu0 %1845  ;;  %v1863_v52 = vmul.f32 %v6916_v19, %v8107_v38  ;;  %v6508_v48 = vpop.permute.xlu1 %6507 }
 0x8ae   : > { %6921 = vrcp.f32 %v1846_v36  ;;  %6089 = vmatprep.subr.msk.bf16.mxu1 %vm7672_vm1, %v6087_v58  ;;  %v6510_v14 = vunpack.i.h.bf16 %v6508_v48 }
 0x8b0   : > { %v6918_v45 = vpop.eup %6917 }
 0x8b1   : > { %v6503_v22 = vpop.permute.xlu0 %6502  ;;  %v1861_v47 = vmul.f32 %v6918_v45, %v8111_v43  ;;  %v6509_v43 = vunpack.i.l.bf16 %v6508_v48 }
 0x8b2   : > { %v6505_v20 = vunpack.i.h.bf16 %v6503_v22  ;;  %v6504_v50 = vunpack.i.l.bf16 %v6503_v22 }
 0x8b3   : > { %5532 = vmatprep.mubr.msk.f32.mxu1 %vm963_vm2, %v1861_v47  ;;  %v6099_v40 = vpack.c.bf16 %v6510_v14, %v6509_v43 }
 0x8b4   : > { %v6093_v12 = vpack.c.bf16 %v6505_v20, %v6504_v50  ;;  %5533 = vmatmul.mubr.msk.f32.gmra.mrb[34].mxu1 %vm963_vm2, %v1863_v52  ;;  %v6920_v15 = vpop.eup %6919 }
 0x8b5   : > { %6092 = vmatpush3.bf16.xpose.msk.msra.mxu1 %vm7672_vm1, %v6087_v58  ;;  %v1867_v38 = vmul.f32 %v6920_v15, %v8115_v42 }
 0x8b6   : > { %6095 = vmatprep.subr.msk.bf16.mxu1 %vm7672_vm1, %v6093_v12 }
 0x8b8   : > { %v6922_v54 = vpop.eup %6921 }
 0x8b9   : > { %v1865_v59 = vmul.f32 %v6922_v54, %v8119_v11  ;;  %v2026_v11 = vpop.permute.xlu0 %2025 }
 0x8bb   : > { %5535 = vmatprep.mubr.msk.f32.mxu1 %vm963_vm2, %v1865_v59 }
 0x8bc   : > { %5536 = vmatmul.mubr.msk.f32.gmra.mrb[36].mxu1 %vm963_vm2, %v1867_v38 }
 0x8bd   : > { %6098 = vmatpush3.bf16.xpose.msk.msra.mxu1 %vm7672_vm1, %v6093_v12  ;;  %v2030_v36 = vpop.permute.xlu0 %2029 }
 0x8be   : > { %6101 = vmatprep.subr.msk.bf16.mxu1 %vm7672_vm1, %v6099_v40 }
 0x8c1   : > { %v2034_v45 = vpop.permute.xlu0 %2033 }
 0x8c5   : > { %6104 = vmatpush3.bf16.xpose.msk.msra.mxu1 %vm7672_vm1, %v6099_v40 }
 0x8d6   : > { %v1855_v13 = vpop.xlane.xlu1 %1854 }
 0x8d7   : > { %6923 = vrcp.f32 %v1855_v13 }
 0x8da   : > { %v1852_v21 = vpop.xlane.xlu1 %1851 }
 0x8db   : > { %6925 = vrcp.f32 %v1852_v21 }
 0x8de   : > { %v2028_v46 = vpop.permute.xlu1 %2027 }
 0x8e1   : > { %v6924_v42 = vpop.eup %6923 }
 0x8e2   : > { %v1871_v58 = vmul.f32 %v6924_v42, %v8137_v39  ;;  %v2032_v19 = vpop.permute.xlu1 %2031 }
 0x8e5   : > { %v6926_v53 = vpop.eup %6925 }
 0x8e6   : > { %v1869_v24 = vmul.f32 %v6926_v53, %v8143_v16  ;;  %v2036_v22 = vpop.permute.xlu1 %2035  ;;  %v2038_v16 = vpop.permute.xlu0 %2037 }
 0x8e8   : > { %5538 = vmatprep.mubr.msk.f32.mxu1 %vm963_vm2, %v1869_v24 }
 0x8e9   : > { %5539 = vmatmul.mubr.msk.f32.gmra.mrb[38].mxu1 %vm963_vm2, %v1871_v58 }
 0x8ea   : > { %5557 = vmatprep.mubr.msk.f32.mxu1 %vm801_vm0, %v2026_v11  ;;  %v2040_v39 = vpop.permute.xlu1 %2039 }
 0x8ed   : > { %5558 = vmatmul.mubr.msk.f32.vlgmr.msra.gmra.mrb[40].mxu1 %vm801_vm0, %v2028_v46 }
 0x8ee   : > { %5560 = vmatprep.mubr.msk.f32.mxu1 %vm801_vm0, %v2030_v36 }
 0x8f1   : > { %5561 = vmatmul.mubr.msk.f32.gmra.mrb[42].mxu1 %vm801_vm0, %v2032_v19 }
 0x8f2   : > { %5563 = vmatprep.mubr.msk.f32.mxu1 %vm801_vm0, %v2034_v45 }
 0x8f5   : > { %5564 = vmatmul.mubr.msk.f32.gmra.mrb[44].mxu1 %vm801_vm0, %v2036_v22 }
 0x8f6   : > { %5566 = vmatprep.mubr.msk.f32.mxu1 %vm801_vm0, %v2038_v16 }
 0x8f9   : > { %5567 = vmatmul.mubr.msk.f32.gmra.mrb[46].mxu1 %vm801_vm0, %v2040_v39 }
 0x97f   : > { %v8193_v47 = vpop.f32.mrb[32].mxu1 }
 0x980   : > { %v8195_v20 = vpop.f32.mrb[33].mxu1 }
 0x987   : > { %v8199_v52 = vpop.f32.mrb[34].mxu1 }
 0x988   : > { %v8201_v12 = vpop.f32.mrb[35].mxu1 }
 0x98f   : > { %v8205_v15 = vpop.f32.mrb[36].mxu1 }
 0x990   : > { %v8207_v54 = vpop.f32.mrb[37].mxu1 }
 0x9bc   : > { %v8211_v43 = vpop.f32.mrb[38].mxu1 }
 0x9bd   : > { %9204 = vst [vmem:[#allocation28_spill] sm:$0xff] %v8211_v43  ;;  %v8213_v59 = vpop.f32.mrb[39].mxu1 }
 0x9be   : > { %9205 = vst [vmem:[#allocation29_spill] sm:$0xff] %v8213_v59 }
 0x9c0   : > { %v5559_v40 = vpop.f32.mrb[40].mxu1 }
 0x9c1   : > { %v2195_v13 = vmul.f32 0.088388346, %v5559_v40  ;;  %v2155_v21 = vpop.f32.mrb[41].mxu1 }
 0x9c2   : > { %v2194_v11 = vmul.f32 0.088388346, %v2155_v21 }
 0x9c3   : > { %v2205_v42 = vsel %vm963_vm2, %v2195_v13, -inf }
 0x9c4   : > { %2206 = vmax.xlane.f32.xlu1 %v2205_v42  ;;  %v5562_v53 = vpop.f32.mrb[42].mxu1  ;;  %v2202_v46 = vsel %vm963_vm2, %v2194_v11, -inf }
 0x9c5   : > { %v2197_v24 = vmul.f32 0.088388346, %v5562_v53  ;;  %2203 = vmax.xlane.f32.xlu0 %v2202_v46  ;;  %v2165_v58 = vpop.f32.mrb[43].mxu1 }
 0x9c6   : > { %v2196_v19 = vmul.f32 0.088388346, %v2165_v58 }
 0x9c7   : > { %v2211_v36 = vsel %vm963_vm2, %v2197_v24, -inf }
 0x9c8   : > { %v5565_v45 = vpop.f32.mrb[44].mxu1  ;;  %v2208_v42 = vsel %vm963_vm2, %v2196_v19, -inf }
 0x9c9   : > { %v2199_v22 = vmul.f32 0.088388346, %v5565_v45  ;;  %2212 = vmax.xlane.f32.xlu0 %v2211_v36  ;;  %v2175_v16 = vpop.f32.mrb[45].mxu1 }
 0x9ca   : > { %v2198_v40 = vmul.f32 0.088388346, %v2175_v16 }
 0x9cb   : > { %v2217_v39 = vsel %vm963_vm2, %v2199_v22, -inf }
 0x9cc   : > { %2218 = vmax.xlane.f32.xlu1 %v2217_v39  ;;  %v5568_v21 = vpop.f32.mrb[46].mxu1  ;;  %v2214_v58 = vsel %vm963_vm2, %v2198_v40, -inf }
 0x9cd   : > { %v8222_v38 = vmul.f32 0.088388346, %v5568_v21  ;;  %2209 = vmax.xlane.f32.xlu0 %v2208_v42  ;;  %v2185_v53 = vpop.f32.mrb[47].mxu1 }
 0x9ce   : > { %v8226_v44 = vmul.f32 0.088388346, %v2185_v53 }
 0x9cf   : > { %v2223_v46 = vsel %vm963_vm2, %v8222_v38, -inf }
 0x9d0   : > { %2224 = vmax.xlane.f32.xlu1 %v2223_v46  ;;  %v2220_v36 = vsel %vm963_vm2, %v8226_v44, -inf }
 0x9d1   : > { %2215 = vmax.xlane.f32.xlu0 %v2214_v58 }
 0x9d5   : > { %2221 = vmax.xlane.f32.xlu0 %v2220_v36 }
 0x9e1   : > { %6517 = vrot.lane.b32.xlu1 %v7929_v41, %s7322_s18 }
 0x9e5   : > { %6522 = vrot.lane.b32.xlu1 %v7935_v17, %s7322_s18 }
 0x9e9   : > { %6527 = vrot.lane.b32.xlu1 %v7941_v51, %s7322_s18 }
 0x9eb   : > { %6512 = vrot.lane.b32.xlu0 %v7947_v56, %s7322_s18 }
 0x9ed   : > { %6537 = vrot.lane.b32.xlu1 %v7687_v10, %s7323_s16 }
 0x9ef   : > { %6532 = vrot.lane.b32.xlu0 %v7676_v0, %s7323_s16 }
 0xa51   : > { %v2207_v45 = vpop.xlane.xlu1 %2206 }
 0xa52   : > { %v2227_v16 = vsub.f32 %v2195_v13, %v2207_v45  ;;  %v2204_v39 = vpop.xlane.xlu0 %2203 }
 0xa53   : > { %v2226_v21 = vsub.f32 %v2194_v11, %v2204_v39 }
 0xa54   : > { %v2236_v42 = vmul.f32 1.442695, %v2227_v16 }
 0xa55   : > { %v2234_v53 = vmul.f32 1.442695, %v2226_v21 }
 0xa56   : > { %6927 = vpow2.f32 %v2236_v42  ;;  %v2213_v46 = vpop.xlane.xlu0 %2212 }
 0xa57   : > { %6929 = vpow2.f32 %v2234_v53  ;;  %v2229_v58 = vsub.f32 %v2197_v24, %v2213_v46 }
 0xa59   : > { %v2240_v36 = vmul.f32 1.442695, %v2229_v58  ;;  %v2219_v14 = vpop.xlane.xlu1 %2218 }
 0xa5a   : > { %v2231_v63 = vsub.f32 %v2199_v22, %v2219_v14  ;;  %v2210_v48 = vpop.xlane.xlu0 %2209 }
 0xa5b   : > { %6931 = vpow2.f32 %v2240_v36  ;;  %v2228_v23 = vsub.f32 %v2196_v19, %v2210_v48 }
 0xa5c   : > { %v2244_v27 = vmul.f32 1.442695, %v2231_v63 }
 0xa5d   : > { %v2238_v50 = vmul.f32 1.442695, %v2228_v23  ;;  %v2225_v49 = vpop.xlane.xlu1 %2224 }
 0xa5e   : > { %v2216_v8 = vpop.xlane.xlu0 %2215 }
 0xa5f   : > { %6933 = vpow2.f32 %v2238_v50  ;;  %v2230_v13 = vsub.f32 %v2198_v40, %v2216_v8 }
 0xa60   : > { %v8243_v45 = vpop.eup %6927  ;;  %6935 = vpow2.f32 %v2244_v27 }
 0xa61   : > { %v8245_v11 = vpop.eup %6929  ;;  %v2242_v16 = vmul.f32 1.442695, %v2230_v13  ;;  %v6518_v39 = vpop.permute.xlu1 %6517  ;;  %v2253_v24 = vsel %vm963_vm2, %v8243_v45, 0.0 }
 0xa62   : > { %2254 = vadd.xlane.f32.xlu1 %v2253_v24  ;;  %v2222_v14 = vpop.xlane.xlu0 %2221  ;;  %v2250_v63 = vsel %vm963_vm2, %v8245_v11, 0.0  ;;  %v6520_v27 = vunpack.i.h.bf16 %v6518_v39  ;;  %v6519_v19 = vunpack.i.l.bf16 %v6518_v39 }
 0xa63   : > { %2251 = vadd.xlane.f32.xlu0 %v2250_v63  ;;  %6937 = vpow2.f32 %v2242_v16 }
 0xa64   : > { %v6109_v13 = vpack.c.bf16 %v6520_v27, %v6519_v19 }
 0xa65   : > { %v8251_v23 = vpop.eup %6931  ;;  %v6523_v8 = vpop.permute.xlu1 %6522 }
 0xa66   : > { %v6513_v50 = vpop.permute.xlu0 %6512  ;;  %v2259_v48 = vsel %vm963_vm2, %v8251_v23, 0.0  ;;  %v6525_v58 = vunpack.i.h.bf16 %v6523_v8  ;;  %v6524_v36 = vunpack.i.l.bf16 %v6523_v8 }
 0xa67   : > { %v6515_v22 = vunpack.i.h.bf16 %v6513_v50  ;;  %v6514_v40 = vunpack.i.l.bf16 %v6513_v50  ;;  %2260 = vadd.xlane.f32.xlu1 %v2259_v48 }
 0xa68   : > { %v6113_v48 = vpack.c.bf16 %v6525_v58, %v6524_v36  ;;  %v2232_v36 = vsub.f32 %v8226_v44, %v2222_v14 }
 0xa69   : > { %v8255_v21 = vpop.eup %6933  ;;  %v6105_v42 = vpack.c.bf16 %v6515_v22, %v6514_v40  ;;  %v6528_v16 = vpop.permute.xlu1 %6527 }
 0xa6a   : > { %v2256_v53 = vsel %vm963_vm2, %v8255_v21, 0.0  ;;  %v8259_v46 = vpop.eup %6935  ;;  %v6530_v63 = vunpack.i.h.bf16 %v6528_v16  ;;  %v6529_v50 = vunpack.i.l.bf16 %v6528_v16  ;;  %v6533_v22 = vpop.permute.xlu0 %6532 }
 0xa6b   : > { %2257 = vadd.xlane.f32.xlu0 %v2256_v53  ;;  %6106 = vmatprep.subr.bf16.mxu0 %v6105_v42  ;;  %v2265_v39 = vsel %vm963_vm2, %v8259_v46, 0.0  ;;  %v6535_v40 = vunpack.i.h.bf16 %v6533_v22  ;;  %v6534_v27 = vunpack.i.l.bf16 %v6533_v22  ;;  %v2233_v53 = vsub.f32 %v8222_v38, %v2225_v49 }
 0xa6c   : > { %6108 = vmatpush3.bf16.msra.mxu0 %v6105_v42  ;;  %v6117_v19 = vpack.c.bf16 %v6530_v63, %v6529_v50 }
 0xa6d   : > { %6110 = vmatprep.subr.bf16.mxu0 %v6109_v13  ;;  %v8263_v24 = vpop.eup %6937  ;;  %v6121_v42 = vpack.c.bf16 %v6535_v40, %v6534_v27  ;;  %v2248_v58 = vmul.f32 1.442695, %v2233_v53  ;;  %v6538_v14 = vpop.permute.xlu1 %6537 }
 0xa6e   : > { %v2262_v8 = vsel %vm963_vm2, %v8263_v24, 0.0  ;;  %v6540_v40 = vunpack.i.h.bf16 %v6538_v14  ;;  %v6539_v27 = vunpack.i.l.bf16 %v6538_v14 }
 0xa6f   : > { %2266 = vadd.xlane.f32.xlu0 %v2265_v39  ;;  %6939 = vpow2.f32 %v2248_v58 }
 0xa70   : > { %6112 = vmatpush3.bf16.msra.mxu0 %v6109_v13  ;;  %v2246_v13 = vmul.f32 1.442695, %v2232_v36  ;;  %v6127_v36 = vpack.c.bf16 %v6540_v40, %v6539_v27 }
 0xa71   : > { %6114 = vmatprep.subr.bf16.mxu0 %v6113_v48 }
 0xa72   : > { %6941 = vpow2.f32 %v2246_v13 }
 0xa73   : > { %2263 = vadd.xlane.f32.xlu0 %v2262_v8 }
 0xa74   : > { %6116 = vmatpush3.bf16.msra.mxu0 %v6113_v48 }
 0xa75   : > { %6118 = vmatprep.subr.bf16.mxu0 %v6117_v19 }
 0xa78   : > { %6547 = vrot.lane.b32.xlu1 %v7699_v25, %s7323_s16  ;;  %6120 = vmatpush3.bf16.msra.mxu0 %v6117_v19 }
 0xa79   : > { %6123 = vmatprep.subr.msk.bf16.mxu0 %vm7672_vm1, %v6121_v42  ;;  %v8281_v16 = vpop.eup %6939 }
 0xa7a   : > { %v2271_v49 = vsel %vm963_vm2, %v8281_v16, 0.0 }
 0xa7c   : > { %v8287_v44 = vpop.eup %6941 }
 0xa7d   : > { %v2268_v38 = vsel %vm963_vm2, %v8287_v44, 0.0 }
 0xa89   : > { %6542 = vrot.lane.b32.xlu0 %v7693_v18, %s7323_s16 }
 0xa8d   : > { %2443 = vrot.lane.b32.xlu0 %v7685_v9, %s7323_s16 }
 0xa91   : > { %2447 = vrot.lane.b32.xlu0 %v7707_v28, %s7323_s16 }
 0xa95   : > { %2451 = vrot.lane.b32.xlu0 %v7717_v31, %s7323_s16 }
 0xa99   : > { %2455 = vrot.lane.b32.xlu0 %v7725_v33, %s7323_s16 }
 0xa9c   : > { %2272 = vadd.xlane.f32.xlu1 %v2271_v49 }
 0xaa0   : > { %2269 = vadd.xlane.f32.xlu1 %v2268_v38 }
 0xab1   : > { %2445 = vrot.lane.b32.xlu1 %v7709_v29, %s7323_s16 }
 0xab5   : > { %2449 = vrot.lane.b32.xlu1 %v7711_v30, %s7323_s16 }
 0xab9   : > { %2453 = vrot.lane.b32.xlu1 %v7719_v32, %s7323_s16 }
 0xabd   : > { %2457 = vrot.lane.b32.xlu1 %v7727_v34, %s7323_s16 }
 0xaef   : > { %v2255_v39 = vpop.xlane.xlu1 %2254 }
 0xaf0   : > { %6943 = vrcp.f32 %v2255_v39  ;;  %v2252_v63 = vpop.xlane.xlu0 %2251 }
 0xaf1   : > { %6945 = vrcp.f32 %v2252_v63 }
 0xaf4   : > { %v2261_v50 = vpop.xlane.xlu1 %2260 }
 0xaf5   : > { %6947 = vrcp.f32 %v2261_v50 }
 0xaf8   : > { %v2258_v48 = vpop.xlane.xlu0 %2257 }
 0xaf9   : > { %6949 = vrcp.f32 %v2258_v48 }
 0xafa   : > { %v6944_v22 = vpop.eup %6943 }
 0xafb   : > { %v6946_v8 = vpop.eup %6945  ;;  %v2277_v58 = vmul.f32 %v6944_v22, %v8243_v45 }
 0xafc   : > { %v2267_v19 = vpop.xlane.xlu0 %2266  ;;  %v2275_v53 = vmul.f32 %v6946_v8, %v8245_v11 }
 0xafd   : > { %6951 = vrcp.f32 %v2267_v19 }
 0xafe   : > { %5585 = vmatprep.mubr.msk.f32.mxu0 %vm963_vm2, %v2275_v53 }
 0xaff   : > { %5586 = vmatmul.mubr.msk.f32.vlgmr.msra.gmra.mrb[32].mxu0 %vm963_vm2, %v2277_v58  ;;  %v6948_v49 = vpop.eup %6947 }
 0xb00   : > { %6126 = vmatpush3.bf16.xpose.msk.msra.mxu0 %vm7672_vm1, %v6121_v42  ;;  %v2264_v13 = vpop.xlane.xlu0 %2263  ;;  %v2281_v63 = vmul.f32 %v6948_v49, %v8251_v23  ;;  %v6548_v42 = vpop.permute.xlu1 %6547 }
 0xb01   : > { %6953 = vrcp.f32 %v2264_v13  ;;  %6129 = vmatprep.subr.msk.bf16.mxu0 %vm7672_vm1, %v6127_v36  ;;  %v6550_v8 = vunpack.i.h.bf16 %v6548_v42 }
 0xb03   : > { %v6950_v38 = vpop.eup %6949 }
 0xb04   : > { %v6543_v14 = vpop.permute.xlu0 %6542  ;;  %v2279_v11 = vmul.f32 %v6950_v38, %v8255_v21  ;;  %v6549_v21 = vunpack.i.l.bf16 %v6548_v42 }
 0xb05   : > { %v6545_v45 = vunpack.i.h.bf16 %v6543_v14  ;;  %v6544_v39 = vunpack.i.l.bf16 %v6543_v14 }
 0xb06   : > { %5588 = vmatprep.mubr.msk.f32.mxu0 %vm963_vm2, %v2279_v11  ;;  %v6139_v27 = vpack.c.bf16 %v6550_v8, %v6549_v21 }
 0xb07   : > { %v6133_v50 = vpack.c.bf16 %v6545_v45, %v6544_v39  ;;  %5589 = vmatmul.mubr.msk.f32.gmra.mrb[34].mxu0 %vm963_vm2, %v2281_v63  ;;  %v6952_v48 = vpop.eup %6951 }
 0xb08   : > { %6132 = vmatpush3.bf16.xpose.msk.msra.mxu0 %vm7672_vm1, %v6127_v36  ;;  %v2285_v23 = vmul.f32 %v6952_v48, %v8259_v46 }
 0xb09   : > { %6135 = vmatprep.subr.msk.bf16.mxu0 %vm7672_vm1, %v6133_v50 }
 0xb0b   : > { %v6954_v22 = vpop.eup %6953 }
 0xb0c   : > { %v2283_v40 = vmul.f32 %v6954_v22, %v8263_v24  ;;  %v2444_v24 = vpop.permute.xlu0 %2443 }
 0xb0e   : > { %5591 = vmatprep.mubr.msk.f32.mxu0 %vm963_vm2, %v2283_v40 }
 0xb0f   : > { %5592 = vmatmul.mubr.msk.f32.gmra.mrb[36].mxu0 %vm963_vm2, %v2285_v23 }
 0xb10   : > { %6138 = vmatpush3.bf16.xpose.msk.msra.mxu0 %vm7672_vm1, %v6133_v50  ;;  %v2448_v38 = vpop.permute.xlu0 %2447 }
 0xb11   : > { %6141 = vmatprep.subr.msk.bf16.mxu0 %vm7672_vm1, %v6139_v27 }
 0xb14   : > { %v2452_v11 = vpop.permute.xlu0 %2451 }
 0xb18   : > { %6144 = vmatpush3.bf16.xpose.msk.msra.mxu0 %vm7672_vm1, %v6139_v27 }
 0xb29   : > { %v2273_v19 = vpop.xlane.xlu1 %2272 }
 0xb2a   : > { %6955 = vrcp.f32 %v2273_v19 }
 0xb2d   : > { %v2270_v53 = vpop.xlane.xlu1 %2269 }
 0xb2e   : > { %6957 = vrcp.f32 %v2270_v53 }
 0xb31   : > { %v2446_v36 = vpop.permute.xlu1 %2445 }
 0xb34   : > { %v6956_v46 = vpop.eup %6955 }
 0xb35   : > { %v2289_v49 = vmul.f32 %v6956_v46, %v8281_v16  ;;  %v2450_v14 = vpop.permute.xlu1 %2449 }
 0xb38   : > { %v6958_v58 = vpop.eup %6957 }
 0xb39   : > { %v2287_v13 = vmul.f32 %v6958_v58, %v8287_v44  ;;  %v2454_v45 = vpop.permute.xlu1 %2453  ;;  %v2456_v44 = vpop.permute.xlu0 %2455 }
 0xb3b   : > { %5594 = vmatprep.mubr.msk.f32.mxu0 %vm963_vm2, %v2287_v13 }
 0xb3c   : > { %5595 = vmatmul.mubr.msk.f32.gmra.mrb[38].mxu0 %vm963_vm2, %v2289_v49 }
 0xb3d   : > { %5613 = vmatprep.mubr.msk.f32.mxu0 %vm801_vm0, %v2444_v24  ;;  %v2458_v16 = vpop.permute.xlu1 %2457 }
 0xb40   : > { %5614 = vmatmul.mubr.msk.f32.vlgmr.msra.gmra.mrb[40].mxu0 %vm801_vm0, %v2446_v36 }
 0xb41   : > { %5616 = vmatprep.mubr.msk.f32.mxu0 %vm801_vm0, %v2448_v38 }
 0xb44   : > { %5617 = vmatmul.mubr.msk.f32.gmra.mrb[42].mxu0 %vm801_vm0, %v2450_v14 }
 0xb45   : > { %5619 = vmatprep.mubr.msk.f32.mxu0 %vm801_vm0, %v2452_v11 }
 0xb48   : > { %5620 = vmatmul.mubr.msk.f32.gmra.mrb[44].mxu0 %vm801_vm0, %v2454_v45 }
 0xb49   : > { %5622 = vmatprep.mubr.msk.f32.mxu0 %vm801_vm0, %v2456_v44 }
 0xb4c   : > { %5623 = vmatmul.mubr.msk.f32.gmra.mrb[46].mxu0 %vm801_vm0, %v2458_v16 }
 0xbd2   : > { %v8337_v39 = vpop.f32.mrb[32].mxu0 }
 0xbd3   : > { %v8339_v63 = vpop.f32.mrb[33].mxu0 }
 0xbda   : > { %v8343_v42 = vpop.f32.mrb[34].mxu0 }
 0xbdb   : > { %v8345_v48 = vpop.f32.mrb[35].mxu0 }
 0xbe2   : > { %v8349_v8 = vpop.f32.mrb[36].mxu0 }
 0xbe3   : > { %v8351_v21 = vpop.f32.mrb[37].mxu0 }
 0xc0f   : > { %v8355_v23 = vpop.f32.mrb[38].mxu0 }
 0xc10   : > { %9206 = vst [vmem:[#allocation30_spill] sm:$0xff] %v8355_v23  ;;  %v8357_v27 = vpop.f32.mrb[39].mxu0 }
 0xc11   : > { %9207 = vst [vmem:[#allocation31_spill] sm:$0xff] %v8357_v27 }
 0xc13   : > { %v5615_v53 = vpop.f32.mrb[40].mxu0 }
 0xc14   : > { %v2613_v24 = vmul.f32 0.088388346, %v5615_v53  ;;  %v2573_v46 = vpop.f32.mrb[41].mxu0 }
 0xc15   : > { %v2612_v58 = vmul.f32 0.088388346, %v2573_v46 }
 0xc16   : > { %v2623_v36 = vsel %vm963_vm2, %v2613_v24, -inf }
 0xc17   : > { %2624 = vmax.xlane.f32.xlu1 %v2623_v36  ;;  %v5618_v13 = vpop.f32.mrb[42].mxu0  ;;  %v2620_v49 = vsel %vm963_vm2, %v2612_v58, -inf }
 0xc18   : > { %v2615_v38 = vmul.f32 0.088388346, %v5618_v13  ;;  %2621 = vmax.xlane.f32.xlu0 %v2620_v49  ;;  %v2583_v14 = vpop.f32.mrb[43].mxu0 }
 0xc19   : > { %v2614_v45 = vmul.f32 0.088388346, %v2583_v14 }
 0xc1a   : > { %v2629_v11 = vsel %vm963_vm2, %v2615_v38, -inf }
 0xc1b   : > { %v5621_v44 = vpop.f32.mrb[44].mxu0  ;;  %v2626_v36 = vsel %vm963_vm2, %v2614_v45, -inf }
 0xc1c   : > { %v2617_v16 = vmul.f32 0.088388346, %v5621_v44  ;;  %2630 = vmax.xlane.f32.xlu0 %v2629_v11  ;;  %v2593_v19 = vpop.f32.mrb[45].mxu0 }
 0xc1d   : > { %v2616_v40 = vmul.f32 0.088388346, %v2593_v19 }
 0xc1e   : > { %v2635_v53 = vsel %vm963_vm2, %v2617_v16, -inf }
 0xc1f   : > { %2636 = vmax.xlane.f32.xlu1 %v2635_v53  ;;  %v5624_v46 = vpop.f32.mrb[46].mxu0  ;;  %v2632_v14 = vsel %vm963_vm2, %v2616_v40, -inf }
 0xc20   : > { %v8366_v22 = vmul.f32 0.088388346, %v5624_v46  ;;  %2627 = vmax.xlane.f32.xlu0 %v2626_v36  ;;  %v2603_v13 = vpop.f32.mrb[47].mxu0 }
 0xc21   : > { %v8370_v50 = vmul.f32 0.088388346, %v2603_v13 }
 0xc22   : > { %v2641_v49 = vsel %vm963_vm2, %v8366_v22, -inf }
 0xc23   : > { %2642 = vmax.xlane.f32.xlu1 %v2641_v49  ;;  %v2638_v19 = vsel %vm963_vm2, %v8370_v50, -inf }
 0xc24   : > { %2633 = vmax.xlane.f32.xlu0 %v2632_v14 }
 0xc28   : > { %2639 = vmax.xlane.f32.xlu0 %v2638_v19 }
 0xc34   : > { %6557 = vrot.lane.b32.xlu1 %v7929_v41, %s7323_s16 }
 0xc38   : > { %6562 = vrot.lane.b32.xlu1 %v7935_v17, %s7323_s16 }
 0xc3c   : > { %6567 = vrot.lane.b32.xlu1 %v7941_v51, %s7323_s16 }
 0xc3e   : > { %6552 = vrot.lane.b32.xlu0 %v7947_v56, %s7323_s16 }
 0xc40   : > { %6577 = vrot.lane.b32.xlu1 %v7687_v10, %s7324_s23 }
 0xc42   : > { %6572 = vrot.lane.b32.xlu0 %v7676_v0, %s7324_s23 }
 0xca4   : > { %v2625_v11 = vpop.xlane.xlu1 %2624 }
 0xca5   : > { %v2645_v44 = vsub.f32 %v2613_v24, %v2625_v11  ;;  %v2622_v53 = vpop.xlane.xlu0 %2621 }
 0xca6   : > { %v2644_v46 = vsub.f32 %v2612_v58, %v2622_v53 }
 0xca7   : > { %v2654_v36 = vmul.f32 1.442695, %v2645_v44 }
 0xca8   : > { %v2652_v13 = vmul.f32 1.442695, %v2644_v46 }
 0xca9   : > { %6959 = vpow2.f32 %v2654_v36  ;;  %v2631_v49 = vpop.xlane.xlu0 %2630 }
 0xcaa   : > { %6961 = vpow2.f32 %v2652_v13  ;;  %v2647_v14 = vsub.f32 %v2615_v38, %v2631_v49 }
 0xcac   : > { %v2658_v19 = vmul.f32 1.442695, %v2647_v14  ;;  %v2637_v5 = vpop.xlane.xlu1 %2636 }
 0xcad   : > { %v2649_v7 = vsub.f32 %v2617_v16, %v2637_v5  ;;  %v2628_v3 = vpop.xlane.xlu0 %2627 }
 0xcae   : > { %6963 = vpow2.f32 %v2658_v19  ;;  %v2646_v2 = vsub.f32 %v2614_v45, %v2628_v3 }
 0xcaf   : > { %v2662_v60 = vmul.f32 1.442695, %v2649_v7 }
 0xcb0   : > { %v2656_v1 = vmul.f32 1.442695, %v2646_v2  ;;  %v2643_v27 = vpop.xlane.xlu1 %2642 }
 0xcb1   : > { %v2634_v23 = vpop.xlane.xlu0 %2633 }
 0xcb2   : > { %6965 = vpow2.f32 %v2656_v1  ;;  %v2648_v24 = vsub.f32 %v2616_v40, %v2634_v23 }
 0xcb3   : > { %v8387_v11 = vpop.eup %6959  ;;  %6967 = vpow2.f32 %v2662_v60 }
 0xcb4   : > { %v8389_v58 = vpop.eup %6961  ;;  %v2660_v44 = vmul.f32 1.442695, %v2648_v24  ;;  %v6558_v53 = vpop.permute.xlu1 %6557  ;;  %v2671_v38 = vsel %vm963_vm2, %v8387_v11, 0.0 }
 0xcb5   : > { %2672 = vadd.xlane.f32.xlu1 %v2671_v38  ;;  %v2640_v5 = vpop.xlane.xlu0 %2639  ;;  %v2668_v3 = vsel %vm963_vm2, %v8389_v58, 0.0  ;;  %v6560_v60 = vunpack.i.h.bf16 %v6558_v53  ;;  %v6559_v23 = vunpack.i.l.bf16 %v6558_v53 }
 0xcb6   : > { %2669 = vadd.xlane.f32.xlu0 %v2668_v3  ;;  %6969 = vpow2.f32 %v2660_v44 }
 0xcb7   : > { %v6149_v24 = vpack.c.bf16 %v6560_v60, %v6559_v23 }
 0xcb8   : > { %v8395_v2 = vpop.eup %6963  ;;  %v6563_v1 = vpop.permute.xlu1 %6562 }
 0xcb9   : > { %v6553_v7 = vpop.permute.xlu0 %6552  ;;  %v2677_v40 = vsel %vm963_vm2, %v8395_v2, 0.0  ;;  %v6565_v14 = vunpack.i.h.bf16 %v6563_v1  ;;  %v6564_v19 = vunpack.i.l.bf16 %v6563_v1 }
 0xcba   : > { %v6555_v45 = vunpack.i.h.bf16 %v6553_v7  ;;  %v6554_v16 = vunpack.i.l.bf16 %v6553_v7  ;;  %2678 = vadd.xlane.f32.xlu1 %v2677_v40 }
 0xcbb   : > { %v6153_v40 = vpack.c.bf16 %v6565_v14, %v6564_v19  ;;  %v2650_v19 = vsub.f32 %v8370_v50, %v2640_v5 }
 0xcbc   : > { %v8399_v46 = vpop.eup %6965  ;;  %v6145_v36 = vpack.c.bf16 %v6555_v45, %v6554_v16  ;;  %v6568_v44 = vpop.permute.xlu1 %6567 }
 0xcbd   : > { %v2674_v13 = vsel %vm963_vm2, %v8399_v46, 0.0  ;;  %v8403_v49 = vpop.eup %6967  ;;  %v6570_v3 = vunpack.i.h.bf16 %v6568_v44  ;;  %v6569_v7 = vunpack.i.l.bf16 %v6568_v44  ;;  %v6573_v45 = vpop.permute.xlu0 %6572 }
 0xcbe   : > { %2675 = vadd.xlane.f32.xlu0 %v2674_v13  ;;  %6146 = vmatprep.subr.bf16.mxu1 %v6145_v36  ;;  %v2683_v53 = vsel %vm963_vm2, %v8403_v49, 0.0  ;;  %v6575_v16 = vunpack.i.h.bf16 %v6573_v45  ;;  %v6574_v60 = vunpack.i.l.bf16 %v6573_v45  ;;  %v2651_v13 = vsub.f32 %v8366_v22, %v2643_v27 }
 0xcbf   : > { %6148 = vmatpush3.bf16.msra.mxu1 %v6145_v36  ;;  %v6157_v23 = vpack.c.bf16 %v6570_v3, %v6569_v7 }
 0xcc0   : > { %6150 = vmatprep.subr.bf16.mxu1 %v6149_v24  ;;  %v8407_v38 = vpop.eup %6969  ;;  %v6161_v36 = vpack.c.bf16 %v6575_v16, %v6574_v60  ;;  %v2666_v14 = vmul.f32 1.442695, %v2651_v13  ;;  %v6578_v5 = vpop.permute.xlu1 %6577 }
 0xcc1   : > { %v2680_v1 = vsel %vm963_vm2, %v8407_v38, 0.0  ;;  %v6580_v16 = vunpack.i.h.bf16 %v6578_v5  ;;  %v6579_v60 = vunpack.i.l.bf16 %v6578_v5 }
 0xcc2   : > { %2684 = vadd.xlane.f32.xlu0 %v2683_v53  ;;  %6971 = vpow2.f32 %v2666_v14 }
 0xcc3   : > { %6152 = vmatpush3.bf16.msra.mxu1 %v6149_v24  ;;  %v2664_v24 = vmul.f32 1.442695, %v2650_v19  ;;  %v6167_v19 = vpack.c.bf16 %v6580_v16, %v6579_v60 }
 0xcc4   : > { %6154 = vmatprep.subr.bf16.mxu1 %v6153_v40 }
 0xcc5   : > { %6973 = vpow2.f32 %v2664_v24 }
 0xcc6   : > { %2681 = vadd.xlane.f32.xlu0 %v2680_v1 }
 0xcc7   : > { %6156 = vmatpush3.bf16.msra.mxu1 %v6153_v40 }
 0xcc8   : > { %6158 = vmatprep.subr.bf16.mxu1 %v6157_v23 }
 0xccb   : > { %6587 = vrot.lane.b32.xlu1 %v7699_v25, %s7324_s23  ;;  %6160 = vmatpush3.bf16.msra.mxu1 %v6157_v23 }
 0xccc   : > { %6163 = vmatprep.subr.msk.bf16.mxu1 %vm7672_vm1, %v6161_v36  ;;  %v8425_v44 = vpop.eup %6971 }
 0xccd   : > { %v2689_v50 = vsel %vm963_vm2, %v8425_v44, 0.0 }
 0xccf   : > { %v8431_v22 = vpop.eup %6973 }
 0xcd0   : > { %v2686_v27 = vsel %vm963_vm2, %v8431_v22, 0.0 }
 0xcdc   : > { %6582 = vrot.lane.b32.xlu0 %v7693_v18, %s7324_s23 }
 0xce0   : > { %2861 = vrot.lane.b32.xlu0 %v7685_v9, %s7324_s23 }
 0xce4   : > { %2865 = vrot.lane.b32.xlu0 %v7707_v28, %s7324_s23 }
 0xce8   : > { %2869 = vrot.lane.b32.xlu0 %v7717_v31, %s7324_s23 }
 0xcec   : > { %2873 = vrot.lane.b32.xlu0 %v7725_v33, %s7324_s23 }
 0xcef   : > { %2690 = vadd.xlane.f32.xlu1 %v2689_v50 }
 0xcf3   : > { %2687 = vadd.xlane.f32.xlu1 %v2686_v27 }
 0xd04   : > { %2863 = vrot.lane.b32.xlu1 %v7709_v29, %s7324_s23 }
 0xd08   : > { %2867 = vrot.lane.b32.xlu1 %v7711_v30, %s7324_s23 }
 0xd0c   : > { %2871 = vrot.lane.b32.xlu1 %v7719_v32, %s7324_s23 }
 0xd10   : > { %2875 = vrot.lane.b32.xlu1 %v7727_v34, %s7324_s23 }
 0xd42   : > { %v2673_v53 = vpop.xlane.xlu1 %2672 }
 0xd43   : > { %6975 = vrcp.f32 %v2673_v53  ;;  %v2670_v3 = vpop.xlane.xlu0 %2669 }
 0xd44   : > { %6977 = vrcp.f32 %v2670_v3 }
 0xd47   : > { %v2679_v7 = vpop.xlane.xlu1 %2678 }
 0xd48   : > { %6979 = vrcp.f32 %v2679_v7 }
 0xd4b   : > { %v2676_v40 = vpop.xlane.xlu0 %2675 }
 0xd4c   : > { %6981 = vrcp.f32 %v2676_v40 }
 0xd4d   : > { %v6976_v45 = vpop.eup %6975 }
 0xd4e   : > { %v6978_v1 = vpop.eup %6977  ;;  %v2695_v14 = vmul.f32 %v6976_v45, %v8387_v11 }
 0xd4f   : > { %v2685_v23 = vpop.xlane.xlu0 %2684  ;;  %v2693_v13 = vmul.f32 %v6978_v1, %v8389_v58 }
 0xd50   : > { %6983 = vrcp.f32 %v2685_v23 }
 0xd51   : > { %5641 = vmatprep.mubr.msk.f32.mxu1 %vm963_vm2, %v2693_v13 }
 0xd52   : > { %5642 = vmatmul.mubr.msk.f32.vlgmr.msra.gmra.mrb[48].mxu1 %vm963_vm2, %v2695_v14  ;;  %v6980_v50 = vpop.eup %6979 }
 0xd53   : > { %6166 = vmatpush3.bf16.xpose.msk.msra.mxu1 %vm7672_vm1, %v6161_v36  ;;  %v2682_v24 = vpop.xlane.xlu0 %2681  ;;  %v2699_v3 = vmul.f32 %v6980_v50, %v8395_v2  ;;  %v6588_v36 = vpop.permute.xlu1 %6587 }
 0xd54   : > { %6985 = vrcp.f32 %v2682_v24  ;;  %6169 = vmatprep.subr.msk.bf16.mxu1 %vm7672_vm1, %v6167_v19  ;;  %v6590_v1 = vunpack.i.h.bf16 %v6588_v36 }
 0xd56   : > { %v6982_v27 = vpop.eup %6981 }
 0xd57   : > { %v6583_v5 = vpop.permute.xlu0 %6582  ;;  %v2697_v58 = vmul.f32 %v6982_v27, %v8399_v46  ;;  %v6589_v46 = vunpack.i.l.bf16 %v6588_v36 }
 0xd58   : > { %v6585_v11 = vunpack.i.h.bf16 %v6583_v5  ;;  %v6584_v53 = vunpack.i.l.bf16 %v6583_v5 }
 0xd59   : > { %5644 = vmatprep.mubr.msk.f32.mxu1 %vm963_vm2, %v2697_v58  ;;  %v6179_v60 = vpack.c.bf16 %v6590_v1, %v6589_v46 }
 0xd5a   : > { %v6173_v7 = vpack.c.bf16 %v6585_v11, %v6584_v53  ;;  %5645 = vmatmul.mubr.msk.f32.gmra.mrb[50].mxu1 %vm963_vm2, %v2699_v3  ;;  %v6984_v40 = vpop.eup %6983 }
 0xd5b   : > { %6172 = vmatpush3.bf16.xpose.msk.msra.mxu1 %vm7672_vm1, %v6167_v19  ;;  %v2703_v2 = vmul.f32 %v6984_v40, %v8403_v49 }
 0xd5c   : > { %6175 = vmatprep.subr.msk.bf16.mxu1 %vm7672_vm1, %v6173_v7 }
 0xd5e   : > { %v6986_v45 = vpop.eup %6985 }
 0xd5f   : > { %v2701_v16 = vmul.f32 %v6986_v45, %v8407_v38  ;;  %v2862_v38 = vpop.permute.xlu0 %2861 }
 0xd61   : > { %5647 = vmatprep.mubr.msk.f32.mxu1 %vm963_vm2, %v2701_v16 }
 0xd62   : > { %5648 = vmatmul.mubr.msk.f32.gmra.mrb[52].mxu1 %vm963_vm2, %v2703_v2 }
 0xd63   : > { %6178 = vmatpush3.bf16.xpose.msk.msra.mxu1 %vm7672_vm1, %v6173_v7  ;;  %v2866_v27 = vpop.permute.xlu0 %2865 }
 0xd64   : > { %6181 = vmatprep.subr.msk.bf16.mxu1 %vm7672_vm1, %v6179_v60 }
 0xd67   : > { %v2870_v58 = vpop.permute.xlu0 %2869 }
 0xd6b   : > { %6184 = vmatpush3.bf16.xpose.msk.msra.mxu1 %vm7672_vm1, %v6179_v60 }
 0xd7c   : > { %v2691_v23 = vpop.xlane.xlu1 %2690 }
 0xd7d   : > { %6987 = vrcp.f32 %v2691_v23 }
 0xd80   : > { %v2688_v13 = vpop.xlane.xlu1 %2687 }
 0xd81   : > { %6989 = vrcp.f32 %v2688_v13 }
 0xd84   : > { %v2864_v19 = vpop.permute.xlu1 %2863 }
 0xd87   : > { %v6988_v49 = vpop.eup %6987 }
 0xd88   : > { %v2707_v50 = vmul.f32 %v6988_v49, %v8425_v44  ;;  %v2868_v5 = vpop.permute.xlu1 %2867 }
 0xd8b   : > { %v6990_v14 = vpop.eup %6989 }
 0xd8c   : > { %v2705_v24 = vmul.f32 %v6990_v14, %v8431_v22  ;;  %v2872_v11 = vpop.permute.xlu1 %2871  ;;  %v2874_v22 = vpop.permute.xlu0 %2873 }
 0xd8e   : > { %5650 = vmatprep.mubr.msk.f32.mxu1 %vm963_vm2, %v2705_v24 }
 0xd8f   : > { %5651 = vmatmul.mubr.msk.f32.gmra.mrb[54].mxu1 %vm963_vm2, %v2707_v50 }
 0xd90   : > { %5669 = vmatprep.mubr.msk.f32.mxu1 %vm801_vm0, %v2862_v38  ;;  %v2876_v44 = vpop.permute.xlu1 %2875 }
 0xd93   : > { %5670 = vmatmul.mubr.msk.f32.vlgmr.msra.gmra.mrb[56].mxu1 %vm801_vm0, %v2864_v19 }
 0xd94   : > { %5672 = vmatprep.mubr.msk.f32.mxu1 %vm801_vm0, %v2866_v27 }
 0xd97   : > { %5673 = vmatmul.mubr.msk.f32.gmra.mrb[58].mxu1 %vm801_vm0, %v2868_v5 }
 0xd98   : > { %5675 = vmatprep.mubr.msk.f32.mxu1 %vm801_vm0, %v2870_v58 }
 0xd9b   : > { %5676 = vmatmul.mubr.msk.f32.gmra.mrb[60].mxu1 %vm801_vm0, %v2872_v11 }
 0xd9c   : > { %5678 = vmatprep.mubr.msk.f32.mxu1 %vm801_vm0, %v2874_v22 }
 0xd9f   : > { %5679 = vmatmul.mubr.msk.f32.gmra.mrb[62].mxu1 %vm801_vm0, %v2876_v44 }
 0xe25   : > { %v8481_v53 = vpop.f32.mrb[48].mxu1 }
 0xe26   : > { %v8483_v3 = vpop.f32.mrb[49].mxu1 }
 0xe2d   : > { %v8487_v36 = vpop.f32.mrb[50].mxu1 }
 0xe2e   : > { %v8489_v40 = vpop.f32.mrb[51].mxu1 }
 0xe35   : > { %v8493_v1 = vpop.f32.mrb[52].mxu1 }
 0xe36   : > { %9208 = vst [vmem:[#allocation32_spill] sm:$0xff] %v8493_v1  ;;  %v8495_v46 = vpop.f32.mrb[53].mxu1 }
 0xe37   : > { %9209 = vst [vmem:[#allocation33_spill] sm:$0xff] %v8495_v46 }
 0xe62   : > { %v8499_v2 = vpop.f32.mrb[54].mxu1 }
 0xe63   : > { %9210 = vst [vmem:[#allocation34_spill] sm:$0xff] %v8499_v2  ;;  %v8501_v60 = vpop.f32.mrb[55].mxu1 }
 0xe64   : > { %9211 = vst [vmem:[#allocation35_spill] sm:$0xff] %v8501_v60 }
 0xe66   : > { %v5671_v13 = vpop.f32.mrb[56].mxu1 }
 0xe67   : > { %v3031_v38 = vmul.f32 0.088388346, %v5671_v13  ;;  %v2991_v49 = vpop.f32.mrb[57].mxu1 }
 0xe68   : > { %v3030_v14 = vmul.f32 0.088388346, %v2991_v49 }
 0xe69   : > { %v3041_v19 = vsel %vm963_vm2, %v3031_v38, -inf }
 0xe6a   : > { %3042 = vmax.xlane.f32.xlu1 %v3041_v19  ;;  %v5674_v24 = vpop.f32.mrb[58].mxu1  ;;  %v3038_v50 = vsel %vm963_vm2, %v3030_v14, -inf }
 0xe6b   : > { %v3033_v27 = vmul.f32 0.088388346, %v5674_v24  ;;  %3039 = vmax.xlane.f32.xlu0 %v3038_v50  ;;  %v3001_v5 = vpop.f32.mrb[59].mxu1 }
 0xe6c   : > { %v3032_v11 = vmul.f32 0.088388346, %v3001_v5 }
 0xe6d   : > { %v3047_v58 = vsel %vm963_vm2, %v3033_v27, -inf }
 0xe6e   : > { %v5677_v22 = vpop.f32.mrb[60].mxu1  ;;  %v3044_v19 = vsel %vm963_vm2, %v3032_v11, -inf }
 0xe6f   : > { %v3035_v44 = vmul.f32 0.088388346, %v5677_v22  ;;  %3048 = vmax.xlane.f32.xlu0 %v3047_v58  ;;  %v3011_v23 = vpop.f32.mrb[61].mxu1 }
 0xe70   : > { %v3034_v16 = vmul.f32 0.088388346, %v3011_v23 }
 0xe71   : > { %v3053_v13 = vsel %vm963_vm2, %v3035_v44, -inf }
 0xe72   : > { %3054 = vmax.xlane.f32.xlu1 %v3053_v13  ;;  %v5680_v49 = vpop.f32.mrb[62].mxu1  ;;  %v3050_v5 = vsel %vm963_vm2, %v3034_v16, -inf }
 0xe73   : > { %v8510_v45 = vmul.f32 0.088388346, %v5680_v49  ;;  %3045 = vmax.xlane.f32.xlu0 %v3044_v19  ;;  %v3021_v24 = vpop.f32.mrb[63].mxu1 }
 0xe74   : > { %v8514_v7 = vmul.f32 0.088388346, %v3021_v24 }
 0xe75   : > { %v3059_v50 = vsel %vm963_vm2, %v8510_v45, -inf }
 0xe76   : > { %3060 = vmax.xlane.f32.xlu1 %v3059_v50  ;;  %v3056_v23 = vsel %vm963_vm2, %v8514_v7, -inf }
 0xe77   : > { %3051 = vmax.xlane.f32.xlu0 %v3050_v5 }
 0xe7b   : > { %3057 = vmax.xlane.f32.xlu0 %v3056_v23 }
 0xe87   : > { %6597 = vrot.lane.b32.xlu1 %v7929_v41, %s7324_s23 }
 0xe8b   : > { %6602 = vrot.lane.b32.xlu1 %v7935_v17, %s7324_s23 }
 0xe8f   : > { %6607 = vrot.lane.b32.xlu1 %v7941_v51, %s7324_s23 }
 0xe91   : > { %6592 = vrot.lane.b32.xlu0 %v7947_v56, %s7324_s23 }
 0xe93   : > { %6617 = vrot.lane.b32.xlu1 %v7687_v10, %s7325_s24 }
 0xe95   : > { %6612 = vrot.lane.b32.xlu0 %v7676_v0, %s7325_s24 }
 0xef7   : > { %v3043_v58 = vpop.xlane.xlu1 %3042 }
 0xef8   : > { %v3063_v22 = vsub.f32 %v3031_v38, %v3043_v58  ;;  %v3040_v13 = vpop.xlane.xlu0 %3039 }
 0xef9   : > { %v3062_v49 = vsub.f32 %v3030_v14, %v3040_v13 }
 0xefa   : > { %v3072_v19 = vmul.f32 1.442695, %v3063_v22 }
 0xefb   : > { %v3070_v24 = vmul.f32 1.442695, %v3062_v49 }
 0xefc   : > { %6991 = vpow2.f32 %v3072_v19  ;;  %v3049_v50 = vpop.xlane.xlu0 %3048 }
 0xefd   : > { %6993 = vpow2.f32 %v3070_v24  ;;  %v3065_v5 = vsub.f32 %v3033_v27, %v3049_v50 }
 0xeff   : > { %v3076_v23 = vmul.f32 1.442695, %v3065_v5  ;;  %v3055_v60 = vpop.xlane.xlu1 %3054 }
 0xf00   : > { %v3067_v2 = vsub.f32 %v3035_v44, %v3055_v60  ;;  %v3046_v59 = vpop.xlane.xlu0 %3045 }
 0xf01   : > { %6995 = vpow2.f32 %v3076_v23  ;;  %v3064_v43 = vsub.f32 %v3032_v11, %v3046_v59 }
 0xf02   : > { %v3080_v6 = vmul.f32 1.442695, %v3067_v2 }
 0xf03   : > { %v3074_v4 = vmul.f32 1.442695, %v3064_v43  ;;  %v3061_v46 = vpop.xlane.xlu1 %3060 }
 0xf04   : > { %v3052_v1 = vpop.xlane.xlu0 %3051 }
 0xf05   : > { %6997 = vpow2.f32 %v3074_v4  ;;  %v3066_v38 = vsub.f32 %v3034_v16, %v3052_v1 }
 0xf06   : > { %v8531_v58 = vpop.eup %6991  ;;  %6999 = vpow2.f32 %v3080_v6 }
 0xf07   : > { %v8533_v14 = vpop.eup %6993  ;;  %v3078_v22 = vmul.f32 1.442695, %v3066_v38  ;;  %v6598_v13 = vpop.permute.xlu1 %6597  ;;  %v3089_v27 = vsel %vm963_vm2, %v8531_v58, 0.0 }
 0xf08   : > { %3090 = vadd.xlane.f32.xlu1 %v3089_v27  ;;  %v3058_v60 = vpop.xlane.xlu0 %3057  ;;  %v3086_v59 = vsel %vm963_vm2, %v8533_v14, 0.0  ;;  %v6600_v6 = vunpack.i.h.bf16 %v6598_v13  ;;  %v6599_v2 = vunpack.i.l.bf16 %v6598_v13 }
 0xf09   : > { %3087 = vadd.xlane.f32.xlu0 %v3086_v59  ;;  %7001 = vpow2.f32 %v3078_v22 }
 0xf0a   : > { %v6189_v38 = vpack.c.bf16 %v6600_v6, %v6599_v2 }
 0xf0b   : > { %v8539_v43 = vpop.eup %6995  ;;  %v6603_v4 = vpop.permute.xlu1 %6602 }
 0xf0c   : > { %v6593_v1 = vpop.permute.xlu0 %6592  ;;  %v3095_v16 = vsel %vm963_vm2, %v8539_v43, 0.0  ;;  %v6605_v5 = vunpack.i.h.bf16 %v6603_v4  ;;  %v6604_v23 = vunpack.i.l.bf16 %v6603_v4 }
 0xf0d   : > { %v6595_v11 = vunpack.i.h.bf16 %v6593_v1  ;;  %v6594_v44 = vunpack.i.l.bf16 %v6593_v1  ;;  %3096 = vadd.xlane.f32.xlu1 %v3095_v16 }
 0xf0e   : > { %v6193_v16 = vpack.c.bf16 %v6605_v5, %v6604_v23  ;;  %v3068_v23 = vsub.f32 %v8514_v7, %v3058_v60 }
 0xf0f   : > { %v8543_v49 = vpop.eup %6997  ;;  %v6185_v19 = vpack.c.bf16 %v6595_v11, %v6594_v44  ;;  %v6608_v22 = vpop.permute.xlu1 %6607 }
 0xf10   : > { %v3092_v24 = vsel %vm963_vm2, %v8543_v49, 0.0  ;;  %v8547_v50 = vpop.eup %6999  ;;  %v6610_v59 = vunpack.i.h.bf16 %v6608_v22  ;;  %v6609_v1 = vunpack.i.l.bf16 %v6608_v22  ;;  %v6613_v11 = vpop.permute.xlu0 %6612 }
 0xf11   : > { %3093 = vadd.xlane.f32.xlu0 %v3092_v24  ;;  %6186 = vmatprep.subr.bf16.mxu0 %v6185_v19  ;;  %v3101_v13 = vsel %vm963_vm2, %v8547_v50, 0.0  ;;  %v6615_v44 = vunpack.i.h.bf16 %v6613_v11  ;;  %v6614_v6 = vunpack.i.l.bf16 %v6613_v11  ;;  %v3069_v24 = vsub.f32 %v8510_v45, %v3061_v46 }
 0xf12   : > { %6188 = vmatpush3.bf16.msra.mxu0 %v6185_v19  ;;  %v6197_v2 = vpack.c.bf16 %v6610_v59, %v6609_v1 }
 0xf13   : > { %6190 = vmatprep.subr.bf16.mxu0 %v6189_v38  ;;  %v8551_v27 = vpop.eup %7001  ;;  %v6201_v19 = vpack.c.bf16 %v6615_v44, %v6614_v6  ;;  %v3084_v5 = vmul.f32 1.442695, %v3069_v24  ;;  %v6618_v60 = vpop.permute.xlu1 %6617 }
 0xf14   : > { %v3098_v4 = vsel %vm963_vm2, %v8551_v27, 0.0  ;;  %v6620_v44 = vunpack.i.h.bf16 %v6618_v60  ;;  %v6619_v6 = vunpack.i.l.bf16 %v6618_v60 }
 0xf15   : > { %3102 = vadd.xlane.f32.xlu0 %v3101_v13  ;;  %7003 = vpow2.f32 %v3084_v5 }
 0xf16   : > { %6192 = vmatpush3.bf16.msra.mxu0 %v6189_v38  ;;  %v3082_v38 = vmul.f32 1.442695, %v3068_v23  ;;  %v6207_v23 = vpack.c.bf16 %v6620_v44, %v6619_v6 }
 0xf17   : > { %6194 = vmatprep.subr.bf16.mxu0 %v6193_v16 }
 0xf18   : > { %7005 = vpow2.f32 %v3082_v38 }
 0xf19   : > { %3099 = vadd.xlane.f32.xlu0 %v3098_v4 }
 0xf1a   : > { %6196 = vmatpush3.bf16.msra.mxu0 %v6193_v16 }
 0xf1b   : > { %6198 = vmatprep.subr.bf16.mxu0 %v6197_v2 }
 0xf1e   : > { %6627 = vrot.lane.b32.xlu1 %v7699_v25, %s7325_s24  ;;  %6200 = vmatpush3.bf16.msra.mxu0 %v6197_v2 }
 0xf1f   : > { %6203 = vmatprep.subr.msk.bf16.mxu0 %vm7672_vm1, %v6201_v19  ;;  %v8569_v22 = vpop.eup %7003 }
 0xf20   : > { %v3107_v7 = vsel %vm963_vm2, %v8569_v22, 0.0 }
 0xf22   : > { %v8575_v45 = vpop.eup %7005 }
 0xf23   : > { %v3104_v46 = vsel %vm963_vm2, %v8575_v45, 0.0 }
 0xf2f   : > { %6622 = vrot.lane.b32.xlu0 %v7693_v18, %s7325_s24 }
 0xf33   : > { %3279 = vrot.lane.b32.xlu0 %v7685_v9, %s7325_s24 }
 0xf37   : > { %3283 = vrot.lane.b32.xlu0 %v7707_v28, %s7325_s24 }
 0xf3b   : > { %3287 = vrot.lane.b32.xlu0 %v7717_v31, %s7325_s24 }
 0xf3f   : > { %3291 = vrot.lane.b32.xlu0 %v7725_v33, %s7325_s24 }
 0xf42   : > { %3108 = vadd.xlane.f32.xlu1 %v3107_v7 }
 0xf46   : > { %3105 = vadd.xlane.f32.xlu1 %v3104_v46 }
 0xf57   : > { %3281 = vrot.lane.b32.xlu1 %v7709_v29, %s7325_s24 }
 0xf5b   : > { %3285 = vrot.lane.b32.xlu1 %v7711_v30, %s7325_s24 }
 0xf5f   : > { %3289 = vrot.lane.b32.xlu1 %v7719_v32, %s7325_s24 }
 0xf63   : > { %3293 = vrot.lane.b32.xlu1 %v7727_v34, %s7325_s24 }
 0xf95   : > { %v3091_v13 = vpop.xlane.xlu1 %3090 }
 0xf96   : > { %7007 = vrcp.f32 %v3091_v13  ;;  %v3088_v59 = vpop.xlane.xlu0 %3087 }
 0xf97   : > { %7009 = vrcp.f32 %v3088_v59 }
 0xf9a   : > { %v3097_v1 = vpop.xlane.xlu1 %3096 }
 0xf9b   : > { %7011 = vrcp.f32 %v3097_v1 }
 0xf9e   : > { %v3094_v16 = vpop.xlane.xlu0 %3093 }
 0xf9f   : > { %7013 = vrcp.f32 %v3094_v16 }
 0xfa0   : > { %v7008_v11 = vpop.eup %7007 }
 0xfa1   : > { %v7010_v4 = vpop.eup %7009  ;;  %v3113_v5 = vmul.f32 %v7008_v11, %v8531_v58 }
 0xfa2   : > { %v3103_v2 = vpop.xlane.xlu0 %3102  ;;  %v3111_v24 = vmul.f32 %v7010_v4, %v8533_v14 }
 0xfa3   : > { %7015 = vrcp.f32 %v3103_v2 }
 0xfa4   : > { %5697 = vmatprep.mubr.msk.f32.mxu0 %vm963_vm2, %v3111_v24 }
 0xfa5   : > { %5698 = vmatmul.mubr.msk.f32.vlgmr.msra.gmra.mrb[48].mxu0 %vm963_vm2, %v3113_v5  ;;  %v7012_v7 = vpop.eup %7011 }
 0xfa6   : > { %6206 = vmatpush3.bf16.xpose.msk.msra.mxu0 %vm7672_vm1, %v6201_v19  ;;  %v3100_v38 = vpop.xlane.xlu0 %3099  ;;  %v3117_v59 = vmul.f32 %v7012_v7, %v8539_v43  ;;  %v6628_v19 = vpop.permute.xlu1 %6627 }
 0xfa7   : > { %7017 = vrcp.f32 %v3100_v38  ;;  %6209 = vmatprep.subr.msk.bf16.mxu0 %vm7672_vm1, %v6207_v23  ;;  %v6630_v4 = vunpack.i.h.bf16 %v6628_v19 }
 0xfa9   : > { %v7014_v46 = vpop.eup %7013 }
 0xfaa   : > { %v6623_v60 = vpop.permute.xlu0 %6622  ;;  %v3115_v14 = vmul.f32 %v7014_v46, %v8543_v49  ;;  %v6629_v49 = vunpack.i.l.bf16 %v6628_v19 }
 0xfab   : > { %v6625_v58 = vunpack.i.h.bf16 %v6623_v60  ;;  %v6624_v13 = vunpack.i.l.bf16 %v6623_v60 }
 0xfac   : > { %5700 = vmatprep.mubr.msk.f32.mxu0 %vm963_vm2, %v3115_v14  ;;  %v6219_v6 = vpack.c.bf16 %v6630_v4, %v6629_v49 }
 0xfad   : > { %v6213_v1 = vpack.c.bf16 %v6625_v58, %v6624_v13  ;;  %5701 = vmatmul.mubr.msk.f32.gmra.mrb[50].mxu0 %vm963_vm2, %v3117_v59  ;;  %v7016_v16 = vpop.eup %7015 }
 0xfae   : > { %6212 = vmatpush3.bf16.xpose.msk.msra.mxu0 %vm7672_vm1, %v6207_v23  ;;  %v3121_v43 = vmul.f32 %v7016_v16, %v8547_v50 }
 0xfaf   : > { %6215 = vmatprep.subr.msk.bf16.mxu0 %vm7672_vm1, %v6213_v1 }
 0xfb1   : > { %v7018_v11 = vpop.eup %7017 }
 0xfb2   : > { %v3119_v44 = vmul.f32 %v7018_v11, %v8551_v27  ;;  %v3280_v27 = vpop.permute.xlu0 %3279 }
 0xfb4   : > { %5703 = vmatprep.mubr.msk.f32.mxu0 %vm963_vm2, %v3119_v44 }
 0xfb5   : > { %5704 = vmatmul.mubr.msk.f32.gmra.mrb[52].mxu0 %vm963_vm2, %v3121_v43 }
 0xfb6   : > { %6218 = vmatpush3.bf16.xpose.msk.msra.mxu0 %vm7672_vm1, %v6213_v1  ;;  %v3284_v46 = vpop.permute.xlu0 %3283 }
 0xfb7   : > { %6221 = vmatprep.subr.msk.bf16.mxu0 %vm7672_vm1, %v6219_v6 }
 0xfba   : > { %v3288_v14 = vpop.permute.xlu0 %3287 }
 0xfbe   : > { %6224 = vmatpush3.bf16.xpose.msk.msra.mxu0 %vm7672_vm1, %v6219_v6 }
 0xfcf   : > { %v3109_v2 = vpop.xlane.xlu1 %3108 }
 0xfd0   : > { %7019 = vrcp.f32 %v3109_v2 }
 0xfd3   : > { %v3106_v24 = vpop.xlane.xlu1 %3105 }
 0xfd4   : > { %7021 = vrcp.f32 %v3106_v24 }
 0xfd7   : > { %v3282_v23 = vpop.permute.xlu1 %3281 }
 0xfda   : > { %v7020_v50 = vpop.eup %7019 }
 0xfdb   : > { %v3125_v7 = vmul.f32 %v7020_v50, %v8569_v22  ;;  %v3286_v60 = vpop.permute.xlu1 %3285 }
 0xfde   : > { %v7022_v5 = vpop.eup %7021 }
 0xfdf   : > { %v3123_v38 = vmul.f32 %v7022_v5, %v8575_v45  ;;  %v3290_v58 = vpop.permute.xlu1 %3289  ;;  %v3292_v45 = vpop.permute.xlu0 %3291 }
 0xfe1   : > { %5706 = vmatprep.mubr.msk.f32.mxu0 %vm963_vm2, %v3123_v38 }
 0xfe2   : > { %5707 = vmatmul.mubr.msk.f32.gmra.mrb[54].mxu0 %vm963_vm2, %v3125_v7 }
 0xfe3   : > { %5725 = vmatprep.mubr.msk.f32.mxu0 %vm801_vm0, %v3280_v27  ;;  %v3294_v22 = vpop.permute.xlu1 %3293 }
 0xfe6   : > { %5726 = vmatmul.mubr.msk.f32.vlgmr.msra.gmra.mrb[56].mxu0 %vm801_vm0, %v3282_v23 }
 0xfe7   : > { %5728 = vmatprep.mubr.msk.f32.mxu0 %vm801_vm0, %v3284_v46 }
 0xfea   : > { %5729 = vmatmul.mubr.msk.f32.gmra.mrb[58].mxu0 %vm801_vm0, %v3286_v60 }
 0xfeb   : > { %5731 = vmatprep.mubr.msk.f32.mxu0 %vm801_vm0, %v3288_v14 }
 0xfee   : > { %5732 = vmatmul.mubr.msk.f32.gmra.mrb[60].mxu0 %vm801_vm0, %v3290_v58 }
 0xfef   : > { %5734 = vmatprep.mubr.msk.f32.mxu0 %vm801_vm0, %v3292_v45 }
 0xff2   : > { %5735 = vmatmul.mubr.msk.f32.gmra.mrb[62].mxu0 %vm801_vm0, %v3294_v22 }
0x1078   : > { %v8625_v13 = vpop.f32.mrb[48].mxu0 }
0x1079   : > { %v8627_v59 = vpop.f32.mrb[49].mxu0 }
0x1080   : > { %v8631_v19 = vpop.f32.mrb[50].mxu0 }
0x1081   : > { %9212 = vst [vmem:[#allocation36_spill] sm:$0xff] %v8631_v19  ;;  %v8633_v16 = vpop.f32.mrb[51].mxu0 }
0x1082   : > { %9213 = vst [vmem:[#allocation37_spill] sm:$0xff] %v8633_v16 }
0x1088   : > { %v8637_v4 = vpop.f32.mrb[52].mxu0 }
0x1089   : > { %9214 = vst [vmem:[#allocation38_spill] sm:$0xff] %v8637_v4  ;;  %v8639_v49 = vpop.f32.mrb[53].mxu0 }
0x108a   : > { %9215 = vst [vmem:[#allocation39_spill] sm:$0xff] %v8639_v49 }
0x10b5   : > { %v8643_v43 = vpop.f32.mrb[54].mxu0 }
0x10b6   : > { %9216 = vst [vmem:[#allocation40_spill] sm:$0xff] %v8643_v43  ;;  %v8645_v6 = vpop.f32.mrb[55].mxu0 }
0x10b7   : > { %9217 = vst [vmem:[#allocation41_spill] sm:$0xff] %v8645_v6 }
0x10b9   : > { %v5727_v24 = vpop.f32.mrb[56].mxu0 }
0x10ba   : > { %v3449_v27 = vmul.f32 0.088388346, %v5727_v24  ;;  %v3409_v50 = vpop.f32.mrb[57].mxu0 }
0x10bb   : > { %v3448_v5 = vmul.f32 0.088388346, %v3409_v50 }
0x10bc   : > { %v3459_v23 = vsel %vm963_vm2, %v3449_v27, -inf }
0x10bd   : > { %3460 = vmax.xlane.f32.xlu1 %v3459_v23  ;;  %v5730_v38 = vpop.f32.mrb[58].mxu0  ;;  %v3456_v7 = vsel %vm963_vm2, %v3448_v5, -inf }
0x10be   : > { %v3451_v46 = vmul.f32 0.088388346, %v5730_v38  ;;  %3457 = vmax.xlane.f32.xlu0 %v3456_v7  ;;  %v3419_v60 = vpop.f32.mrb[59].mxu0 }
0x10bf   : > { %v3450_v58 = vmul.f32 0.088388346, %v3419_v60 }
0x10c0   : > { %v3465_v14 = vsel %vm963_vm2, %v3451_v46, -inf }
0x10c1   : > { %v5733_v45 = vpop.f32.mrb[60].mxu0  ;;  %v3462_v23 = vsel %vm963_vm2, %v3450_v58, -inf }
0x10c2   : > { %v3453_v22 = vmul.f32 0.088388346, %v5733_v45  ;;  %3466 = vmax.xlane.f32.xlu0 %v3465_v14  ;;  %v3429_v2 = vpop.f32.mrb[61].mxu0 }
0x10c3   : > { %v3452_v44 = vmul.f32 0.088388346, %v3429_v2 }
0x10c4   : > { %v3471_v24 = vsel %vm963_vm2, %v3453_v22, -inf }
0x10c5   : > { %3472 = vmax.xlane.f32.xlu1 %v3471_v24  ;;  %v5736_v50 = vpop.f32.mrb[62].mxu0  ;;  %v3468_v60 = vsel %vm963_vm2, %v3452_v44, -inf }
0x10c6   : > { %v8654_v11 = vmul.f32 0.088388346, %v5736_v50  ;;  %3463 = vmax.xlane.f32.xlu0 %v3462_v23  ;;  %v3439_v38 = vpop.f32.mrb[63].mxu0 }
0x10c7   : > { %v8658_v1 = vmul.f32 0.088388346, %v3439_v38 }
0x10c8   : > { %v3477_v7 = vsel %vm963_vm2, %v8654_v11, -inf }
0x10c9   : > { %3478 = vmax.xlane.f32.xlu1 %v3477_v7  ;;  %v3474_v2 = vsel %vm963_vm2, %v8658_v1, -inf }
0x10ca   : > { %3469 = vmax.xlane.f32.xlu0 %v3468_v60 }
0x10ce   : > { %3475 = vmax.xlane.f32.xlu0 %v3474_v2 }
0x10da   : > { %6637 = vrot.lane.b32.xlu1 %v7929_v41, %s7325_s24 }
0x10de   : > { %6642 = vrot.lane.b32.xlu1 %v7935_v17, %s7325_s24 }
0x10e2   : > { %6647 = vrot.lane.b32.xlu1 %v7941_v51, %s7325_s24 }
0x10e4   : > { %6632 = vrot.lane.b32.xlu0 %v7947_v56, %s7325_s24 }
0x10e6   : > { %6657 = vrot.lane.b32.xlu1 %v7687_v10, %s7326_s15 }
0x10e8   : > { %6652 = vrot.lane.b32.xlu0 %v7676_v0, %s7326_s15 }
0x114a   : > { %v3461_v14 = vpop.xlane.xlu1 %3460 }
0x114b   : > { %v3481_v45 = vsub.f32 %v3449_v27, %v3461_v14  ;;  %v3458_v24 = vpop.xlane.xlu0 %3457 }
0x114c   : > { %v3480_v50 = vsub.f32 %v3448_v5, %v3458_v24 }
0x114d   : > { %v3490_v23 = vmul.f32 1.442695, %v3481_v45 }
0x114e   : > { %v3488_v38 = vmul.f32 1.442695, %v3480_v50 }
0x114f   : > { %7023 = vpow2.f32 %v3490_v23  ;;  %v3467_v7 = vpop.xlane.xlu0 %3466 }
0x1150   : > { %7025 = vpow2.f32 %v3488_v38  ;;  %v3483_v60 = vsub.f32 %v3451_v46, %v3467_v7 }
0x1152   : > { %v3494_v2 = vmul.f32 1.442695, %v3483_v60  ;;  %v3473_v6 = vpop.xlane.xlu1 %3472 }
0x1153   : > { %v3485_v43 = vsub.f32 %v3453_v22, %v3473_v6  ;;  %v3464_v49 = vpop.xlane.xlu0 %3463 }
0x1154   : > { %7027 = vpow2.f32 %v3494_v2  ;;  %v3482_v4 = vsub.f32 %v3450_v58, %v3464_v49 }
0x1155   : > { %v3498_v10 = vmul.f32 1.442695, %v3485_v43 }
0x1156   : > { %v3492_v16 = vmul.f32 1.442695, %v3482_v4  ;;  %v3479_v19 = vpop.xlane.xlu1 %3478 }
0x1157   : > { %v3470_v0 = vpop.xlane.xlu0 %3469 }
0x1158   : > { %7029 = vpow2.f32 %v3492_v16  ;;  %v3484_v27 = vsub.f32 %v3452_v44, %v3470_v0 }
0x1159   : > { %v8675_v14 = vpop.eup %7023  ;;  %7031 = vpow2.f32 %v3498_v10 }
0x115a   : > { %v8677_v5 = vpop.eup %7025  ;;  %v3496_v45 = vmul.f32 1.442695, %v3484_v27  ;;  %v6638_v24 = vpop.permute.xlu1 %6637  ;;  %v3507_v46 = vsel %vm963_vm2, %v8675_v14, 0.0 }
0x115b   : > { %3508 = vadd.xlane.f32.xlu1 %v3507_v46  ;;  %v3476_v6 = vpop.xlane.xlu0 %3475  ;;  %v3504_v49 = vsel %vm963_vm2, %v8677_v5, 0.0  ;;  %v6640_v58 = vunpack.i.h.bf16 %v6638_v24  ;;  %v6639_v22 = vunpack.i.l.bf16 %v6638_v24 }
0x115c   : > { %3505 = vadd.xlane.f32.xlu0 %v3504_v49  ;;  %7033 = vpow2.f32 %v3496_v45 }
0x115d   : > { %v6229_v10 = vpack.c.bf16 %v6640_v58, %v6639_v22 }
0x115e   : > { %v8683_v4 = vpop.eup %7027  ;;  %v6643_v16 = vpop.permute.xlu1 %6642 }
0x115f   : > { %v6633_v44 = vpop.permute.xlu0 %6632  ;;  %v3513_v43 = vsel %vm963_vm2, %v8683_v4, 0.0  ;;  %v6645_v0 = vunpack.i.h.bf16 %v6643_v16  ;;  %v6644_v27 = vunpack.i.l.bf16 %v6643_v16 }
0x1160   : > { %v6635_v50 = vunpack.i.h.bf16 %v6633_v44  ;;  %v6634_v23 = vunpack.i.l.bf16 %v6633_v44  ;;  %3514 = vadd.xlane.f32.xlu1 %v3513_v43 }
0x1161   : > { %v6233_v49 = vpack.c.bf16 %v6645_v0, %v6644_v27  ;;  %v3486_v0 = vsub.f32 %v8658_v1, %v3476_v6 }
0x1162   : > { %v8687_v38 = vpop.eup %7029  ;;  %v6225_v7 = vpack.c.bf16 %v6635_v50, %v6634_v23  ;;  %v6648_v45 = vpop.permute.xlu1 %6647 }
0x1163   : > { %v3510_v60 = vsel %vm963_vm2, %v8687_v38, 0.0  ;;  %v8691_v2 = vpop.eup %7031  ;;  %v6650_v44 = vunpack.i.h.bf16 %v6648_v45  ;;  %v6649_v43 = vunpack.i.l.bf16 %v6648_v45  ;;  %v6653_v50 = vpop.permute.xlu0 %6652 }
0x1164   : > { %3511 = vadd.xlane.f32.xlu0 %v3510_v60  ;;  %6226 = vmatprep.subr.bf16.mxu1 %v6225_v7  ;;  %v3519_v24 = vsel %vm963_vm2, %v8691_v2, 0.0  ;;  %v6655_v22 = vunpack.i.h.bf16 %v6653_v50  ;;  %v6654_v23 = vunpack.i.l.bf16 %v6653_v50  ;;  %v3487_v60 = vsub.f32 %v8654_v11, %v3479_v19 }
0x1165   : > { %6228 = vmatpush3.bf16.msra.mxu1 %v6225_v7  ;;  %v6237_v58 = vpack.c.bf16 %v6650_v44, %v6649_v43 }
0x1166   : > { %6230 = vmatprep.subr.bf16.mxu1 %v6229_v10  ;;  %v8695_v46 = vpop.eup %7033  ;;  %v6241_v7 = vpack.c.bf16 %v6655_v22, %v6654_v23 }
0x1167   : > { %v3516_v16 = vsel %vm963_vm2, %v8695_v46, 0.0 }
0x1168   : > { %3520 = vadd.xlane.f32.xlu0 %v3519_v24 }
0x1169   : > { %6232 = vmatpush3.bf16.msra.mxu1 %v6229_v10  ;;  %v3502_v10 = vmul.f32 1.442695, %v3487_v60 }
0x116a   : > { %6234 = vmatprep.subr.bf16.mxu1 %v6233_v49 }
0x116b   : > { %7035 = vpow2.f32 %v3502_v10 }
0x116c   : > { %3517 = vadd.xlane.f32.xlu0 %v3516_v16 }
0x116d   : > { %6236 = vmatpush3.bf16.msra.mxu1 %v6233_v49 }
0x116e   : > { %6238 = vmatprep.subr.bf16.mxu1 %v6237_v58 }
0x1171   : > { %6667 = vrot.lane.b32.xlu1 %v7699_v25, %s7326_s15  ;;  %6240 = vmatpush3.bf16.msra.mxu1 %v6237_v58  ;;  %v3500_v25 = vmul.f32 1.442695, %v3486_v0 }
0x1172   : > { %6243 = vmatprep.subr.msk.bf16.mxu1 %vm7672_vm1, %v6241_v7 }
0x1173   : > { %7037 = vpow2.f32 %v3500_v25 }
0x1175   : > { %3699 = vrot.lane.b32.xlu1 %v7709_v29, %s7326_s15 }
0x1182   : > { %6662 = vrot.lane.b32.xlu0 %v7693_v18, %s7326_s15  ;;  %v8717_v18 = vpop.eup %7035 }
0x1183   : > { %v8721_v29 = vpop.eup %7037 }
0x1186   : > { %3697 = vrot.lane.b32.xlu0 %v7685_v9, %s7326_s15  ;;  %v3525_v9 = vsel %vm963_vm2, %v8717_v18, 0.0 }
0x118a   : > { %3701 = vrot.lane.b32.xlu0 %v7707_v28, %s7326_s15  ;;  %v3522_v28 = vsel %vm963_vm2, %v8721_v29, 0.0 }
0x118e   : > { %3705 = vrot.lane.b32.xlu0 %v7717_v31, %s7326_s15  ;;  %v6658_v31 = vpop.permute.xlu1 %6657 }
0x118f   : > { %v6660_v45 = vunpack.i.h.bf16 %v6658_v31  ;;  %v6659_v24 = vunpack.i.l.bf16 %v6658_v31 }
0x1192   : > { %3709 = vrot.lane.b32.xlu0 %v7725_v33, %s7326_s15 }
0x1199   : > { %3526 = vadd.xlane.f32.xlu1 %v3525_v9 }
0x119d   : > { %3523 = vadd.xlane.f32.xlu1 %v3522_v28 }
0x11ae   : > { %3703 = vrot.lane.b32.xlu1 %v7711_v30, %s7326_s15 }
0x11b2   : > { %3707 = vrot.lane.b32.xlu1 %v7719_v32, %s7326_s15 }
0x11b6   : > { %3711 = vrot.lane.b32.xlu1 %v7727_v34, %s7326_s15  ;;  %v6247_v34 = vpack.c.bf16 %v6660_v45, %v6659_v24 }
0x11e8   : > { %v3509_v33 = vpop.xlane.xlu1 %3508 }
0x11e9   : > { %7039 = vrcp.f32 %v3509_v33  ;;  %v3506_v1 = vpop.xlane.xlu0 %3505 }
0x11ea   : > { %7041 = vrcp.f32 %v3506_v1 }
0x11ed   : > { %v3515_v19 = vpop.xlane.xlu1 %3514 }
0x11ee   : > { %7043 = vrcp.f32 %v3515_v19 }
0x11f1   : > { %v3512_v11 = vpop.xlane.xlu0 %3511 }
0x11f2   : > { %7045 = vrcp.f32 %v3512_v11 }
0x11f3   : > { %v7040_v6 = vpop.eup %7039 }
0x11f4   : > { %v7042_v27 = vpop.eup %7041  ;;  %v3531_v32 = vmul.f32 %v7040_v6, %v8675_v14 }
0x11f5   : > { %v3521_v30 = vpop.xlane.xlu0 %3520  ;;  %v3529_v49 = vmul.f32 %v7042_v27, %v8677_v5 }
0x11f6   : > { %7047 = vrcp.f32 %v3521_v30 }
0x11f7   : > { %5753 = vmatprep.mubr.msk.f32.mxu1 %vm963_vm2, %v3529_v49 }
0x11f8   : > { %5754 = vmatmul.mubr.msk.f32.vlgmr.msra.gmra.mrb[64].mxu1 %vm963_vm2, %v3531_v32  ;;  %v7044_v43 = vpop.eup %7043 }
0x11f9   : > { %6246 = vmatpush3.bf16.xpose.msk.msra.mxu1 %vm7672_vm1, %v6241_v7  ;;  %v3518_v44 = vpop.xlane.xlu0 %3517  ;;  %v3535_v22 = vmul.f32 %v7044_v43, %v8683_v4  ;;  %v6668_v7 = vpop.permute.xlu1 %6667 }
0x11fa   : > { %7049 = vrcp.f32 %v3518_v44  ;;  %6249 = vmatprep.subr.msk.bf16.mxu1 %vm7672_vm1, %v6247_v34  ;;  %v6670_v0 = vunpack.i.h.bf16 %v6668_v7 }
0x11fc   : > { %v7046_v50 = vpop.eup %7045 }
0x11fd   : > { %v6663_v16 = vpop.permute.xlu0 %6662  ;;  %v3533_v5 = vmul.f32 %v7046_v50, %v8687_v38  ;;  %v6669_v38 = vunpack.i.l.bf16 %v6668_v7  ;;  %v3700_v28 = vpop.permute.xlu1 %3699 }
0x11fe   : > { %v6665_v14 = vunpack.i.h.bf16 %v6663_v16  ;;  %v6664_v58 = vunpack.i.l.bf16 %v6663_v16 }
0x11ff   : > { %5756 = vmatprep.mubr.msk.f32.mxu1 %vm963_vm2, %v3533_v5  ;;  %v6259_v9 = vpack.c.bf16 %v6670_v0, %v6669_v38 }
0x1200   : > { %v6253_v23 = vpack.c.bf16 %v6665_v14, %v6664_v58  ;;  %5757 = vmatmul.mubr.msk.f32.gmra.mrb[66].mxu1 %vm963_vm2, %v3535_v22  ;;  %v7048_v60 = vpop.eup %7047 }
0x1201   : > { %6252 = vmatpush3.bf16.xpose.msk.msra.mxu1 %vm7672_vm1, %v6247_v34  ;;  %v3539_v4 = vmul.f32 %v7048_v60, %v8691_v2  ;;  %v3698_v2 = vpop.permute.xlu0 %3697 }
0x1202   : > { %6255 = vmatprep.subr.msk.bf16.mxu1 %vm7672_vm1, %v6253_v23 }
0x1204   : > { %v7050_v10 = vpop.eup %7049 }
0x1205   : > { %v3537_v25 = vmul.f32 %v7050_v10, %v8695_v46  ;;  %v3702_v6 = vpop.permute.xlu0 %3701 }
0x1207   : > { %5759 = vmatprep.mubr.msk.f32.mxu1 %vm963_vm2, %v3537_v25 }
0x1208   : > { %5760 = vmatmul.mubr.msk.f32.gmra.mrb[68].mxu1 %vm963_vm2, %v3539_v4 }
0x1209   : > { %6258 = vmatpush3.bf16.xpose.msk.msra.mxu1 %vm7672_vm1, %v6253_v23  ;;  %v3706_v27 = vpop.permute.xlu0 %3705 }
0x120a   : > { %6261 = vmatprep.subr.msk.bf16.mxu1 %vm7672_vm1, %v6259_v9 }
0x1211   : > { %6264 = vmatpush3.bf16.xpose.msk.msra.mxu1 %vm7672_vm1, %v6259_v9 }
0x1226   : > { %v3527_v31 = vpop.xlane.xlu1 %3526 }
0x1227   : > { %7051 = vrcp.f32 %v3527_v31 }
0x122a   : > { %v3524_v46 = vpop.xlane.xlu1 %3523 }
0x122b   : > { %7053 = vrcp.f32 %v3524_v46 }
0x122e   : > { %v3704_v61 = vpop.permute.xlu1 %3703 }
0x1231   : > { %v7052_v33 = vpop.eup %7051 }
0x1232   : > { %v3543_v11 = vmul.f32 %v7052_v33, %v8717_v18  ;;  %v3708_v45 = vpop.permute.xlu1 %3707 }
0x1235   : > { %v7054_v1 = vpop.eup %7053 }
0x1236   : > { %v3541_v19 = vmul.f32 %v7054_v1, %v8721_v29  ;;  %v3710_v29 = vpop.permute.xlu0 %3709  ;;  %v3712_v18 = vpop.permute.xlu1 %3711 }
0x1238   : > { %5762 = vmatprep.mubr.msk.f32.mxu1 %vm963_vm2, %v3541_v19 }
0x1239   : > { %5763 = vmatmul.mubr.msk.f32.gmra.mrb[70].mxu1 %vm963_vm2, %v3543_v11 }
0x123a   : > { %5781 = vmatprep.mubr.msk.f32.mxu1 %vm801_vm0, %v3698_v2 }
0x123d   : > { %5782 = vmatmul.mubr.msk.f32.vlgmr.msra.gmra.mrb[72].mxu1 %vm801_vm0, %v3700_v28 }
0x123e   : > { %5784 = vmatprep.mubr.msk.f32.mxu1 %vm801_vm0, %v3702_v6 }
0x1241   : > { %5785 = vmatmul.mubr.msk.f32.gmra.mrb[74].mxu1 %vm801_vm0, %v3704_v61 }
0x1242   : > { %5787 = vmatprep.mubr.msk.f32.mxu1 %vm801_vm0, %v3706_v27 }
0x1245   : > { %5788 = vmatmul.mubr.msk.f32.gmra.mrb[76].mxu1 %vm801_vm0, %v3708_v45 }
0x1246   : > { %5790 = vmatprep.mubr.msk.f32.mxu1 %vm801_vm0, %v3710_v29 }
0x1249   : > { %5791 = vmatmul.mubr.msk.f32.gmra.mrb[78].mxu1 %vm801_vm0, %v3712_v18 }
0x12cb   : > { %v8769_v24 = vpop.f32.mrb[64].mxu1 }
0x12cc   : > { %v8771_v30 = vpop.f32.mrb[65].mxu1 }
0x12cd   : > { %v6726_v49 = vpack.i.bf16 %v8769_v24, %v8771_v30 }
0x12d3   : > { %v8775_v32 = vpop.f32.mrb[66].mxu1 }
0x12d4   : > { %v8777_v34 = vpop.f32.mrb[67].mxu1 }
0x12d5   : > { %v6756_v44 = vpack.i.bf16 %v8775_v32, %v8777_v34 }
0x12db   : > { %v8781_v43 = vpop.f32.mrb[68].mxu1 }
0x12dc   : > { %v8783_v50 = vpop.f32.mrb[69].mxu1 }
0x12dd   : > { %v6786_v16 = vpack.i.bf16 %v8781_v43, %v8783_v50 }
0x130c   : > { %v8787_v5 = vpop.f32.mrb[70].mxu1 }
0x130d   : > { %v8789_v14 = vpop.f32.mrb[71].mxu1 }
0x130e   : > { %v6821_v58 = vpack.i.bf16 %v8787_v5, %v8789_v14 }
0x1310   : > { %v5783_v22 = vpop.f32.mrb[72].mxu1 }
0x1311   : > { %v3867_v23 = vmul.f32 0.088388346, %v5783_v22  ;;  %v3827_v7 = vpop.f32.mrb[73].mxu1 }
0x1312   : > { %v3866_v60 = vmul.f32 0.088388346, %v3827_v7 }
0x1313   : > { %v3877_v10 = vsel %vm963_vm2, %v3867_v23, -inf }
0x1314   : > { %3878 = vmax.xlane.f32.xlu1 %v3877_v10  ;;  %v5786_v0 = vpop.f32.mrb[74].mxu1  ;;  %v3874_v38 = vsel %vm963_vm2, %v3866_v60, -inf }
0x1315   : > { %v3869_v25 = vmul.f32 0.088388346, %v5786_v0  ;;  %3875 = vmax.xlane.f32.xlu0 %v3874_v38  ;;  %v3837_v4 = vpop.f32.mrb[75].mxu1 }
0x1316   : > { %v3868_v28 = vmul.f32 0.088388346, %v3837_v4 }
0x1317   : > { %v3883_v9 = vsel %vm963_vm2, %v3869_v25, -inf }
0x1318   : > { %v5789_v31 = vpop.f32.mrb[76].mxu1  ;;  %v3880_v11 = vsel %vm963_vm2, %v3868_v28, -inf }
0x1319   : > { %v3871_v46 = vmul.f32 0.088388346, %v5789_v31  ;;  %3884 = vmax.xlane.f32.xlu0 %v3883_v9  ;;  %v3847_v2 = vpop.f32.mrb[77].mxu1 }
0x131a   : > { %v3870_v1 = vmul.f32 0.088388346, %v3847_v2 }
0x131b   : > { %v3889_v33 = vsel %vm963_vm2, %v3871_v46, -inf }
0x131c   : > { %3890 = vmax.xlane.f32.xlu1 %v3889_v33  ;;  %v5792_v19 = vpop.f32.mrb[78].mxu1  ;;  %v3886_v29 = vsel %vm963_vm2, %v3870_v1, -inf }
0x131d   : > { %v3873_v6 = vmul.f32 0.088388346, %v5792_v19  ;;  %3881 = vmax.xlane.f32.xlu0 %v3880_v11  ;;  %v3857_v61 = vpop.f32.mrb[79].mxu1 }
0x131e   : > { %v3872_v45 = vmul.f32 0.088388346, %v3857_v61 }
0x131f   : > { %v3895_v27 = vsel %vm963_vm2, %v3873_v6, -inf }
0x1320   : > { %3896 = vmax.xlane.f32.xlu1 %v3895_v27  ;;  %v3892_v18 = vsel %vm963_vm2, %v3872_v45, -inf }
0x1321   : > { %3887 = vmax.xlane.f32.xlu0 %v3886_v29 }
0x1325   : > { %3893 = vmax.xlane.f32.xlu0 %v3892_v18 }
0x1331   : > { %6677 = vrot.lane.b32.xlu1 %v7929_v41, %s7326_s15 }
0x133b   : > { %6672 = vrot.lane.b32.xlu0 %v7947_v56, %s7326_s15 }
0x13a1   : > { %v3879_v22 = vpop.xlane.xlu1 %3878 }
0x13a2   : > { %v3899_v7 = vsub.f32 %v3867_v23, %v3879_v22  ;;  %v3876_v10 = vpop.xlane.xlu0 %3875 }
0x13a3   : > { %v3898_v0 = vsub.f32 %v3866_v60, %v3876_v10 }
0x13a4   : > { %v3908_v38 = vmul.f32 1.442695, %v3899_v7 }
0x13a5   : > { %v3906_v4 = vmul.f32 1.442695, %v3898_v0 }
0x13a6   : > { %7055 = vpow2.f32 %v3908_v38  ;;  %v3885_v9 = vpop.xlane.xlu0 %3884 }
0x13a7   : > { %7057 = vpow2.f32 %v3906_v4  ;;  %v3901_v31 = vsub.f32 %v3869_v25, %v3885_v9 }
0x13a9   : > { %v3912_v2 = vmul.f32 1.442695, %v3901_v31  ;;  %v3891_v33 = vpop.xlane.xlu1 %3890 }
0x13aa   : > { %v3903_v19 = vsub.f32 %v3871_v46, %v3891_v33  ;;  %v3882_v11 = vpop.xlane.xlu0 %3881 }
0x13ab   : > { %7059 = vpow2.f32 %v3912_v2  ;;  %v3900_v61 = vsub.f32 %v3868_v28, %v3882_v11 }
0x13ac   : > { %v3916_v41 = vmul.f32 1.442695, %v3903_v19 }
0x13ad   : > { %v3910_v27 = vmul.f32 1.442695, %v3900_v61  ;;  %v3897_v29 = vpop.xlane.xlu1 %3896 }
0x13ae   : > { %7061 = vpow2.f32 %v3916_v41  ;;  %v3905_v56 = vsub.f32 %v3873_v6, %v3897_v29  ;;  %v3888_v23 = vpop.xlane.xlu0 %3887 }
0x13af   : > { %7063 = vpow2.f32 %v3910_v27  ;;  %v3902_v60 = vsub.f32 %v3870_v1, %v3888_v23 }
0x13b0   : > { %v8805_v18 = vpop.eup %7055  ;;  %v3920_v22 = vmul.f32 1.442695, %v3905_v56 }
0x13b1   : > { %v8807_v7 = vpop.eup %7057  ;;  %v3914_v25 = vmul.f32 1.442695, %v3902_v60  ;;  %v3925_v46 = vsel %vm963_vm2, %v8805_v18, 0.0  ;;  %v6678_v1 = vpop.permute.xlu1 %6677 }
0x13b2   : > { %7065 = vpow2.f32 %v3920_v22  ;;  %3926 = vadd.xlane.f32.xlu1 %v3925_v46  ;;  %v3894_v28 = vpop.xlane.xlu0 %3893  ;;  %v3922_v10 = vsel %vm963_vm2, %v8807_v7, 0.0  ;;  %v6680_v19 = vunpack.i.h.bf16 %v6678_v1  ;;  %v6679_v11 = vunpack.i.l.bf16 %v6678_v1 }
0x13b3   : > { %7067 = vpow2.f32 %v3914_v25  ;;  %v3904_v6 = vsub.f32 %v3872_v45, %v3894_v28  ;;  %3923 = vadd.xlane.f32.xlu0 %v3922_v10  ;;  %v9218_v28 = vpack.i.bf16 %v8193_v47, %v8195_v20  ;;  %v9219_v10 = vpack.i.bf16 %v8049_v55, %v8051_v26 }
0x13b4   : > { %v6269_v56 = vpack.c.bf16 %v6680_v19, %v6679_v11  ;;  %v9223_v55 = vpack.i.bf16 %v8055_v35, %v8057_v37  ;;  %v9224_v26 = vpack.i.bf16 %v8199_v52, %v8201_v12  ;;  %v9225_v47 = vpack.i.bf16 %v8061_v57, %v8063_v62  ;;  %v9230_v62 = vld [vmem:[#allocation36_spill] sm:$0xff]  ;;  %v9231_v52 = vld [vmem:[#allocation37_spill] sm:$0xff] }
0x13b5   : > { %v8813_v0 = vpop.eup %7059  ;;  %v3918_v38 = vmul.f32 1.442695, %v3904_v6  ;;  %v9220_v6 = vpack.i.bf16 %v8481_v53, %v8483_v3  ;;  %v9226_v35 = vpack.i.bf16 %v8343_v42, %v8345_v48  ;;  %v9227_v37 = vpack.i.bf16 %v8205_v15, %v8207_v54  ;;  %v9236_v54 = vld [vmem:[#allocation38_spill] sm:$0xff]  ;;  %v9237_v42 = vld [vmem:[#allocation39_spill] sm:$0xff]  ;;  %v9242_v3 = vld [vmem:[#allocation28_spill] sm:$0xff] }
0x13b6   : > { %v6673_v4 = vpop.permute.xlu0 %6672  ;;  %v3931_v9 = vsel %vm963_vm2, %v8813_v0, 0.0  ;;  %v9228_v20 = vpack.i.bf16 %v8487_v36, %v8489_v40  ;;  %v9229_v57 = vpack.i.bf16 %v8349_v8, %v8351_v21  ;;  %v9232_v12 = vpack.i.bf16 %v9230_v62, %v9231_v52  ;;  %v9239_v8 = vld [vmem:[#allocation26_spill] sm:$0xff]  ;;  %v9240_v21 = vld [vmem:[#allocation27_spill] sm:$0xff]  ;;  %v9243_v36 = vld [vmem:[#allocation29_spill] sm:$0xff] }
0x13b7   : > { %7069 = vpow2.f32 %v3918_v38  ;;  %v6675_v31 = vunpack.i.h.bf16 %v6673_v4  ;;  %v6674_v2 = vunpack.i.l.bf16 %v6673_v4  ;;  %3932 = vadd.xlane.f32.xlu1 %v3931_v9  ;;  %v9238_v48 = vpack.i.bf16 %v9236_v54, %v9237_v42  ;;  %v4407_v62 = vld [vmem:[#allocation10 + $0x38] sm:$0xff]  ;;  %v4412_v42 = vld [vmem:[#allocation10 + $0x60] sm:$0xff] }
0x13b8   : > { %v8817_v33 = vpop.eup %7061  ;;  %v9241_v53 = vpack.i.bf16 %v9239_v8, %v9240_v21  ;;  %v9244_v40 = vpack.i.bf16 %v9242_v3, %v9243_v36  ;;  %v4414_v21 = vld [vmem:[#allocation10 + $0x70] sm:$0xff] }
0x13b9   : > { %v8819_v61 = vpop.eup %7063  ;;  %v6265_v45 = vpack.c.bf16 %v6675_v31, %v6674_v2  ;;  %v3937_v41 = vsel %vm963_vm2, %v8817_v33, 0.0 }
0x13ba   : > { %v3928_v27 = vsel %vm963_vm2, %v8819_v61, 0.0 }
0x13bb   : > { %3938 = vadd.xlane.f32.xlu1 %v3937_v41  ;;  %3929 = vadd.xlane.f32.xlu0 %v3928_v27 }
0x13bc   : > { %v8825_v29 = vpop.eup %7065  ;;  %6266 = vmatprep.subr.bf16.mxu0 %v6265_v45 }
0x13bd   : > { %v8827_v23 = vpop.eup %7067  ;;  %6268 = vmatpush3.bf16.msra.mxu0 %v6265_v45  ;;  %v3943_v60 = vsel %vm963_vm2, %v8825_v29, 0.0 }
0x13be   : > { %6270 = vmatprep.subr.bf16.mxu0 %v6269_v56  ;;  %v3934_v22 = vsel %vm963_vm2, %v8827_v23, 0.0 }
0x13bf   : > { %3944 = vadd.xlane.f32.xlu1 %v3943_v60  ;;  %3935 = vadd.xlane.f32.xlu0 %v3934_v22 }
0x13c1   : > { %v8833_v25 = vpop.eup %7069  ;;  %6272 = vmatpush3.bf16.msra.mxu0 %v6269_v56 }
0x13c2   : > { %v3940_v46 = vsel %vm963_vm2, %v8833_v25, 0.0 }
0x13c3   : > { %3941 = vadd.xlane.f32.xlu1 %v3940_v46 }
0x13d4   : > { %6687 = vrot.lane.b32.xlu1 %v7941_v51, %s7326_s15  ;;  %v9221_v51 = vpack.i.bf16 %v8337_v39, %v8339_v63  ;;  %v9233_v39 = vld [vmem:[#allocation32_spill] sm:$0xff]  ;;  %v9234_v63 = vld [vmem:[#allocation33_spill] sm:$0xff] }
0x13d5   : > { %6682 = vrot.lane.b32.xlu0 %v7935_v17, %s7326_s15  ;;  %v9222_v17 = vpack.i.bf16 %v8625_v13, %v8627_v59  ;;  %v9235_v15 = vpack.i.bf16 %v9233_v39, %v9234_v63  ;;  %v9245_v13 = vld [vmem:[#allocation30_spill] sm:$0xff]  ;;  %v9246_v59 = vld [vmem:[#allocation31_spill] sm:$0xff]  ;;  %v4410_v63 = vld [vmem:[#allocation10 + $0x50] sm:$0xff] }
0x13d6   : > { %v9247_v24 = vpack.i.bf16 %v9245_v13, %v9246_v59 }
0x13d8   : > { %6697 = vrot.lane.b32.xlu1 %v9218_v28, %s7325_s24 }
0x13d9   : > { %6692 = vrot.lane.b32.xlu0 %v9219_v10, %s7326_s15 }
0x13dc   : > { %6707 = vrot.lane.b32.xlu1 %v9220_v6, %s7323_s16 }
0x13dd   : > { %6702 = vrot.lane.b32.xlu0 %v9221_v51, %s7324_s23 }
0x13e0   : > { %6717 = vrot.lane.b32.xlu1 %v9222_v17, %s7322_s18 }
0x13e1   : > { %6712 = vrot.lane.b32.xlu0 %v9223_v55, %s7326_s15 }
0x13e4   : > { %6727 = vrot.lane.b32.xlu1 %v6726_v49, %s7321_s29 }
0x13e5   : > { %6722 = vrot.lane.b32.xlu0 %v9224_v26, %s7325_s24  ;;  %v4402_v26 = vld [vmem:[#allocation10 + $0x10] sm:$0xff] }
0x13e8   : > { %6742 = vrot.lane.b32.xlu1 %v9225_v47, %s7326_s15 }
0x13e9   : > { %6732 = vrot.lane.b32.xlu0 %v9226_v35, %s7324_s23  ;;  %v4403_v35 = vld [vmem:[#allocation10 + $0x18] sm:$0xff] }
0x13ec   : > { %6752 = vrot.lane.b32.xlu1 %v9227_v37, %s7325_s24  ;;  %v6285_v37 = vpack.c.bf16 %v4403_v35, %v4402_v26  ;;  %v9255_v26 = vld [vmem:[#allocation18_spill] sm:$0xff] }
0x13ed   : > { %6737 = vrot.lane.b32.xlu0 %v9228_v20, %s7323_s16  ;;  %v4404_v20 = vld [vmem:[#allocation10 + $0x20] sm:$0xff] }
0x13f0   : > { %6762 = vrot.lane.b32.xlu1 %v9229_v57, %s7324_s23  ;;  %v4405_v57 = vld [vmem:[#allocation10 + $0x28] sm:$0xff] }
0x13f1   : > { %6747 = vrot.lane.b32.xlu0 %v9232_v12, %s7322_s18  ;;  %v4409_v12 = vld [vmem:[#allocation10 + $0x48] sm:$0xff] }
0x13f4   : > { %6767 = vrot.lane.b32.xlu1 %v9235_v15, %s7323_s16  ;;  %v4411_v15 = vld [vmem:[#allocation10 + $0x58] sm:$0xff] }
0x13f5   : > { %6757 = vrot.lane.b32.xlu0 %v6756_v44, %s7321_s29  ;;  %v6301_v54 = vpack.c.bf16 %v4411_v15, %v4410_v63 }
0x13f8   : > { %6777 = vrot.lane.b32.xlu1 %v9238_v48, %s7322_s18  ;;  %v4413_v48 = vld [vmem:[#allocation10 + $0x68] sm:$0xff] }
0x13f9   : > { %6772 = vrot.lane.b32.xlu0 %v9241_v53, %s7326_s15  ;;  %v6305_v8 = vpack.c.bf16 %v4413_v48, %v4412_v42  ;;  %v4415_v53 = vld [vmem:[#allocation10 + $0x78] sm:$0xff] }
0x13fa   : > { %v6309_v3 = vpack.c.bf16 %v4415_v53, %v4414_v21  ;;  %v9257_v53 = vld [vmem:[#allocation21_spill] sm:$0xff] }
0x13fc   : > { %6787 = vrot.lane.b32.xlu1 %v6786_v16, %s7321_s29 }
0x13fd   : > { %6782 = vrot.lane.b32.xlu0 %v9244_v40, %s7325_s24 }
0x1401   : > { %6792 = vrot.lane.b32.xlu0 %v9247_v24, %s7324_s23  ;;  %s7327_s23 = smov [#allocation11]  }
0x1402   : > { %s7241_s24 = sshll.u32 %s7327_s23, 4  ;;  %s7242_s24 = int_to_ptr.vmem [resolvable:$false] %s7241_s24 }
0x1403   : > { %s7243_s15 = scalar_lea.vmem %s7242_s24, 2048  ;;  %p7244_p12 = scmp.lt.s32.totalorder %s9090_s21, %s7242_s24 }
0x143f   : > { %v3927_v30 = vpop.xlane.xlu1 %3926 }
0x1440   : > { %v3924_v49 = vpop.xlane.xlu0 %3923 }
0x1441   : > { %7071 = vrcp.f32 %v3924_v49  ;;  %v9248_v49 = vld [vmem:[#allocation40_spill] sm:$0xff] }
0x1442   : > { %7073 = vrcp.f32 %v3927_v30 }
0x1444   : > { %v3933_v32 = vpop.xlane.xlu1 %3932 }
0x1448   : > { %v3939_v34 = vpop.xlane.xlu1 %3938  ;;  %v3930_v44 = vpop.xlane.xlu0 %3929 }
0x1449   : > { %7075 = vrcp.f32 %v3930_v44 }
0x144a   : > { %7077 = vrcp.f32 %v3933_v32  ;;  %v9249_v32 = vld [vmem:[#allocation41_spill] sm:$0xff] }
0x144b   : > { %v7072_v1 = vpop.eup %7071 }
0x144c   : > { %v3945_v38 = vpop.xlane.xlu1 %3944  ;;  %v3936_v43 = vpop.xlane.xlu0 %3935  ;;  %v3947_v50 = vmul.f32 %v7072_v1, %v8807_v7 }
0x144d   : > { %7079 = vrcp.f32 %v3936_v43  ;;  %v7074_v7 = vpop.eup %7073  ;;  %v9251_v43 = vld [vmem:[#allocation34_spill] sm:$0xff] }
0x144e   : > { %5809 = vmatprep.mubr.msk.f32.mxu0 %vm963_vm2, %v3947_v50  ;;  %7081 = vrcp.f32 %v3939_v34  ;;  %v3949_v56 = vmul.f32 %v7074_v7, %v8805_v18  ;;  %v9250_v34 = vpack.i.bf16 %v9248_v49, %v9249_v32  ;;  %v9252_v50 = vld [vmem:[#allocation35_spill] sm:$0xff] }
0x1450   : > { %v3942_v16 = vpop.xlane.xlu1 %3941  ;;  %v6683_v4 = vpop.permute.xlu0 %6682 }
0x1451   : > { %v6685_v9 = vunpack.i.h.bf16 %v6683_v4  ;;  %v6684_v31 = vunpack.i.l.bf16 %v6683_v4  ;;  %7083 = vrcp.f32 %v3942_v16  ;;  %v9253_v16 = vpack.i.bf16 %v9251_v43, %v9252_v50 }
0x1452   : > { %7085 = vrcp.f32 %v3945_v38 }
0x1453   : > { %v6273_v2 = vpack.c.bf16 %v6685_v9, %v6684_v31  ;;  %v7076_v27 = vpop.eup %7075 }
0x1454   : > { %v6688_v19 = vpop.permute.xlu1 %6687  ;;  %v7078_v60 = vpop.eup %7077  ;;  %v3951_v22 = vmul.f32 %v7076_v27, %v8819_v61 }
0x1455   : > { %v6690_v11 = vunpack.i.h.bf16 %v6688_v19  ;;  %v6689_v45 = vunpack.i.l.bf16 %v6688_v19  ;;  %6274 = vmatprep.subr.bf16.mxu0 %v6273_v2  ;;  %v3953_v28 = vmul.f32 %v7078_v60, %v8813_v0  ;;  %v4400_v0 = vld [vmem:[#allocation10] sm:$0xff] }
0x1456   : > { %6276 = vmatpush3.bf16.msra.mxu0 %v6273_v2  ;;  %v6693_v2 = vpop.permute.xlu0 %6692 }
0x1457   : > { %v6277_v41 = vpack.c.bf16 %v6690_v11, %v6689_v45  ;;  %v7080_v46 = vpop.eup %7079 }
0x1458   : > { %v7082_v10 = vpop.eup %7081  ;;  %v3955_v6 = vmul.f32 %v7080_v46, %v8827_v23  ;;  %v4401_v23 = vld [vmem:[#allocation10 + $0x8] sm:$0xff]  ;;  %v6698_v19 = vpop.permute.xlu1 %6697 }
0x1459   : > { %6278 = vmatprep.subr.bf16.mxu0 %v6277_v41  ;;  %v3957_v18 = vmul.f32 %v7082_v10, %v8817_v33  ;;  %v6281_v47 = vpack.c.bf16 %v4401_v23, %v4400_v0  ;;  %v6289_v33 = vpack.c.bf16 %v4405_v57, %v4404_v20  ;;  %v6699_v10 = vunpack.i.l.bf16 %v6698_v19 }
0x145a   : > { %6280 = vmatpush3.bf16.msra.mxu0 %v6277_v41  ;;  %v6703_v11 = vpop.permute.xlu0 %6702 }
0x145b   : > { %v7084_v51 = vpop.eup %7083  ;;  %6282 = vmatprep.subr.bf16.mxu0 %v6281_v47  ;;  %v6704_v0 = vunpack.i.l.bf16 %v6703_v11  ;;  %v6705_v35 = vunpack.i.h.bf16 %v6703_v11 }
0x145c   : > { %v7086_v17 = vpop.eup %7085  ;;  %v3959_v61 = vmul.f32 %v7084_v51, %v8833_v25  ;;  %v4406_v25 = vld [vmem:[#allocation10 + $0x30] sm:$0xff]  ;;  %v6708_v45 = vpop.permute.xlu1 %6707  ;;  %v6695_v51 = vunpack.i.h.bf16 %v6693_v2 }
0x145d   : > { %5810 = vmatmul.mubr.msk.f32.vlgmr.msra.gmra.mrb[64].mxu0 %vm963_vm2, %v3949_v56  ;;  %v3961_v55 = vmul.f32 %v7086_v17, %v8825_v29  ;;  %v6293_v52 = vpack.c.bf16 %v4407_v62, %v4406_v25  ;;  %v4408_v29 = vld [vmem:[#allocation10 + $0x40] sm:$0xff]  ;;  %v6710_v57 = vunpack.i.h.bf16 %v6708_v45 }
0x145e   : > { %5812 = vmatprep.mubr.msk.f32.mxu0 %vm963_vm2, %v3951_v22  ;;  %6284 = vmatpush3.bf16.msra.mxu0 %v6281_v47  ;;  %v6297_v39 = vpack.c.bf16 %v4409_v12, %v4408_v29  ;;  %v6713_v41 = vpop.permute.xlu0 %6712  ;;  %v4340_v47 = vsel %vm801_vm0, %v9255_v26, %v6695_v51 }
0x145f   : > { %6286 = vmatprep.subr.bf16.mxu0 %v6285_v37  ;;  %v6714_v25 = vunpack.i.l.bf16 %v6713_v41 }
0x1460   : > { %v6718_v7 = vpop.permute.xlu1 %6717 }
0x1461   : > { %5813 = vmatmul.mubr.msk.f32.gmra.mrb[66].mxu0 %vm963_vm2, %v3953_v28  ;;  %v6720_v29 = vunpack.i.h.bf16 %v6718_v7  ;;  %v6719_v12 = vunpack.i.l.bf16 %v6718_v7 }
0x1462   : > { %5815 = vmatprep.mubr.msk.f32.mxu0 %vm963_vm2, %v3955_v6  ;;  %6288 = vmatpush3.bf16.msra.mxu0 %v6285_v37  ;;  %v6723_v27 = vpop.permute.xlu0 %6722  ;;  %v6709_v37 = vunpack.i.l.bf16 %v6708_v45  ;;  %v9258_v45 = vld [vmem:[#allocation23_spill] sm:$0xff] }
0x1463   : > { %6290 = vmatprep.subr.bf16.mxu0 %v6289_v33  ;;  %v6724_v63 = vunpack.i.l.bf16 %v6723_v27 }
0x1464   : > { %v8957_v56 = vpop.permute.xlu1 %6727 }
0x1465   : > { %5816 = vmatmul.mubr.msk.f32.gmra.mrb[68].mxu0 %vm963_vm2, %v3957_v18  ;;  %v6700_v18 = vunpack.i.h.bf16 %v6698_v19 }
0x1466   : > { %5818 = vmatprep.mubr.msk.f32.mxu0 %vm963_vm2, %v3959_v61  ;;  %6292 = vmatpush3.bf16.msra.mxu0 %v6289_v33  ;;  %v6733_v60 = vpop.permute.xlu0 %6732  ;;  %v9254_v61 = vld [vmem:[#allocation19_spill] sm:$0xff]  ;;  %v6715_v33 = vunpack.i.h.bf16 %v6713_v41 }
0x1467   : > { %6294 = vmatprep.subr.bf16.mxu0 %v6293_v52  ;;  %v4349_v20 = vsel %vm4347_vm3, %v4340_v47, %v6700_v18 }
0x1468   : > { %v8959_v22 = vpop.permute.xlu1 %6742 }
0x1469   : > { %5819 = vmatmul.mubr.msk.f32.gmra.mrb[70].mxu0 %vm963_vm2, %v3961_v55 }
0x146a   : > { %6296 = vmatpush3.bf16.msra.mxu0 %v6293_v52  ;;  %v8961_v46 = vpop.permute.xlu0 %6737 }
0x146b   : > { %6298 = vmatprep.subr.bf16.mxu0 %v6297_v39  ;;  %v6739_v43 = vunpack.i.l.bf16 %v8961_v46 }
0x146c   : > { %v8963_v28 = vpop.permute.xlu1 %6752 }
0x146d   : > { %v6754_v50 = vunpack.i.l.bf16 %v8963_v28 }
0x146e   : > { %6300 = vmatpush3.bf16.msra.mxu0 %v6297_v39  ;;  %v8965_v5 = vpop.permute.xlu0 %6747  ;;  %v6725_v39 = vunpack.i.h.bf16 %v6723_v27 }
0x146f   : > { %6302 = vmatprep.subr.bf16.mxu0 %v6301_v54 }
0x1470   : > { %v8967_v14 = vpop.permute.xlu1 %6762 }
0x1471   : > { %v6765_v27 = vunpack.i.h.bf16 %v8967_v14 }
0x1472   : > { %6304 = vmatpush3.bf16.msra.mxu0 %v6301_v54  ;;  %v8969_v6 = vpop.permute.xlu0 %6757  ;;  %v4358_v54 = vsel %vm4356_vm4, %v4349_v20, %v6705_v35 }
0x1473   : > { %6306 = vmatprep.subr.bf16.mxu0 %v6305_v8  ;;  %v4366_v48 = vsel %vm963_vm2, %v4358_v54, %v6710_v57 }
0x1474   : > { %v8971_v17 = vpop.permute.xlu1 %6767 }
0x1476   : > { %6308 = vmatpush3.bf16.msra.mxu0 %v6305_v8  ;;  %v8979_v62 = vpop.permute.xlu0 %6772  ;;  %v9256_v8 = vld [vmem:[#allocation20_spill] sm:$0xff] }
0x1477   : > { %6310 = vmatprep.subr.bf16.mxu0 %v6309_v3  ;;  %v4342_v21 = vsel %vm801_vm0, %v9256_v8, %v6715_v33  ;;  %v6775_v57 = vunpack.i.h.bf16 %v8979_v62  ;;  %v6774_v33 = vunpack.i.l.bf16 %v8979_v62 }
0x1478   : > { %v8982_v15 = vpop.permute.xlu1 %6777  ;;  %v4351_v32 = vsel %vm4347_vm3, %v4342_v21, %v6725_v39 }
0x147a   : > { %6312 = vmatpush3.bf16.msra.mxu0 %v6309_v3  ;;  %v4341_v3 = vsel %vm801_vm0, %v9257_v53, %v6714_v25 }
0x147b   : > { %v4350_v49 = vsel %vm4347_vm3, %v4341_v3, %v6724_v63 }
0x1530   : > { %v5811_v36 = vpop.f32.mrb[64].mxu0 }
0x1531   : > { %v4076_v40 = vpop.f32.mrb[65].mxu0 }
0x1532   : > { %v6796_v13 = vpack.i.bf16 %v5811_v36, %v4076_v40  ;;  %v6730_v36 = vunpack.i.h.bf16 %v8957_v56  ;;  %v6729_v40 = vunpack.i.l.bf16 %v8957_v56  ;;  %v6764_v56 = vunpack.i.l.bf16 %v8967_v14 }
0x1534   : > { %6797 = vrot.lane.b32.xlu1 %v6796_v13, %s7320_s20  ;;  %v5814_v59 = vpop.f32.mrb[66].mxu0  ;;  %v6735_v13 = vunpack.i.h.bf16 %v6733_v60 }
0x1535   : > { %v4086_v24 = vpop.f32.mrb[67].mxu0 }
0x1536   : > { %v6801_v30 = vpack.i.bf16 %v5814_v59, %v4086_v24  ;;  %v6734_v59 = vunpack.i.l.bf16 %v6733_v60  ;;  %v6744_v24 = vunpack.i.l.bf16 %v8959_v22  ;;  %v4360_v11 = vsel %vm4356_vm4, %v4351_v32, %v6735_v13  ;;  %v9261_v13 = vld [vmem:[#allocation25_spill] sm:$0xff] }
0x1537   : > { %v6760_v60 = vunpack.i.h.bf16 %v8969_v6 }
0x1538   : > { %6812 = vrot.lane.b32.xlu1 %v9250_v34, %s7322_s18  ;;  %6802 = vrot.lane.b32.xlu0 %v6801_v30, %s7320_s20  ;;  %v5817_v44 = vpop.f32.mrb[68].mxu0  ;;  %v4375_v30 = vsel %vm4373_vm5, %v4366_v48, %v6720_v29  ;;  %v8997_v34 = vpop.permute.xlu0 %6782  ;;  %v4359_v19 = vsel %vm4356_vm4, %v4350_v49, %v6734_v59  ;;  %v4343_v41 = vsel %vm801_vm0, %v9258_v45, %v6744_v24  ;;  %v6779_v29 = vunpack.i.l.bf16 %v8982_v15 }
0x1539   : > { %v4096_v1 = vpop.f32.mrb[69].mxu0  ;;  %v6784_v39 = vunpack.i.l.bf16 %v8997_v34  ;;  %v4345_v59 = vsel %vm801_vm0, %v9261_v13, %v6774_v33 }
0x153a   : > { %v6816_v38 = vpack.i.bf16 %v5817_v44, %v4096_v1  ;;  %v6745_v1 = vunpack.i.h.bf16 %v8959_v22  ;;  %v6759_v22 = vunpack.i.l.bf16 %v8969_v6  ;;  %v6770_v6 = vunpack.i.h.bf16 %v8971_v17 }
0x153b   : > { %v4354_v49 = vsel %vm4347_vm3, %v4345_v59, %v6784_v39  ;;  %v7090_v39 = vld [vmem:[%s7612_s9 + $0x10] sm:$0xff]  ;;  %v7093_v59 = vld [vmem:[%s7612_s9 + $0x38] sm:$0xff] }
0x153c   : > { %6807 = vrot.lane.b32.xlu0 %v9253_v16, %s7323_s16  ;;  %6817 = vrot.lane.b32.xlu1 %v6816_v38, %s7320_s20  ;;  %v5820_v4 = vpop.f32.mrb[70].mxu0  ;;  %v6740_v38 = vunpack.i.h.bf16 %v8961_v46  ;;  %v4384_v16 = vsel %vm4382_vm6, %v4375_v30, %v6730_v36  ;;  %v9259_v46 = vld [vmem:[#allocation22_spill] sm:$0xff]  ;;  %v6793_v18 = vpop.permute.xlu0 %6792  ;;  %v9260_v36 = vld [vmem:[#allocation24_spill] sm:$0xff]  ;;  %s7237_s16 = scalar_lea.vmem %s9090_s21, 1024 }
0x153d   : > { %v4106_v9 = vpop.f32.mrb[71].mxu0  ;;  %v6795_v3 = vunpack.i.h.bf16 %v6793_v18  ;;  %p7238_p3 = scmp.ne.s32.totalorder %s9090_s21, %s7237_s16  ;;  %p7245_p1 = scmp.lt.s32.totalorder %s7243_s15, %s7237_s16 }
0x153e   : > { %v6826_v31 = vpack.i.bf16 %v5820_v4, %v4106_v9  ;;  %v6755_v4 = vunpack.i.h.bf16 %v8963_v28  ;;  %v6750_v9 = vunpack.i.h.bf16 %v8965_v5  ;;  %v4344_v28 = vsel %vm801_vm0, %v9259_v46, %v6745_v1 }
0x153f   : > { %p7239_p5 = pnand %p7238_p3, %p7551_p10  ;;  %p7246_p2 = por %p7245_p1, %p7244_p12 }
0x1540   : > { %6822 = vrot.lane.b32.xlu0 %v6821_v58, %s7321_s29  ;;  %6827 = vrot.lane.b32.xlu1 %v6826_v31, %s7320_s20  ;;  %v6694_v58 = vunpack.i.l.bf16 %v6693_v2  ;;  %v6749_v31 = vunpack.i.l.bf16 %v8965_v5  ;;  %v9008_v2 = vpop.permute.xlu1 %6787  ;;  %v4367_v5 = vsel %vm963_vm2, %v4359_v19, %v6739_v43  ;;  %v4353_v51 = vsel %vm4347_vm3, %v4344_v28, %v6755_v4  ;;  %s9262_s29 = sld [smem:[#allocation42_spill]] }
0x1541   : > { %v4362_v35 = vsel %vm4356_vm4, %v4353_v51, %v6765_v27  ;;  %v6790_v21 = vunpack.i.h.bf16 %v9008_v2  ;;  %v6789_v53 = vunpack.i.l.bf16 %v9008_v2  ;;  %p7240_p7 = pneg %p7239_p5 }
0x1542   : > { %v4339_v55 = vsel %vm801_vm0, %v9254_v61, %v6694_v58  ;;  %v4368_v58 = vsel %vm963_vm2, %v4360_v11, %v6740_v38  ;;  %v4376_v14 = vsel %vm4373_vm5, %v4367_v5, %v6749_v31  ;;  %v4370_v48 = vsel %vm963_vm2, %v4362_v35, %v6770_v6  ;;  %v4881_v6 = vld [vmem:[%s9151_s8] ss:$0 sm:$0xff]  ;;  %v7087_v35 = vld [vmem:[%s7612_s9 + $0x8] sm:$0xff] }
0x1543   : > { %v4348_v23 = vsel %vm4347_vm3, %v4339_v55, %v6699_v10  ;;  %v4352_v10 = vsel %vm4347_vm3, %v4343_v41, %v6754_v50  ;;  %v4377_v55 = vsel %vm4373_vm5, %v4368_v58, %v6750_v9  ;;  %p7247_p13 = pnand %p7246_p2, %p7240_p7 }
0x1544   : > { %v4357_v52 = vsel %vm4356_vm4, %v4348_v23, %v6704_v0  ;;  %v6769_v0 = vunpack.i.l.bf16 %v8971_v17  ;;  %v4361_v47 = vsel %vm4356_vm4, %v4352_v10, %v6764_v56  ;;  %v4386_v20 = vsel %vm4382_vm6, %v4377_v55, %v6760_v60 }
0x1545   : > { %v4365_v42 = vsel %vm963_vm2, %v4357_v52, %v6709_v37  ;;  %v4385_v37 = vsel %vm4382_vm6, %v4376_v14, %v6759_v22  ;;  %v6780_v17 = vunpack.i.h.bf16 %v8982_v15  ;;  %v6794_v15 = vunpack.i.l.bf16 %v6793_v18 }
0x1546   : > { %v4374_v44 = vsel %vm4373_vm5, %v4365_v42, %v6719_v12  ;;  %v6785_v12 = vunpack.i.h.bf16 %v8997_v34  ;;  %v4369_v42 = vsel %vm963_vm2, %v4361_v47, %v6769_v0  ;;  %s9096_s18 = scalar_lea.hbm %s9262_s29, %s4888_s19 }
0x1547   : > { %v4383_v7 = vsel %vm4382_vm6, %v4374_v44, %v6729_v40  ;;  %v4346_v40 = vsel %vm801_vm0, %v9260_v36, %v6775_v57  ;;  %v4378_v1 = vsel %vm4373_vm5, %v4369_v42, %v6779_v29  ;;  %v4379_v38 = vsel %vm4373_vm5, %v4370_v48, %v6780_v17  ;;  %v7089_v29 = vld [vmem:[%s7612_s9 + $0x18] sm:$0xff] }
0x1548   : > { %v4355_v32 = vsel %vm4347_vm3, %v4346_v40, %v6785_v12  ;;  %v4363_v9 = vsel %vm4356_vm4, %v4354_v49, %v6794_v15  ;;  %v4387_v2 = vsel %vm4382_vm6, %v4378_v1, %v6789_v53  ;;  %v4388_v19 = vsel %vm4382_vm6, %v4379_v38, %v6790_v21  ;;  %v7092_v53 = vld [vmem:[%s7612_s9 + $0x20] sm:$0xff] }
0x1549   : > { %v4364_v31 = vsel %vm4356_vm4, %v4355_v32, %v6795_v3 }
0x15a6   : > { %v6798_v61 = vpop.permute.xlu1 %6797 }
0x15a7   : > { %v6800_v23 = vunpack.i.h.bf16 %v6798_v61  ;;  %v6799_v26 = vunpack.i.l.bf16 %v6798_v61 }
0x15a9   : > { %v4392_v25 = vsel %vm4391_vm7, %v4383_v7, %v6799_v26  ;;  %v4393_v52 = vsel %vm4391_vm7, %v4384_v16, %v6800_v23 }
0x15aa   : > { %v6813_v63 = vpop.permute.xlu1 %6812  ;;  %5853 = vmatprep.mubr.f32.mxu0 %v4392_v25  ;;  %v6803_v54 = vpop.permute.xlu0 %6802 }
0x15ab   : > { %v6805_v62 = vunpack.i.h.bf16 %v6803_v54  ;;  %v6804_v8 = vunpack.i.l.bf16 %v6803_v54  ;;  %5854 = vmatmul.mubr.f32.vlgmr.msra.gmra.mrb[72].mxu0 %v4393_v52  ;;  %v6815_v27 = vunpack.i.h.bf16 %v6813_v63  ;;  %v6814_v56 = vunpack.i.l.bf16 %v6813_v63 }
0x15ad   : > { %v4394_v24 = vsel %vm4391_vm7, %v4385_v37, %v6804_v8  ;;  %v4395_v30 = vsel %vm4391_vm7, %v4386_v20, %v6805_v62  ;;  %v7088_v20 = vld [vmem:[%s7612_s9] sm:$0xff]  ;;  %v7091_v8 = vld [vmem:[%s7612_s9 + $0x28] sm:$0xff] }
0x15ae   : > { %v6808_v34 = vpop.permute.xlu0 %6807  ;;  %5856 = vmatprep.mubr.f32.mxu0 %v4394_v24  ;;  %v6818_v44 = vpop.permute.xlu1 %6817 }
0x15af   : > { %v6810_v43 = vunpack.i.h.bf16 %v6808_v34  ;;  %v6809_v50 = vunpack.i.l.bf16 %v6808_v34  ;;  %v6820_v16 = vunpack.i.h.bf16 %v6818_v44  ;;  %v6819_v4 = vunpack.i.l.bf16 %v6818_v44  ;;  %5857 = vmatmul.mubr.f32.gmra.mrb[74].mxu0 %v4395_v30  ;;  %v7094_v30 = vld [vmem:[%s7612_s9 + $0x30] sm:$0xff] }
0x15b1   : > { %v4372_v11 = vsel %vm963_vm2, %v4364_v31, %v6810_v43  ;;  %v4371_v45 = vsel %vm963_vm2, %v4363_v9, %v6809_v50  ;;  %v4396_v41 = vsel %vm4391_vm7, %v4387_v2, %v6819_v4  ;;  %v4397_v7 = vsel %vm4391_vm7, %v4388_v19, %v6820_v16 }
0x15b2   : > { %v6823_v60 = vpop.permute.xlu0 %6822  ;;  %5859 = vmatprep.mubr.f32.mxu0 %v4396_v41  ;;  %v6828_v22 = vpop.permute.xlu1 %6827  ;;  %v4380_v10 = vsel %vm4373_vm5, %v4371_v45, %v6814_v56  ;;  %v4381_v51 = vsel %vm4373_vm5, %v4372_v11, %v6815_v27 }
0x15b3   : > { %v6825_v46 = vunpack.i.h.bf16 %v6823_v60  ;;  %v6824_v28 = vunpack.i.l.bf16 %v6823_v60  ;;  %v6830_v5 = vunpack.i.h.bf16 %v6828_v22  ;;  %v6829_v58 = vunpack.i.l.bf16 %v6828_v22  ;;  %5860 = vmatmul.mubr.f32.gmra.mrb[76].mxu0 %v4397_v7 }
0x15b5   : > { %v4389_v18 = vsel %vm4382_vm6, %v4380_v10, %v6824_v28  ;;  %v4390_v61 = vsel %vm4382_vm6, %v4381_v51, %v6825_v46 }
0x15b6   : > { %v4398_v14 = vsel %vm4391_vm7, %v4389_v18, %v6829_v58  ;;  %v4399_v55 = vsel %vm4391_vm7, %v4390_v61, %v6830_v5 }
0x15b7   : > { %5862 = vmatprep.mubr.f32.mxu0 %v4398_v14 }
0x15b8   : > { %5863 = vmatmul.mubr.f32.gmra.mrb[78].mxu0 %v4399_v55 }
0x167e   : > { %v5855_v0 = vpop.f32.mrb[72].mxu0 }
0x167f   : > { %v4495_v23 = vadd.f32 %v5855_v0, %v4881_v6  ;;  %v4489_v26 = vpop.f32.mrb[73].mxu0 }
0x1680   : > { %v4490_v47 = vadd.f32 %v4881_v6, %v4489_v26 }
0x1681   : > { %v4529_v37 = vadd.f32 %v7087_v35, %v4495_v23 }
0x1682   : > { %v4528_v57 = vadd.f32 %v7088_v20, %v4490_v47  ;;  %v5858_v33 = vpop.f32.mrb[74].mxu0 }
0x1683   : > { %4537 = vst [vmem:[%s9076_s26 + $0x8] sm:$0xff] %v4529_v37  ;;  %v4505_v25 = vadd.f32 %v5858_v33, %v4881_v6  ;;  %v4499_v52 = vpop.f32.mrb[75].mxu0 }
0x1684   : > { %4536 = vst [vmem:[%s9076_s26] sm:$0xff] %v4528_v57  ;;  %v4500_v17 = vadd.f32 %v4881_v6, %v4499_v52 }
0x1685   : > { %v4531_v12 = vadd.f32 %v7089_v29, %v4505_v25 }
0x1686   : > { %v4530_v63 = vadd.f32 %v7090_v39, %v4500_v17  ;;  %v5861_v54 = vpop.f32.mrb[76].mxu0 }
0x1687   : > { %4539 = vst [vmem:[%s9076_s26 + $0x18] sm:$0xff] %v4531_v12  ;;  %v4515_v42 = vadd.f32 %v5861_v54, %v4881_v6  ;;  %v4509_v48 = vpop.f32.mrb[77].mxu0 }
0x1688   : > { %4538 = vst [vmem:[%s9076_s26 + $0x10] sm:$0xff] %v4530_v63  ;;  %v4510_v62 = vadd.f32 %v4881_v6, %v4509_v48 }
0x1689   : > { %v4533_v21 = vadd.f32 %v7091_v8, %v4515_v42 }
0x168a   : > { %v4532_v3 = vadd.f32 %v7092_v53, %v4510_v62 }
0x168b   : > { %4541 = vst [vmem:[%s9076_s26 + $0x28] sm:$0xff] %v4533_v21  ;;  %v5864_v15 = vpop.f32.mrb[78].mxu0 }
0x168c   : > { %4540 = vst [vmem:[%s9076_s26 + $0x20] sm:$0xff] %v4532_v3  ;;  %v4525_v36 = vadd.f32 %v5864_v15, %v4881_v6  ;;  %v4519_v40 = vpop.f32.mrb[79].mxu0 }
0x168d   : > { %v4520_v13 = vadd.f32 %v4881_v6, %v4519_v40 }
0x168e   : > { %v4535_v24 = vadd.f32 %v7093_v59, %v4525_v36 }
0x168f   : > { %v4534_v49 = vadd.f32 %v7094_v30, %v4520_v13 }
0x1690   : > { %4543 = vst [vmem:[%s9076_s26 + $0x38] sm:$0xff] %v4535_v24 }
0x1691   : > { %4542 = vst [vmem:[%s9076_s26 + $0x30] sm:$0xff] %v4534_v49 }
0x1692   : > { %7250 = shalt.err (!%p7247_p13)
}
0x1693   : > { %s7251_s9 = scalar_lea.hbm %s9096_s18, 1024  ;;  %s7255_s26 = scalar_lea.hbm %s9262_s29, 2048 }
0x1694   : > { %p7252_p9 = scmp.ne.s32.totalorder %s9096_s18, %s7251_s9  ;;  %p7256_p4 = scmp.lt.u32.totalorder %s9096_s18, %s9262_s29 }
0x1695   : > { %p7257_p8 = scmp.lt.u32.totalorder %s7255_s26, %s7251_s9  ;;  %p7259_p3 = scmp.lt.u32.totalorder %s7251_s9, %s9096_s18 }
0x1696   : > { %p7253_p0 = pnand %p7252_p9, %p7551_p10 }
0x1697   : > { %p7258_p6 = por %p7257_p8, %p7256_p4 }
0x1698   : > { %p7254_p11 = pneg %p7253_p0 }
0x1699   : > { %p7260_p5 = por %p7259_p3, %p7258_p6 }
0x169b   : > { %p7261_p7 = pnand %p7260_p5, %p7254_p11 }
0x169d   : > { %7264 = shalt.err (!%p7261_p7)
}
0x169e   : > { %s7328_s20 = smov 128   ;;  %s7329_s16 = smov 8  }
0x169f   : > { %6331 = dma.vmem_to_hbm [thread:$0]  (%p7551_p10), %s9090_s21, 1024, %s9096_s18, %s4545_s13, %s7328_s20, %s7328_s20, %s7329_s16  }
0x16a0 PF: > { %s9263_s23 = sld [smem:[#allocation16_spill]]  ;;  %s9264_s24 = sld [smem:[#allocation17_spill]] }
0x16a1   : > { %p9266_p1 = scmp.ge.s32.totalorder %s7311_s12, 2 }
0x16a6   : > { %s4573_s15 = sand.u32 1, %s9263_s23   ;;  %p9265_p12 = scmp.ne.s32.totalorder %s9264_s24, 0 }
0x16a7   : > { %s4574_s9 = scalar_lea.sflag [#allocation4], %s4573_s15 }
0x16a8   : > { %p6351_p2 = pnand %p9266_p1, %p9265_p12 }
0x16aa   : > { %7294 = dma.done.wait (!%p6351_p2), %s4574_s9, 1024  }
0x16ab   : > { %7296 = vsyncadd (!%p6351_p2), %s4574_s9, 4294966272  ;;  %p24_p13 = scmp.ge.s32.totalorder %s7541_s14, 4   ;;  %s9267_s30 = smov %s7303_s10 }
0x16ac   : > { %s9268_s10 = smov %s7307_s11  ;;  %s9269_s11 = smov %s7557_s28 }
0x16ad   : > { %s9270_s12 = smov %s7541_s14  ;;  %26 = sbr.rel (!%p24_p13) target bundleno = 9 (0x9), region = 117 }
0x16b4   :  { %4579 = vsyncpa [#allocation3], 1 }
0x16b5   :  { %4581 = vsyncpa [#allocation3 + $0x1], 1 }
0x16b6   :  { %4582 = vsyncpa [#allocation6], 1 }
0x16b7   :  { %4583 = vsyncpa [#allocation9], 1 }
0x16b8   :  { %4584 = vsyncpa [#allocation4], 1 }
0x16b9   :  { %4586 = vsyncpa [#allocation4 + $0x1], 1 }

</bundles_post_ra>
